<compile_context>
chip_gen: v7x
topology: tpu7x:2x2x1
jax: 0.10.0
libtpu: 0.0.40
codegen_flags: <defaults>
</compile_context>

<pallas_src>
import functools

import jax
import jax.numpy as jnp
from jax.experimental import pallas as pl
from jax.experimental.pallas import tpu as pltpu


def _dwconv_kernel(x_ref, xt_ref, xb_ref, w_ref, b_ref, o_ref, *, TH, W):
    """Depthwise 3x3 conv (pad 1, bias) on one TH-row NHWC block.

    x_ref : (1, TH, W, C)  center rows of this block
    xt_ref: (1, 1,  W, C)  row above the block (clamped; masked when j == 0)
    xb_ref: (1, 1,  W, C)  row below the block (clamped; masked when j == last)
    w_ref : (3, 3, C)      depthwise taps, channels on lanes
    b_ref : (1, C)         bias
    o_ref : (1, TH, W, C)  output block
    """
    j = pl.program_id(1)
    n_j = pl.num_programs(1)

    wts = w_ref[...].astype(jnp.float32)            # (3, 3, C), read once
    bias = b_ref[...].astype(jnp.float32)           # (1, C)

    # Halo rows, zeroed at the image border (this implements padding=1).
    top = jnp.where(j > 0, xt_ref[0, 0].astype(jnp.float32), 0.0)        # (W, C)
    bot = jnp.where(j < n_j - 1, xb_ref[0, 0].astype(jnp.float32), 0.0)  # (W, C)

    # Column-boundary mask for the horizontal (sublane-axis) shifts.
    col = jax.lax.broadcasted_iota(jnp.int32, (W, 1), 0)

    def prep(row):
        """row (W,C) -> (x[.,w-1], x[.,w], x[.,w+1]); shifts built once/row."""
        wm1 = jnp.where(col >= 1, pltpu.roll(row, shift=1, axis=0), 0.0)
        wp1 = jnp.where(col <= W - 2, pltpu.roll(row, shift=W - 1, axis=0), 0.0)
        return (wm1, row, wp1)

    def src(s):                                     # block-local row s in [-1, TH]
        if s == -1:
            return top
        if s == TH:
            return bot
        return x_ref[0, s].astype(jnp.float32)

    # Rolling 3-row window of prepared source rows (static Python unroll).
    win = [prep(src(-1)), prep(src(0)), prep(src(1))]
    for h in range(TH):
        # Fold the bias into the center tap -> no separate bias pass.
        acc = win[1][1] * wts[1, 1:2, :] + bias     # (W, C)
        for ky in range(3):                          # ky-1 = dy in {-1,0,+1}
            trio = win[ky]
            for kx in range(3):                      # kx-1 = dx in {-1,0,+1}
                if ky == 1 and kx == 1:
                    continue
                acc = acc + trio[kx] * wts[ky, kx:kx + 1, :]
        o_ref[0, h] = acc.astype(o_ref.dtype)
        if h + 1 < TH:                               # slide the window down one row
            win = [win[1], win[2], prep(src(h + 2))]


def dwconv_forward(x, H, W, w, b, *, row_block=8):
    """x: (B, N, C) with N == H*W; w: (3, 3, C); b: (C,). Returns (B, N, C)."""
    B, N, C = x.shape
    assert N == H * W, "sequence length must equal H*W"
    x_nhwc = x.reshape(B, H, W, C)   # free view; matches the NCHW dwconv exactly

    TH = max(1, min(row_block, H))
    while H % TH:                    # pick a row-block size that divides H
        TH -= 1
    n_blocks = H // TH

    cost = pl.CostEstimate(
        flops=2 * 9 * B * H * W * C,
        transcendentals=0,
        bytes_accessed=4 * (2 * B * H * W * C + 2 * B * n_blocks * W * C + 10 * C),
    )
    kern = functools.partial(_dwconv_kernel, TH=TH, W=W)
    y = pl.pallas_call(
        kern,
        out_shape=jax.ShapeDtypeStruct((B, H, W, C), x.dtype),
        grid=(B, n_blocks),
        in_specs=[
            # center rows of this block
            pl.BlockSpec((1, TH, W, C), lambda bi, j: (bi, j, 0, 0)),
            # one-row halo above (index clamped into the image; masked in-kernel)
            pl.BlockSpec((1, 1, W, C),
                         lambda bi, j: (bi, jnp.maximum(j * TH - 1, 0), 0, 0)),
            # one-row halo below
            pl.BlockSpec((1, 1, W, C),
                         lambda bi, j: (bi, jnp.minimum((j + 1) * TH, H - 1), 0, 0)),
            pl.BlockSpec((3, 3, C), lambda bi, j: (0, 0, 0)),
            pl.BlockSpec((1, C), lambda bi, j: (0, 0)),
        ],
        out_specs=pl.BlockSpec((1, TH, W, C), lambda bi, j: (bi, j, 0, 0)),
        compiler_params=pltpu.CompilerParams(
            dimension_semantics=("parallel", "arbitrary"),
        ),
        cost_estimate=cost,
    )(x_nhwc, x_nhwc, x_nhwc, w, b.reshape(1, C))
    return y.reshape(B, N, C)


def ref_forward(x, H, W, w, b):
    """Independent pure-JAX reference (lax depthwise conv)."""
    B, N, C = x.shape
    xh = x.reshape(B, H, W, C)
    y = jax.lax.conv_general_dilated(
        xh, w.reshape(3, 3, 1, C),
        window_strides=(1, 1), padding="SAME",
        dimension_numbers=("NHWC", "HWIO", "NHWC"),
        feature_group_count=C,
    )
    return (y + b).reshape(B, N, C)


if __name__ == "__main__":
    key = jax.random.PRNGKey(0)
    kx, kw, kb = jax.random.split(key, 3)

    # Small but lane-dense shapes: C is a multiple of 128 so every vreg,
    # VPU op and store is fully utilized.
    B, H, W, C = 2, 16, 16, 256
    N = H * W

    x = jax.random.normal(kx, (B, N, C), jnp.float32)
    w = 0.1 * jax.random.normal(kw, (3, 3, C), jnp.float32)   # taps per channel
    b = 0.1 * jax.random.normal(kb, (C,), jnp.float32)

    out = jax.block_until_ready(dwconv_forward(x, H, W, w, b))

    ref = ref_forward(x, H, W, w, b)
    assert out.shape == (B, N, C)
    assert jnp.allclose(out, ref, atol=1e-4, rtol=1e-4), "mismatch vs reference"

    print("KERNEL_OK")
</pallas_src>

<mosaic_0001>
module attributes {stable_mosaic.version = 11 : i64} {
  func.func @_dwconv_kernel(%arg0: i32, %arg1: i32, %arg2: memref<1x8x16x256xf32, #tpu.memory_space<vmem>>, %arg3: memref<1x1x16x256xf32, #tpu.memory_space<vmem>>, %arg4: memref<1x1x16x256xf32, #tpu.memory_space<vmem>>, %arg5: memref<3x3x256xf32, #tpu.memory_space<vmem>>, %arg6: memref<1x256xf32, #tpu.memory_space<vmem>>, %arg7: memref<1x8x16x256xf32, #tpu.memory_space<vmem>>) attributes {dimension_semantics = [#tpu.dimension_semantics<parallel>, #tpu.dimension_semantics<arbitrary>], iteration_bounds = array<i64: 2, 2>, scalar_prefetch = 0 : i64, scratch_operands = 0 : i64, tpu.core_type = #tpu.core_type<tc>, window_params = [{transform_indices = @transform_0, window_bounds = array<i64: 1, 8, 16, 256>}, {transform_indices = @transform_1, window_bounds = array<i64: 1, 1, 16, 256>}, {transform_indices = @transform_2, window_bounds = array<i64: 1, 1, 16, 256>}, {pipeline_mode = #tpu.pipeline_mode<synchronous>, transform_indices = @transform_3, window_bounds = array<i64: 3, 3, 256>}, {pipeline_mode = #tpu.pipeline_mode<synchronous>, transform_indices = @transform_4, window_bounds = array<i64: 1, 256>}, {transform_indices = @transform_5, window_bounds = array<i64: 1, 8, 16, 256>}]} {
    %c0 = arith.constant 0 : index
    %c0_0 = arith.constant 0 : index
    %c0_1 = arith.constant 0 : index
    %0 = vector.load %arg5[%c0, %c0_0, %c0_1] : memref<3x3x256xf32, #tpu.memory_space<vmem>>, vector<3x3x256xf32>
    %c0_2 = arith.constant 0 : index
    %c0_3 = arith.constant 0 : index
    %1 = vector.load %arg6[%c0_2, %c0_3] : memref<1x256xf32, #tpu.memory_space<vmem>>, vector<1x256xf32>
    %c0_i32 = arith.constant 0 : i32
    %2 = arith.cmpi sgt, %arg1, %c0_i32 : i32
    %c0_4 = arith.constant 0 : index
    %c0_5 = arith.constant 0 : index
    %c0_6 = arith.constant 0 : index
    %c0_7 = arith.constant 0 : index
    %3 = vector.load %arg3[%c0_4, %c0_5, %c0_6, %c0_7] : memref<1x1x16x256xf32, #tpu.memory_space<vmem>>, vector<1x1x16x256xf32>
    %4 = vector.shape_cast %3 : vector<1x1x16x256xf32> to vector<16x256xf32>
    %cst = arith.constant 0.000000e+00 : f32
    %5 = vector.broadcast %cst : f32 to vector<16x256xf32>
    %6 = arith.select %2, %4, %5 : vector<16x256xf32>
    %c1_i32 = arith.constant 1 : i32
    %7 = arith.cmpi slt, %arg1, %c1_i32 : i32
    %c0_8 = arith.constant 0 : index
    %c0_9 = arith.constant 0 : index
    %c0_10 = arith.constant 0 : index
    %c0_11 = arith.constant 0 : index
    %8 = vector.load %arg4[%c0_8, %c0_9, %c0_10, %c0_11] : memref<1x1x16x256xf32, #tpu.memory_space<vmem>>, vector<1x1x16x256xf32>
    %9 = vector.shape_cast %8 : vector<1x1x16x256xf32> to vector<16x256xf32>
    %cst_12 = arith.constant 0.000000e+00 : f32
    %10 = vector.broadcast %cst_12 : f32 to vector<16x256xf32>
    %11 = arith.select %7, %9, %10 : vector<16x256xf32>
    %12 = tpu.iota {dimensions = array<i32: 0>} : vector<16x1xi32>
    %c1_i32_13 = arith.constant 1 : i32
    %13 = vector.broadcast %c1_i32_13 : i32 to vector<16x1xi32>
    %14 = arith.cmpi sge, %12, %13 : vector<16x1xi32>
    %c1_i32_14 = arith.constant 1 : i32
    %15 = tpu.dynamic_rotate %6 by %c1_i32_14 dim 0 : vector<16x256xf32>, i32 -> vector<16x256xf32>
    %cst_15 = arith.constant 0.000000e+00 : f32
    %16 = vector.shape_cast %14 : vector<16x1xi1> to vector<16x1xi1>
    %17 = vector.broadcast %16 : vector<16x1xi1> to vector<16x256xi1>
    %18 = vector.broadcast %cst_15 : f32 to vector<16x256xf32>
    %19 = arith.select %17, %15, %18 : vector<16x256xi1>, vector<16x256xf32>
    %c14_i32 = arith.constant 14 : i32
    %20 = vector.broadcast %c14_i32 : i32 to vector<16x1xi32>
    %21 = arith.cmpi sle, %12, %20 : vector<16x1xi32>
    %c15_i32 = arith.constant 15 : i32
    %22 = tpu.dynamic_rotate %6 by %c15_i32 dim 0 : vector<16x256xf32>, i32 -> vector<16x256xf32>
    %cst_16 = arith.constant 0.000000e+00 : f32
    %23 = vector.shape_cast %21 : vector<16x1xi1> to vector<16x1xi1>
    %24 = vector.broadcast %23 : vector<16x1xi1> to vector<16x256xi1>
    %25 = vector.broadcast %cst_16 : f32 to vector<16x256xf32>
    %26 = arith.select %24, %22, %25 : vector<16x256xi1>, vector<16x256xf32>
    %c0_17 = arith.constant 0 : index
    %c0_18 = arith.constant 0 : index
    %c0_19 = arith.constant 0 : index
    %c0_20 = arith.constant 0 : index
    %27 = vector.load %arg2[%c0_17, %c0_18, %c0_19, %c0_20] : memref<1x8x16x256xf32, #tpu.memory_space<vmem>>, vector<1x1x16x256xf32>
    %28 = vector.shape_cast %27 : vector<1x1x16x256xf32> to vector<16x256xf32>
    %c1_i32_21 = arith.constant 1 : i32
    %29 = vector.broadcast %c1_i32_21 : i32 to vector<16x1xi32>
    %30 = arith.cmpi sge, %12, %29 : vector<16x1xi32>
    %c1_i32_22 = arith.constant 1 : i32
    %31 = tpu.dynamic_rotate %28 by %c1_i32_22 dim 0 : vector<16x256xf32>, i32 -> vector<16x256xf32>
    %cst_23 = arith.constant 0.000000e+00 : f32
    %32 = vector.shape_cast %30 : vector<16x1xi1> to vector<16x1xi1>
    %33 = vector.broadcast %32 : vector<16x1xi1> to vector<16x256xi1>
    %34 = vector.broadcast %cst_23 : f32 to vector<16x256xf32>
    %35 = arith.select %33, %31, %34 : vector<16x256xi1>, vector<16x256xf32>
    %c14_i32_24 = arith.constant 14 : i32
    %36 = vector.broadcast %c14_i32_24 : i32 to vector<16x1xi32>
    %37 = arith.cmpi sle, %12, %36 : vector<16x1xi32>
    %c15_i32_25 = arith.constant 15 : i32
    %38 = tpu.dynamic_rotate %28 by %c15_i32_25 dim 0 : vector<16x256xf32>, i32 -> vector<16x256xf32>
    %cst_26 = arith.constant 0.000000e+00 : f32
    %39 = vector.shape_cast %37 : vector<16x1xi1> to vector<16x1xi1>
    %40 = vector.broadcast %39 : vector<16x1xi1> to vector<16x256xi1>
    %41 = vector.broadcast %cst_26 : f32 to vector<16x256xf32>
    %42 = arith.select %40, %38, %41 : vector<16x256xi1>, vector<16x256xf32>
    %c0_27 = arith.constant 0 : index
    %c1 = arith.constant 1 : index
    %c0_28 = arith.constant 0 : index
    %c0_29 = arith.constant 0 : index
    %43 = vector.load %arg2[%c0_27, %c1, %c0_28, %c0_29] : memref<1x8x16x256xf32, #tpu.memory_space<vmem>>, vector<1x1x16x256xf32>
    %44 = vector.shape_cast %43 : vector<1x1x16x256xf32> to vector<16x256xf32>
    %c1_i32_30 = arith.constant 1 : i32
    %45 = vector.broadcast %c1_i32_30 : i32 to vector<16x1xi32>
    %46 = arith.cmpi sge, %12, %45 : vector<16x1xi32>
    %c1_i32_31 = arith.constant 1 : i32
    %47 = tpu.dynamic_rotate %44 by %c1_i32_31 dim 0 : vector<16x256xf32>, i32 -> vector<16x256xf32>
    %cst_32 = arith.constant 0.000000e+00 : f32
    %48 = vector.shape_cast %46 : vector<16x1xi1> to vector<16x1xi1>
    %49 = vector.broadcast %48 : vector<16x1xi1> to vector<16x256xi1>
    %50 = vector.broadcast %cst_32 : f32 to vector<16x256xf32>
    %51 = arith.select %49, %47, %50 : vector<16x256xi1>, vector<16x256xf32>
    %c14_i32_33 = arith.constant 14 : i32
    %52 = vector.broadcast %c14_i32_33 : i32 to vector<16x1xi32>
    %53 = arith.cmpi sle, %12, %52 : vector<16x1xi32>
    %c15_i32_34 = arith.constant 15 : i32
    %54 = tpu.dynamic_rotate %44 by %c15_i32_34 dim 0 : vector<16x256xf32>, i32 -> vector<16x256xf32>
    %cst_35 = arith.constant 0.000000e+00 : f32
    %55 = vector.shape_cast %53 : vector<16x1xi1> to vector<16x1xi1>
    %56 = vector.broadcast %55 : vector<16x1xi1> to vector<16x256xi1>
    %57 = vector.broadcast %cst_35 : f32 to vector<16x256xf32>
    %58 = arith.select %56, %54, %57 : vector<16x256xi1>, vector<16x256xf32>
    %59 = vector.extract_strided_slice %0 {offsets = [1, 1, 0], sizes = [1, 1, 256], strides = [1, 1, 1]} : vector<3x3x256xf32> to vector<1x1x256xf32>
    %60 = vector.shape_cast %59 : vector<1x1x256xf32> to vector<1x256xf32>
    %61 = vector.broadcast %60 : vector<1x256xf32> to vector<16x256xf32>
    %62 = arith.mulf %28, %61 : vector<16x256xf32>
    %63 = vector.broadcast %1 : vector<1x256xf32> to vector<16x256xf32>
    %64 = arith.addf %62, %63 : vector<16x256xf32>
    %65 = vector.extract_strided_slice %0 {offsets = [0, 0, 0], sizes = [1, 1, 256], strides = [1, 1, 1]} : vector<3x3x256xf32> to vector<1x1x256xf32>
    %66 = vector.shape_cast %65 : vector<1x1x256xf32> to vector<1x256xf32>
    %67 = vector.broadcast %66 : vector<1x256xf32> to vector<16x256xf32>
    %68 = arith.mulf %19, %67 : vector<16x256xf32>
    %69 = arith.addf %64, %68 : vector<16x256xf32>
    %70 = vector.extract_strided_slice %0 {offsets = [0, 1, 0], sizes = [1, 1, 256], strides = [1, 1, 1]} : vector<3x3x256xf32> to vector<1x1x256xf32>
    %71 = vector.shape_cast %70 : vector<1x1x256xf32> to vector<1x256xf32>
    %72 = vector.broadcast %71 : vector<1x256xf32> to vector<16x256xf32>
    %73 = arith.mulf %6, %72 : vector<16x256xf32>
    %74 = arith.addf %69, %73 : vector<16x256xf32>
    %75 = vector.extract_strided_slice %0 {offsets = [0, 2, 0], sizes = [1, 1, 256], strides = [1, 1, 1]} : vector<3x3x256xf32> to vector<1x1x256xf32>
    %76 = vector.shape_cast %75 : vector<1x1x256xf32> to vector<1x256xf32>
    %77 = vector.broadcast %76 : vector<1x256xf32> to vector<16x256xf32>
    %78 = arith.mulf %26, %77 : vector<16x256xf32>
    %79 = arith.addf %74, %78 : vector<16x256xf32>
    %80 = vector.extract_strided_slice %0 {offsets = [1, 0, 0], sizes = [1, 1, 256], strides = [1, 1, 1]} : vector<3x3x256xf32> to vector<1x1x256xf32>
    %81 = vector.shape_cast %80 : vector<1x1x256xf32> to vector<1x256xf32>
    %82 = vector.broadcast %81 : vector<1x256xf32> to vector<16x256xf32>
    %83 = arith.mulf %35, %82 : vector<16x256xf32>
    %84 = arith.addf %79, %83 : vector<16x256xf32>
    %85 = vector.extract_strided_slice %0 {offsets = [1, 2, 0], sizes = [1, 1, 256], strides = [1, 1, 1]} : vector<3x3x256xf32> to vector<1x1x256xf32>
    %86 = vector.shape_cast %85 : vector<1x1x256xf32> to vector<1x256xf32>
    %87 = vector.broadcast %86 : vector<1x256xf32> to vector<16x256xf32>
    %88 = arith.mulf %42, %87 : vector<16x256xf32>
    %89 = arith.addf %84, %88 : vector<16x256xf32>
    %90 = vector.extract_strided_slice %0 {offsets = [2, 0, 0], sizes = [1, 1, 256], strides = [1, 1, 1]} : vector<3x3x256xf32> to vector<1x1x256xf32>
    %91 = vector.shape_cast %90 : vector<1x1x256xf32> to vector<1x256xf32>
    %92 = vector.broadcast %91 : vector<1x256xf32> to vector<16x256xf32>
    %93 = arith.mulf %51, %92 : vector<16x256xf32>
    %94 = arith.addf %89, %93 : vector<16x256xf32>
    %95 = vector.extract_strided_slice %0 {offsets = [2, 1, 0], sizes = [1, 1, 256], strides = [1, 1, 1]} : vector<3x3x256xf32> to vector<1x1x256xf32>
    %96 = vector.shape_cast %95 : vector<1x1x256xf32> to vector<1x256xf32>
    %97 = vector.broadcast %96 : vector<1x256xf32> to vector<16x256xf32>
    %98 = arith.mulf %44, %97 : vector<16x256xf32>
    %99 = arith.addf %94, %98 : vector<16x256xf32>
    %100 = vector.extract_strided_slice %0 {offsets = [2, 2, 0], sizes = [1, 1, 256], strides = [1, 1, 1]} : vector<3x3x256xf32> to vector<1x1x256xf32>
    %101 = vector.shape_cast %100 : vector<1x1x256xf32> to vector<1x256xf32>
    %102 = vector.broadcast %101 : vector<1x256xf32> to vector<16x256xf32>
    %103 = arith.mulf %58, %102 : vector<16x256xf32>
    %104 = arith.addf %99, %103 : vector<16x256xf32>
    %c0_36 = arith.constant 0 : index
    %c0_37 = arith.constant 0 : index
    %c0_38 = arith.constant 0 : index
    %c0_39 = arith.constant 0 : index
    %105 = vector.load %arg7[%c0_36, %c0_37, %c0_38, %c0_39] : memref<1x8x16x256xf32, #tpu.memory_space<vmem>>, vector<1x1x16x256xf32>
    %106 = vector.shape_cast %105 : vector<1x1x16x256xf32> to vector<16x256xf32>
    %107 = vector.shape_cast %104 : vector<16x256xf32> to vector<1x1x16x256xf32>
    tpu.vector_store %arg7[%c0_36, %c0_37, %c0_38, %c0_39], %107 {strides = array<i32>} : memref<1x8x16x256xf32, #tpu.memory_space<vmem>>, vector<1x1x16x256xf32>,
    %c0_40 = arith.constant 0 : index
    %c2 = arith.constant 2 : index
    %c0_41 = arith.constant 0 : index
    %c0_42 = arith.constant 0 : index
    %108 = vector.load %arg2[%c0_40, %c2, %c0_41, %c0_42] : memref<1x8x16x256xf32, #tpu.memory_space<vmem>>, vector<1x1x16x256xf32>
    %109 = vector.shape_cast %108 : vector<1x1x16x256xf32> to vector<16x256xf32>
    %c1_i32_43 = arith.constant 1 : i32
    %110 = vector.broadcast %c1_i32_43 : i32 to vector<16x1xi32>
    %111 = arith.cmpi sge, %12, %110 : vector<16x1xi32>
    %c1_i32_44 = arith.constant 1 : i32
    %112 = tpu.dynamic_rotate %109 by %c1_i32_44 dim 0 : vector<16x256xf32>, i32 -> vector<16x256xf32>
    %cst_45 = arith.constant 0.000000e+00 : f32
    %113 = vector.shape_cast %111 : vector<16x1xi1> to vector<16x1xi1>
    %114 = vector.broadcast %113 : vector<16x1xi1> to vector<16x256xi1>
    %115 = vector.broadcast %cst_45 : f32 to vector<16x256xf32>
    %116 = arith.select %114, %112, %115 : vector<16x256xi1>, vector<16x256xf32>
    %c14_i32_46 = arith.constant 14 : i32
    %117 = vector.broadcast %c14_i32_46 : i32 to vector<16x1xi32>
    %118 = arith.cmpi sle, %12, %117 : vector<16x1xi32>
    %c15_i32_47 = arith.constant 15 : i32
    %119 = tpu.dynamic_rotate %109 by %c15_i32_47 dim 0 : vector<16x256xf32>, i32 -> vector<16x256xf32>
    %cst_48 = arith.constant 0.000000e+00 : f32
    %120 = vector.shape_cast %118 : vector<16x1xi1> to vector<16x1xi1>
    %121 = vector.broadcast %120 : vector<16x1xi1> to vector<16x256xi1>
    %122 = vector.broadcast %cst_48 : f32 to vector<16x256xf32>
    %123 = arith.select %121, %119, %122 : vector<16x256xi1>, vector<16x256xf32>
    %124 = vector.extract_strided_slice %0 {offsets = [1, 1, 0], sizes = [1, 1, 256], strides = [1, 1, 1]} : vector<3x3x256xf32> to vector<1x1x256xf32>
    %125 = vector.shape_cast %124 : vector<1x1x256xf32> to vector<1x256xf32>
    %126 = vector.broadcast %125 : vector<1x256xf32> to vector<16x256xf32>
    %127 = arith.mulf %44, %126 : vector<16x256xf32>
    %128 = vector.broadcast %1 : vector<1x256xf32> to vector<16x256xf32>
    %129 = arith.addf %127, %128 : vector<16x256xf32>
    %130 = vector.extract_strided_slice %0 {offsets = [0, 0, 0], sizes = [1, 1, 256], strides = [1, 1, 1]} : vector<3x3x256xf32> to vector<1x1x256xf32>
    %131 = vector.shape_cast %130 : vector<1x1x256xf32> to vector<1x256xf32>
    %132 = vector.broadcast %131 : vector<1x256xf32> to vector<16x256xf32>
    %133 = arith.mulf %35, %132 : vector<16x256xf32>
    %134 = arith.addf %129, %133 : vector<16x256xf32>
    %135 = vector.extract_strided_slice %0 {offsets = [0, 1, 0], sizes = [1, 1, 256], strides = [1, 1, 1]} : vector<3x3x256xf32> to vector<1x1x256xf32>
    %136 = vector.shape_cast %135 : vector<1x1x256xf32> to vector<1x256xf32>
    %137 = vector.broadcast %136 : vector<1x256xf32> to vector<16x256xf32>
    %138 = arith.mulf %28, %137 : vector<16x256xf32>
    %139 = arith.addf %134, %138 : vector<16x256xf32>
    %140 = vector.extract_strided_slice %0 {offsets = [0, 2, 0], sizes = [1, 1, 256], strides = [1, 1, 1]} : vector<3x3x256xf32> to vector<1x1x256xf32>
    %141 = vector.shape_cast %140 : vector<1x1x256xf32> to vector<1x256xf32>
    %142 = vector.broadcast %141 : vector<1x256xf32> to vector<16x256xf32>
    %143 = arith.mulf %42, %142 : vector<16x256xf32>
    %144 = arith.addf %139, %143 : vector<16x256xf32>
    %145 = vector.extract_strided_slice %0 {offsets = [1, 0, 0], sizes = [1, 1, 256], strides = [1, 1, 1]} : vector<3x3x256xf32> to vector<1x1x256xf32>
    %146 = vector.shape_cast %145 : vector<1x1x256xf32> to vector<1x256xf32>
    %147 = vector.broadcast %146 : vector<1x256xf32> to vector<16x256xf32>
    %148 = arith.mulf %51, %147 : vector<16x256xf32>
    %149 = arith.addf %144, %148 : vector<16x256xf32>
    %150 = vector.extract_strided_slice %0 {offsets = [1, 2, 0], sizes = [1, 1, 256], strides = [1, 1, 1]} : vector<3x3x256xf32> to vector<1x1x256xf32>
    %151 = vector.shape_cast %150 : vector<1x1x256xf32> to vector<1x256xf32>
    %152 = vector.broadcast %151 : vector<1x256xf32> to vector<16x256xf32>
    %153 = arith.mulf %58, %152 : vector<16x256xf32>
    %154 = arith.addf %149, %153 : vector<16x256xf32>
    %155 = vector.extract_strided_slice %0 {offsets = [2, 0, 0], sizes = [1, 1, 256], strides = [1, 1, 1]} : vector<3x3x256xf32> to vector<1x1x256xf32>
    %156 = vector.shape_cast %155 : vector<1x1x256xf32> to vector<1x256xf32>
    %157 = vector.broadcast %156 : vector<1x256xf32> to vector<16x256xf32>
    %158 = arith.mulf %116, %157 : vector<16x256xf32>
    %159 = arith.addf %154, %158 : vector<16x256xf32>
    %160 = vector.extract_strided_slice %0 {offsets = [2, 1, 0], sizes = [1, 1, 256], strides = [1, 1, 1]} : vector<3x3x256xf32> to vector<1x1x256xf32>
    %161 = vector.shape_cast %160 : vector<1x1x256xf32> to vector<1x256xf32>
    %162 = vector.broadcast %161 : vector<1x256xf32> to vector<16x256xf32>
    %163 = arith.mulf %109, %162 : vector<16x256xf32>
    %164 = arith.addf %159, %163 : vector<16x256xf32>
    %165 = vector.extract_strided_slice %0 {offsets = [2, 2, 0], sizes = [1, 1, 256], strides = [1, 1, 1]} : vector<3x3x256xf32> to vector<1x1x256xf32>
    %166 = vector.shape_cast %165 : vector<1x1x256xf32> to vector<1x256xf32>
    %167 = vector.broadcast %166 : vector<1x256xf32> to vector<16x256xf32>
    %168 = arith.mulf %123, %167 : vector<16x256xf32>
    %169 = arith.addf %164, %168 : vector<16x256xf32>
    %c0_49 = arith.constant 0 : index
    %c1_50 = arith.constant 1 : index
    %c0_51 = arith.constant 0 : index
    %c0_52 = arith.constant 0 : index
    %170 = vector.load %arg7[%c0_49, %c1_50, %c0_51, %c0_52] : memref<1x8x16x256xf32, #tpu.memory_space<vmem>>, vector<1x1x16x256xf32>
    %171 = vector.shape_cast %170 : vector<1x1x16x256xf32> to vector<16x256xf32>
    %172 = vector.shape_cast %169 : vector<16x256xf32> to vector<1x1x16x256xf32>
    tpu.vector_store %arg7[%c0_49, %c1_50, %c0_51, %c0_52], %172 {strides = array<i32>} : memref<1x8x16x256xf32, #tpu.memory_space<vmem>>, vector<1x1x16x256xf32>,
    %c0_53 = arith.constant 0 : index
    %c3 = arith.constant 3 : index
    %c0_54 = arith.constant 0 : index
    %c0_55 = arith.constant 0 : index
    %173 = vector.load %arg2[%c0_53, %c3, %c0_54, %c0_55] : memref<1x8x16x256xf32, #tpu.memory_space<vmem>>, vector<1x1x16x256xf32>
    %174 = vector.shape_cast %173 : vector<1x1x16x256xf32> to vector<16x256xf32>
    %c1_i32_56 = arith.constant 1 : i32
    %175 = vector.broadcast %c1_i32_56 : i32 to vector<16x1xi32>
    %176 = arith.cmpi sge, %12, %175 : vector<16x1xi32>
    %c1_i32_57 = arith.constant 1 : i32
    %177 = tpu.dynamic_rotate %174 by %c1_i32_57 dim 0 : vector<16x256xf32>, i32 -> vector<16x256xf32>
    %cst_58 = arith.constant 0.000000e+00 : f32
    %178 = vector.shape_cast %176 : vector<16x1xi1> to vector<16x1xi1>
    %179 = vector.broadcast %178 : vector<16x1xi1> to vector<16x256xi1>
    %180 = vector.broadcast %cst_58 : f32 to vector<16x256xf32>
    %181 = arith.select %179, %177, %180 : vector<16x256xi1>, vector<16x256xf32>
    %c14_i32_59 = arith.constant 14 : i32
    %182 = vector.broadcast %c14_i32_59 : i32 to vector<16x1xi32>
    %183 = arith.cmpi sle, %12, %182 : vector<16x1xi32>
    %c15_i32_60 = arith.constant 15 : i32
    %184 = tpu.dynamic_rotate %174 by %c15_i32_60 dim 0 : vector<16x256xf32>, i32 -> vector<16x256xf32>
    %cst_61 = arith.constant 0.000000e+00 : f32
    %185 = vector.shape_cast %183 : vector<16x1xi1> to vector<16x1xi1>
    %186 = vector.broadcast %185 : vector<16x1xi1> to vector<16x256xi1>
    %187 = vector.broadcast %cst_61 : f32 to vector<16x256xf32>
    %188 = arith.select %186, %184, %187 : vector<16x256xi1>, vector<16x256xf32>
    %189 = vector.extract_strided_slice %0 {offsets = [1, 1, 0], sizes = [1, 1, 256], strides = [1, 1, 1]} : vector<3x3x256xf32> to vector<1x1x256xf32>
    %190 = vector.shape_cast %189 : vector<1x1x256xf32> to vector<1x256xf32>
    %191 = vector.broadcast %190 : vector<1x256xf32> to vector<16x256xf32>
    %192 = arith.mulf %109, %191 : vector<16x256xf32>
    %193 = vector.broadcast %1 : vector<1x256xf32> to vector<16x256xf32>
    %194 = arith.addf %192, %193 : vector<16x256xf32>
    %195 = vector.extract_strided_slice %0 {offsets = [0, 0, 0], sizes = [1, 1, 256], strides = [1, 1, 1]} : vector<3x3x256xf32> to vector<1x1x256xf32>
    %196 = vector.shape_cast %195 : vector<1x1x256xf32> to vector<1x256xf32>
    %197 = vector.broadcast %196 : vector<1x256xf32> to vector<16x256xf32>
    %198 = arith.mulf %51, %197 : vector<16x256xf32>
    %199 = arith.addf %194, %198 : vector<16x256xf32>
    %200 = vector.extract_strided_slice %0 {offsets = [0, 1, 0], sizes = [1, 1, 256], strides = [1, 1, 1]} : vector<3x3x256xf32> to vector<1x1x256xf32>
    %201 = vector.shape_cast %200 : vector<1x1x256xf32> to vector<1x256xf32>
    %202 = vector.broadcast %201 : vector<1x256xf32> to vector<16x256xf32>
    %203 = arith.mulf %44, %202 : vector<16x256xf32>
    %204 = arith.addf %199, %203 : vector<16x256xf32>
    %205 = vector.extract_strided_slice %0 {offsets = [0, 2, 0], sizes = [1, 1, 256], strides = [1, 1, 1]} : vector<3x3x256xf32> to vector<1x1x256xf32>
    %206 = vector.shape_cast %205 : vector<1x1x256xf32> to vector<1x256xf32>
    %207 = vector.broadcast %206 : vector<1x256xf32> to vector<16x256xf32>
    %208 = arith.mulf %58, %207 : vector<16x256xf32>
    %209 = arith.addf %204, %208 : vector<16x256xf32>
    %210 = vector.extract_strided_slice %0 {offsets = [1, 0, 0], sizes = [1, 1, 256], strides = [1, 1, 1]} : vector<3x3x256xf32> to vector<1x1x256xf32>
    %211 = vector.shape_cast %210 : vector<1x1x256xf32> to vector<1x256xf32>
    %212 = vector.broadcast %211 : vector<1x256xf32> to vector<16x256xf32>
    %213 = arith.mulf %116, %212 : vector<16x256xf32>
    %214 = arith.addf %209, %213 : vector<16x256xf32>
    %215 = vector.extract_strided_slice %0 {offsets = [1, 2, 0], sizes = [1, 1, 256], strides = [1, 1, 1]} : vector<3x3x256xf32> to vector<1x1x256xf32>
    %216 = vector.shape_cast %215 : vector<1x1x256xf32> to vector<1x256xf32>
    %217 = vector.broadcast %216 : vector<1x256xf32> to vector<16x256xf32>
    %218 = arith.mulf %123, %217 : vector<16x256xf32>
    %219 = arith.addf %214, %218 : vector<16x256xf32>
    %220 = vector.extract_strided_slice %0 {offsets = [2, 0, 0], sizes = [1, 1, 256], strides = [1, 1, 1]} : vector<3x3x256xf32> to vector<1x1x256xf32>
    %221 = vector.shape_cast %220 : vector<1x1x256xf32> to vector<1x256xf32>
    %222 = vector.broadcast %221 : vector<1x256xf32> to vector<16x256xf32>
    %223 = arith.mulf %181, %222 : vector<16x256xf32>
    %224 = arith.addf %219, %223 : vector<16x256xf32>
    %225 = vector.extract_strided_slice %0 {offsets = [2, 1, 0], sizes = [1, 1, 256], strides = [1, 1, 1]} : vector<3x3x256xf32> to vector<1x1x256xf32>
    %226 = vector.shape_cast %225 : vector<1x1x256xf32> to vector<1x256xf32>
    %227 = vector.broadcast %226 : vector<1x256xf32> to vector<16x256xf32>
    %228 = arith.mulf %174, %227 : vector<16x256xf32>
    %229 = arith.addf %224, %228 : vector<16x256xf32>
    %230 = vector.extract_strided_slice %0 {offsets = [2, 2, 0], sizes = [1, 1, 256], strides = [1, 1, 1]} : vector<3x3x256xf32> to vector<1x1x256xf32>
    %231 = vector.shape_cast %230 : vector<1x1x256xf32> to vector<1x256xf32>
    %232 = vector.broadcast %231 : vector<1x256xf32> to vector<16x256xf32>
    %233 = arith.mulf %188, %232 : vector<16x256xf32>
    %234 = arith.addf %229, %233 : vector<16x256xf32>
    %c0_62 = arith.constant 0 : index
    %c2_63 = arith.constant 2 : index
    %c0_64 = arith.constant 0 : index
    %c0_65 = arith.constant 0 : index
    %235 = vector.load %arg7[%c0_62, %c2_63, %c0_64, %c0_65] : memref<1x8x16x256xf32, #tpu.memory_space<vmem>>, vector<1x1x16x256xf32>
    %236 = vector.shape_cast %235 : vector<1x1x16x256xf32> to vector<16x256xf32>
    %237 = vector.shape_cast %234 : vector<16x256xf32> to vector<1x1x16x256xf32>
    tpu.vector_store %arg7[%c0_62, %c2_63, %c0_64, %c0_65], %237 {strides = array<i32>} : memref<1x8x16x256xf32, #tpu.memory_space<vmem>>, vector<1x1x16x256xf32>,
    %c0_66 = arith.constant 0 : index
    %c4 = arith.constant 4 : index
    %c0_67 = arith.constant 0 : index
    %c0_68 = arith.constant 0 : index
    %238 = vector.load %arg2[%c0_66, %c4, %c0_67, %c0_68] : memref<1x8x16x256xf32, #tpu.memory_space<vmem>>, vector<1x1x16x256xf32>
    %239 = vector.shape_cast %238 : vector<1x1x16x256xf32> to vector<16x256xf32>
    %c1_i32_69 = arith.constant 1 : i32
    %240 = vector.broadcast %c1_i32_69 : i32 to vector<16x1xi32>
    %241 = arith.cmpi sge, %12, %240 : vector<16x1xi32>
    %c1_i32_70 = arith.constant 1 : i32
    %242 = tpu.dynamic_rotate %239 by %c1_i32_70 dim 0 : vector<16x256xf32>, i32 -> vector<16x256xf32>
    %cst_71 = arith.constant 0.000000e+00 : f32
    %243 = vector.shape_cast %241 : vector<16x1xi1> to vector<16x1xi1>
    %244 = vector.broadcast %243 : vector<16x1xi1> to vector<16x256xi1>
    %245 = vector.broadcast %cst_71 : f32 to vector<16x256xf32>
    %246 = arith.select %244, %242, %245 : vector<16x256xi1>, vector<16x256xf32>
    %c14_i32_72 = arith.constant 14 : i32
    %247 = vector.broadcast %c14_i32_72 : i32 to vector<16x1xi32>
    %248 = arith.cmpi sle, %12, %247 : vector<16x1xi32>
    %c15_i32_73 = arith.constant 15 : i32
    %249 = tpu.dynamic_rotate %239 by %c15_i32_73 dim 0 : vector<16x256xf32>, i32 -> vector<16x256xf32>
    %cst_74 = arith.constant 0.000000e+00 : f32
    %250 = vector.shape_cast %248 : vector<16x1xi1> to vector<16x1xi1>
    %251 = vector.broadcast %250 : vector<16x1xi1> to vector<16x256xi1>
    %252 = vector.broadcast %cst_74 : f32 to vector<16x256xf32>
    %253 = arith.select %251, %249, %252 : vector<16x256xi1>, vector<16x256xf32>
    %254 = vector.extract_strided_slice %0 {offsets = [1, 1, 0], sizes = [1, 1, 256], strides = [1, 1, 1]} : vector<3x3x256xf32> to vector<1x1x256xf32>
    %255 = vector.shape_cast %254 : vector<1x1x256xf32> to vector<1x256xf32>
    %256 = vector.broadcast %255 : vector<1x256xf32> to vector<16x256xf32>
    %257 = arith.mulf %174, %256 : vector<16x256xf32>
    %258 = vector.broadcast %1 : vector<1x256xf32> to vector<16x256xf32>
    %259 = arith.addf %257, %258 : vector<16x256xf32>
    %260 = vector.extract_strided_slice %0 {offsets = [0, 0, 0], sizes = [1, 1, 256], strides = [1, 1, 1]} : vector<3x3x256xf32> to vector<1x1x256xf32>
    %261 = vector.shape_cast %260 : vector<1x1x256xf32> to vector<1x256xf32>
    %262 = vector.broadcast %261 : vector<1x256xf32> to vector<16x256xf32>
    %263 = arith.mulf %116, %262 : vector<16x256xf32>
    %264 = arith.addf %259, %263 : vector<16x256xf32>
    %265 = vector.extract_strided_slice %0 {offsets = [0, 1, 0], sizes = [1, 1, 256], strides = [1, 1, 1]} : vector<3x3x256xf32> to vector<1x1x256xf32>
    %266 = vector.shape_cast %265 : vector<1x1x256xf32> to vector<1x256xf32>
    %267 = vector.broadcast %266 : vector<1x256xf32> to vector<16x256xf32>
    %268 = arith.mulf %109, %267 : vector<16x256xf32>
    %269 = arith.addf %264, %268 : vector<16x256xf32>
    %270 = vector.extract_strided_slice %0 {offsets = [0, 2, 0], sizes = [1, 1, 256], strides = [1, 1, 1]} : vector<3x3x256xf32> to vector<1x1x256xf32>
    %271 = vector.shape_cast %270 : vector<1x1x256xf32> to vector<1x256xf32>
    %272 = vector.broadcast %271 : vector<1x256xf32> to vector<16x256xf32>
    %273 = arith.mulf %123, %272 : vector<16x256xf32>
    %274 = arith.addf %269, %273 : vector<16x256xf32>
    %275 = vector.extract_strided_slice %0 {offsets = [1, 0, 0], sizes = [1, 1, 256], strides = [1, 1, 1]} : vector<3x3x256xf32> to vector<1x1x256xf32>
    %276 = vector.shape_cast %275 : vector<1x1x256xf32> to vector<1x256xf32>
    %277 = vector.broadcast %276 : vector<1x256xf32> to vector<16x256xf32>
    %278 = arith.mulf %181, %277 : vector<16x256xf32>
    %279 = arith.addf %274, %278 : vector<16x256xf32>
    %280 = vector.extract_strided_slice %0 {offsets = [1, 2, 0], sizes = [1, 1, 256], strides = [1, 1, 1]} : vector<3x3x256xf32> to vector<1x1x256xf32>
    %281 = vector.shape_cast %280 : vector<1x1x256xf32> to vector<1x256xf32>
    %282 = vector.broadcast %281 : vector<1x256xf32> to vector<16x256xf32>
    %283 = arith.mulf %188, %282 : vector<16x256xf32>
    %284 = arith.addf %279, %283 : vector<16x256xf32>
    %285 = vector.extract_strided_slice %0 {offsets = [2, 0, 0], sizes = [1, 1, 256], strides = [1, 1, 1]} : vector<3x3x256xf32> to vector<1x1x256xf32>
    %286 = vector.shape_cast %285 : vector<1x1x256xf32> to vector<1x256xf32>
    %287 = vector.broadcast %286 : vector<1x256xf32> to vector<16x256xf32>
    %288 = arith.mulf %246, %287 : vector<16x256xf32>
    %289 = arith.addf %284, %288 : vector<16x256xf32>
    %290 = vector.extract_strided_slice %0 {offsets = [2, 1, 0], sizes = [1, 1, 256], strides = [1, 1, 1]} : vector<3x3x256xf32> to vector<1x1x256xf32>
    %291 = vector.shape_cast %290 : vector<1x1x256xf32> to vector<1x256xf32>
    %292 = vector.broadcast %291 : vector<1x256xf32> to vector<16x256xf32>
    %293 = arith.mulf %239, %292 : vector<16x256xf32>
    %294 = arith.addf %289, %293 : vector<16x256xf32>
    %295 = vector.extract_strided_slice %0 {offsets = [2, 2, 0], sizes = [1, 1, 256], strides = [1, 1, 1]} : vector<3x3x256xf32> to vector<1x1x256xf32>
    %296 = vector.shape_cast %295 : vector<1x1x256xf32> to vector<1x256xf32>
    %297 = vector.broadcast %296 : vector<1x256xf32> to vector<16x256xf32>
    %298 = arith.mulf %253, %297 : vector<16x256xf32>
    %299 = arith.addf %294, %298 : vector<16x256xf32>
    %c0_75 = arith.constant 0 : index
    %c3_76 = arith.constant 3 : index
    %c0_77 = arith.constant 0 : index
    %c0_78 = arith.constant 0 : index
    %300 = vector.load %arg7[%c0_75, %c3_76, %c0_77, %c0_78] : memref<1x8x16x256xf32, #tpu.memory_space<vmem>>, vector<1x1x16x256xf32>
    %301 = vector.shape_cast %300 : vector<1x1x16x256xf32> to vector<16x256xf32>
    %302 = vector.shape_cast %299 : vector<16x256xf32> to vector<1x1x16x256xf32>
    tpu.vector_store %arg7[%c0_75, %c3_76, %c0_77, %c0_78], %302 {strides = array<i32>} : memref<1x8x16x256xf32, #tpu.memory_space<vmem>>, vector<1x1x16x256xf32>,
    %c0_79 = arith.constant 0 : index
    %c5 = arith.constant 5 : index
    %c0_80 = arith.constant 0 : index
    %c0_81 = arith.constant 0 : index
    %303 = vector.load %arg2[%c0_79, %c5, %c0_80, %c0_81] : memref<1x8x16x256xf32, #tpu.memory_space<vmem>>, vector<1x1x16x256xf32>
    %304 = vector.shape_cast %303 : vector<1x1x16x256xf32> to vector<16x256xf32>
    %c1_i32_82 = arith.constant 1 : i32
    %305 = vector.broadcast %c1_i32_82 : i32 to vector<16x1xi32>
    %306 = arith.cmpi sge, %12, %305 : vector<16x1xi32>
    %c1_i32_83 = arith.constant 1 : i32
    %307 = tpu.dynamic_rotate %304 by %c1_i32_83 dim 0 : vector<16x256xf32>, i32 -> vector<16x256xf32>
    %cst_84 = arith.constant 0.000000e+00 : f32
    %308 = vector.shape_cast %306 : vector<16x1xi1> to vector<16x1xi1>
    %309 = vector.broadcast %308 : vector<16x1xi1> to vector<16x256xi1>
    %310 = vector.broadcast %cst_84 : f32 to vector<16x256xf32>
    %311 = arith.select %309, %307, %310 : vector<16x256xi1>, vector<16x256xf32>
    %c14_i32_85 = arith.constant 14 : i32
    %312 = vector.broadcast %c14_i32_85 : i32 to vector<16x1xi32>
    %313 = arith.cmpi sle, %12, %312 : vector<16x1xi32>
    %c15_i32_86 = arith.constant 15 : i32
    %314 = tpu.dynamic_rotate %304 by %c15_i32_86 dim 0 : vector<16x256xf32>, i32 -> vector<16x256xf32>
    %cst_87 = arith.constant 0.000000e+00 : f32
    %315 = vector.shape_cast %313 : vector<16x1xi1> to vector<16x1xi1>
    %316 = vector.broadcast %315 : vector<16x1xi1> to vector<16x256xi1>
    %317 = vector.broadcast %cst_87 : f32 to vector<16x256xf32>
    %318 = arith.select %316, %314, %317 : vector<16x256xi1>, vector<16x256xf32>
    %319 = vector.extract_strided_slice %0 {offsets = [1, 1, 0], sizes = [1, 1, 256], strides = [1, 1, 1]} : vector<3x3x256xf32> to vector<1x1x256xf32>
    %320 = vector.shape_cast %319 : vector<1x1x256xf32> to vector<1x256xf32>
    %321 = vector.broadcast %320 : vector<1x256xf32> to vector<16x256xf32>
    %322 = arith.mulf %239, %321 : vector<16x256xf32>
    %323 = vector.broadcast %1 : vector<1x256xf32> to vector<16x256xf32>
    %324 = arith.addf %322, %323 : vector<16x256xf32>
    %325 = vector.extract_strided_slice %0 {offsets = [0, 0, 0], sizes = [1, 1, 256], strides = [1, 1, 1]} : vector<3x3x256xf32> to vector<1x1x256xf32>
    %326 = vector.shape_cast %325 : vector<1x1x256xf32> to vector<1x256xf32>
    %327 = vector.broadcast %326 : vector<1x256xf32> to vector<16x256xf32>
    %328 = arith.mulf %181, %327 : vector<16x256xf32>
    %329 = arith.addf %324, %328 : vector<16x256xf32>
    %330 = vector.extract_strided_slice %0 {offsets = [0, 1, 0], sizes = [1, 1, 256], strides = [1, 1, 1]} : vector<3x3x256xf32> to vector<1x1x256xf32>
    %331 = vector.shape_cast %330 : vector<1x1x256xf32> to vector<1x256xf32>
    %332 = vector.broadcast %331 : vector<1x256xf32> to vector<16x256xf32>
    %333 = arith.mulf %174, %332 : vector<16x256xf32>
    %334 = arith.addf %329, %333 : vector<16x256xf32>
    %335 = vector.extract_strided_slice %0 {offsets = [0, 2, 0], sizes = [1, 1, 256], strides = [1, 1, 1]} : vector<3x3x256xf32> to vector<1x1x256xf32>
    %336 = vector.shape_cast %335 : vector<1x1x256xf32> to vector<1x256xf32>
    %337 = vector.broadcast %336 : vector<1x256xf32> to vector<16x256xf32>
    %338 = arith.mulf %188, %337 : vector<16x256xf32>
    %339 = arith.addf %334, %338 : vector<16x256xf32>
    %340 = vector.extract_strided_slice %0 {offsets = [1, 0, 0], sizes = [1, 1, 256], strides = [1, 1, 1]} : vector<3x3x256xf32> to vector<1x1x256xf32>
    %341 = vector.shape_cast %340 : vector<1x1x256xf32> to vector<1x256xf32>
    %342 = vector.broadcast %341 : vector<1x256xf32> to vector<16x256xf32>
    %343 = arith.mulf %246, %342 : vector<16x256xf32>
    %344 = arith.addf %339, %343 : vector<16x256xf32>
    %345 = vector.extract_strided_slice %0 {offsets = [1, 2, 0], sizes = [1, 1, 256], strides = [1, 1, 1]} : vector<3x3x256xf32> to vector<1x1x256xf32>
    %346 = vector.shape_cast %345 : vector<1x1x256xf32> to vector<1x256xf32>
    %347 = vector.broadcast %346 : vector<1x256xf32> to vector<16x256xf32>
    %348 = arith.mulf %253, %347 : vector<16x256xf32>
    %349 = arith.addf %344, %348 : vector<16x256xf32>
    %350 = vector.extract_strided_slice %0 {offsets = [2, 0, 0], sizes = [1, 1, 256], strides = [1, 1, 1]} : vector<3x3x256xf32> to vector<1x1x256xf32>
    %351 = vector.shape_cast %350 : vector<1x1x256xf32> to vector<1x256xf32>
    %352 = vector.broadcast %351 : vector<1x256xf32> to vector<16x256xf32>
    %353 = arith.mulf %311, %352 : vector<16x256xf32>
    %354 = arith.addf %349, %353 : vector<16x256xf32>
    %355 = vector.extract_strided_slice %0 {offsets = [2, 1, 0], sizes = [1, 1, 256], strides = [1, 1, 1]} : vector<3x3x256xf32> to vector<1x1x256xf32>
    %356 = vector.shape_cast %355 : vector<1x1x256xf32> to vector<1x256xf32>
    %357 = vector.broadcast %356 : vector<1x256xf32> to vector<16x256xf32>
    %358 = arith.mulf %304, %357 : vector<16x256xf32>
    %359 = arith.addf %354, %358 : vector<16x256xf32>
    %360 = vector.extract_strided_slice %0 {offsets = [2, 2, 0], sizes = [1, 1, 256], strides = [1, 1, 1]} : vector<3x3x256xf32> to vector<1x1x256xf32>
    %361 = vector.shape_cast %360 : vector<1x1x256xf32> to vector<1x256xf32>
    %362 = vector.broadcast %361 : vector<1x256xf32> to vector<16x256xf32>
    %363 = arith.mulf %318, %362 : vector<16x256xf32>
    %364 = arith.addf %359, %363 : vector<16x256xf32>
    %c0_88 = arith.constant 0 : index
    %c4_89 = arith.constant 4 : index
    %c0_90 = arith.constant 0 : index
    %c0_91 = arith.constant 0 : index
    %365 = vector.load %arg7[%c0_88, %c4_89, %c0_90, %c0_91] : memref<1x8x16x256xf32, #tpu.memory_space<vmem>>, vector<1x1x16x256xf32>
    %366 = vector.shape_cast %365 : vector<1x1x16x256xf32> to vector<16x256xf32>
    %367 = vector.shape_cast %364 : vector<16x256xf32> to vector<1x1x16x256xf32>
    tpu.vector_store %arg7[%c0_88, %c4_89, %c0_90, %c0_91], %367 {strides = array<i32>} : memref<1x8x16x256xf32, #tpu.memory_space<vmem>>, vector<1x1x16x256xf32>,
    %c0_92 = arith.constant 0 : index
    %c6 = arith.constant 6 : index
    %c0_93 = arith.constant 0 : index
    %c0_94 = arith.constant 0 : index
    %368 = vector.load %arg2[%c0_92, %c6, %c0_93, %c0_94] : memref<1x8x16x256xf32, #tpu.memory_space<vmem>>, vector<1x1x16x256xf32>
    %369 = vector.shape_cast %368 : vector<1x1x16x256xf32> to vector<16x256xf32>
    %c1_i32_95 = arith.constant 1 : i32
    %370 = vector.broadcast %c1_i32_95 : i32 to vector<16x1xi32>
    %371 = arith.cmpi sge, %12, %370 : vector<16x1xi32>
    %c1_i32_96 = arith.constant 1 : i32
    %372 = tpu.dynamic_rotate %369 by %c1_i32_96 dim 0 : vector<16x256xf32>, i32 -> vector<16x256xf32>
    %cst_97 = arith.constant 0.000000e+00 : f32
    %373 = vector.shape_cast %371 : vector<16x1xi1> to vector<16x1xi1>
    %374 = vector.broadcast %373 : vector<16x1xi1> to vector<16x256xi1>
    %375 = vector.broadcast %cst_97 : f32 to vector<16x256xf32>
    %376 = arith.select %374, %372, %375 : vector<16x256xi1>, vector<16x256xf32>
    %c14_i32_98 = arith.constant 14 : i32
    %377 = vector.broadcast %c14_i32_98 : i32 to vector<16x1xi32>
    %378 = arith.cmpi sle, %12, %377 : vector<16x1xi32>
    %c15_i32_99 = arith.constant 15 : i32
    %379 = tpu.dynamic_rotate %369 by %c15_i32_99 dim 0 : vector<16x256xf32>, i32 -> vector<16x256xf32>
    %cst_100 = arith.constant 0.000000e+00 : f32
    %380 = vector.shape_cast %378 : vector<16x1xi1> to vector<16x1xi1>
    %381 = vector.broadcast %380 : vector<16x1xi1> to vector<16x256xi1>
    %382 = vector.broadcast %cst_100 : f32 to vector<16x256xf32>
    %383 = arith.select %381, %379, %382 : vector<16x256xi1>, vector<16x256xf32>
    %384 = vector.extract_strided_slice %0 {offsets = [1, 1, 0], sizes = [1, 1, 256], strides = [1, 1, 1]} : vector<3x3x256xf32> to vector<1x1x256xf32>
    %385 = vector.shape_cast %384 : vector<1x1x256xf32> to vector<1x256xf32>
    %386 = vector.broadcast %385 : vector<1x256xf32> to vector<16x256xf32>
    %387 = arith.mulf %304, %386 : vector<16x256xf32>
    %388 = vector.broadcast %1 : vector<1x256xf32> to vector<16x256xf32>
    %389 = arith.addf %387, %388 : vector<16x256xf32>
    %390 = vector.extract_strided_slice %0 {offsets = [0, 0, 0], sizes = [1, 1, 256], strides = [1, 1, 1]} : vector<3x3x256xf32> to vector<1x1x256xf32>
    %391 = vector.shape_cast %390 : vector<1x1x256xf32> to vector<1x256xf32>
    %392 = vector.broadcast %391 : vector<1x256xf32> to vector<16x256xf32>
    %393 = arith.mulf %246, %392 : vector<16x256xf32>
    %394 = arith.addf %389, %393 : vector<16x256xf32>
    %395 = vector.extract_strided_slice %0 {offsets = [0, 1, 0], sizes = [1, 1, 256], strides = [1, 1, 1]} : vector<3x3x256xf32> to vector<1x1x256xf32>
    %396 = vector.shape_cast %395 : vector<1x1x256xf32> to vector<1x256xf32>
    %397 = vector.broadcast %396 : vector<1x256xf32> to vector<16x256xf32>
    %398 = arith.mulf %239, %397 : vector<16x256xf32>
    %399 = arith.addf %394, %398 : vector<16x256xf32>
    %400 = vector.extract_strided_slice %0 {offsets = [0, 2, 0], sizes = [1, 1, 256], strides = [1, 1, 1]} : vector<3x3x256xf32> to vector<1x1x256xf32>
    %401 = vector.shape_cast %400 : vector<1x1x256xf32> to vector<1x256xf32>
    %402 = vector.broadcast %401 : vector<1x256xf32> to vector<16x256xf32>
    %403 = arith.mulf %253, %402 : vector<16x256xf32>
    %404 = arith.addf %399, %403 : vector<16x256xf32>
    %405 = vector.extract_strided_slice %0 {offsets = [1, 0, 0], sizes = [1, 1, 256], strides = [1, 1, 1]} : vector<3x3x256xf32> to vector<1x1x256xf32>
    %406 = vector.shape_cast %405 : vector<1x1x256xf32> to vector<1x256xf32>
    %407 = vector.broadcast %406 : vector<1x256xf32> to vector<16x256xf32>
    %408 = arith.mulf %311, %407 : vector<16x256xf32>
    %409 = arith.addf %404, %408 : vector<16x256xf32>
    %410 = vector.extract_strided_slice %0 {offsets = [1, 2, 0], sizes = [1, 1, 256], strides = [1, 1, 1]} : vector<3x3x256xf32> to vector<1x1x256xf32>
    %411 = vector.shape_cast %410 : vector<1x1x256xf32> to vector<1x256xf32>
    %412 = vector.broadcast %411 : vector<1x256xf32> to vector<16x256xf32>
    %413 = arith.mulf %318, %412 : vector<16x256xf32>
    %414 = arith.addf %409, %413 : vector<16x256xf32>
    %415 = vector.extract_strided_slice %0 {offsets = [2, 0, 0], sizes = [1, 1, 256], strides = [1, 1, 1]} : vector<3x3x256xf32> to vector<1x1x256xf32>
    %416 = vector.shape_cast %415 : vector<1x1x256xf32> to vector<1x256xf32>
    %417 = vector.broadcast %416 : vector<1x256xf32> to vector<16x256xf32>
    %418 = arith.mulf %376, %417 : vector<16x256xf32>
    %419 = arith.addf %414, %418 : vector<16x256xf32>
    %420 = vector.extract_strided_slice %0 {offsets = [2, 1, 0], sizes = [1, 1, 256], strides = [1, 1, 1]} : vector<3x3x256xf32> to vector<1x1x256xf32>
    %421 = vector.shape_cast %420 : vector<1x1x256xf32> to vector<1x256xf32>
    %422 = vector.broadcast %421 : vector<1x256xf32> to vector<16x256xf32>
    %423 = arith.mulf %369, %422 : vector<16x256xf32>
    %424 = arith.addf %419, %423 : vector<16x256xf32>
    %425 = vector.extract_strided_slice %0 {offsets = [2, 2, 0], sizes = [1, 1, 256], strides = [1, 1, 1]} : vector<3x3x256xf32> to vector<1x1x256xf32>
    %426 = vector.shape_cast %425 : vector<1x1x256xf32> to vector<1x256xf32>
    %427 = vector.broadcast %426 : vector<1x256xf32> to vector<16x256xf32>
    %428 = arith.mulf %383, %427 : vector<16x256xf32>
    %429 = arith.addf %424, %428 : vector<16x256xf32>
    %c0_101 = arith.constant 0 : index
    %c5_102 = arith.constant 5 : index
    %c0_103 = arith.constant 0 : index
    %c0_104 = arith.constant 0 : index
    %430 = vector.load %arg7[%c0_101, %c5_102, %c0_103, %c0_104] : memref<1x8x16x256xf32, #tpu.memory_space<vmem>>, vector<1x1x16x256xf32>
    %431 = vector.shape_cast %430 : vector<1x1x16x256xf32> to vector<16x256xf32>
    %432 = vector.shape_cast %429 : vector<16x256xf32> to vector<1x1x16x256xf32>
    tpu.vector_store %arg7[%c0_101, %c5_102, %c0_103, %c0_104], %432 {strides = array<i32>} : memref<1x8x16x256xf32, #tpu.memory_space<vmem>>, vector<1x1x16x256xf32>,
    %c0_105 = arith.constant 0 : index
    %c7 = arith.constant 7 : index
    %c0_106 = arith.constant 0 : index
    %c0_107 = arith.constant 0 : index
    %433 = vector.load %arg2[%c0_105, %c7, %c0_106, %c0_107] : memref<1x8x16x256xf32, #tpu.memory_space<vmem>>, vector<1x1x16x256xf32>
    %434 = vector.shape_cast %433 : vector<1x1x16x256xf32> to vector<16x256xf32>
    %c1_i32_108 = arith.constant 1 : i32
    %435 = vector.broadcast %c1_i32_108 : i32 to vector<16x1xi32>
    %436 = arith.cmpi sge, %12, %435 : vector<16x1xi32>
    %c1_i32_109 = arith.constant 1 : i32
    %437 = tpu.dynamic_rotate %434 by %c1_i32_109 dim 0 : vector<16x256xf32>, i32 -> vector<16x256xf32>
    %cst_110 = arith.constant 0.000000e+00 : f32
    %438 = vector.shape_cast %436 : vector<16x1xi1> to vector<16x1xi1>
    %439 = vector.broadcast %438 : vector<16x1xi1> to vector<16x256xi1>
    %440 = vector.broadcast %cst_110 : f32 to vector<16x256xf32>
    %441 = arith.select %439, %437, %440 : vector<16x256xi1>, vector<16x256xf32>
    %c14_i32_111 = arith.constant 14 : i32
    %442 = vector.broadcast %c14_i32_111 : i32 to vector<16x1xi32>
    %443 = arith.cmpi sle, %12, %442 : vector<16x1xi32>
    %c15_i32_112 = arith.constant 15 : i32
    %444 = tpu.dynamic_rotate %434 by %c15_i32_112 dim 0 : vector<16x256xf32>, i32 -> vector<16x256xf32>
    %cst_113 = arith.constant 0.000000e+00 : f32
    %445 = vector.shape_cast %443 : vector<16x1xi1> to vector<16x1xi1>
    %446 = vector.broadcast %445 : vector<16x1xi1> to vector<16x256xi1>
    %447 = vector.broadcast %cst_113 : f32 to vector<16x256xf32>
    %448 = arith.select %446, %444, %447 : vector<16x256xi1>, vector<16x256xf32>
    %449 = vector.extract_strided_slice %0 {offsets = [1, 1, 0], sizes = [1, 1, 256], strides = [1, 1, 1]} : vector<3x3x256xf32> to vector<1x1x256xf32>
    %450 = vector.shape_cast %449 : vector<1x1x256xf32> to vector<1x256xf32>
    %451 = vector.broadcast %450 : vector<1x256xf32> to vector<16x256xf32>
    %452 = arith.mulf %369, %451 : vector<16x256xf32>
    %453 = vector.broadcast %1 : vector<1x256xf32> to vector<16x256xf32>
    %454 = arith.addf %452, %453 : vector<16x256xf32>
    %455 = vector.extract_strided_slice %0 {offsets = [0, 0, 0], sizes = [1, 1, 256], strides = [1, 1, 1]} : vector<3x3x256xf32> to vector<1x1x256xf32>
    %456 = vector.shape_cast %455 : vector<1x1x256xf32> to vector<1x256xf32>
    %457 = vector.broadcast %456 : vector<1x256xf32> to vector<16x256xf32>
    %458 = arith.mulf %311, %457 : vector<16x256xf32>
    %459 = arith.addf %454, %458 : vector<16x256xf32>
    %460 = vector.extract_strided_slice %0 {offsets = [0, 1, 0], sizes = [1, 1, 256], strides = [1, 1, 1]} : vector<3x3x256xf32> to vector<1x1x256xf32>
    %461 = vector.shape_cast %460 : vector<1x1x256xf32> to vector<1x256xf32>
    %462 = vector.broadcast %461 : vector<1x256xf32> to vector<16x256xf32>
    %463 = arith.mulf %304, %462 : vector<16x256xf32>
    %464 = arith.addf %459, %463 : vector<16x256xf32>
    %465 = vector.extract_strided_slice %0 {offsets = [0, 2, 0], sizes = [1, 1, 256], strides = [1, 1, 1]} : vector<3x3x256xf32> to vector<1x1x256xf32>
    %466 = vector.shape_cast %465 : vector<1x1x256xf32> to vector<1x256xf32>
    %467 = vector.broadcast %466 : vector<1x256xf32> to vector<16x256xf32>
    %468 = arith.mulf %318, %467 : vector<16x256xf32>
    %469 = arith.addf %464, %468 : vector<16x256xf32>
    %470 = vector.extract_strided_slice %0 {offsets = [1, 0, 0], sizes = [1, 1, 256], strides = [1, 1, 1]} : vector<3x3x256xf32> to vector<1x1x256xf32>
    %471 = vector.shape_cast %470 : vector<1x1x256xf32> to vector<1x256xf32>
    %472 = vector.broadcast %471 : vector<1x256xf32> to vector<16x256xf32>
    %473 = arith.mulf %376, %472 : vector<16x256xf32>
    %474 = arith.addf %469, %473 : vector<16x256xf32>
    %475 = vector.extract_strided_slice %0 {offsets = [1, 2, 0], sizes = [1, 1, 256], strides = [1, 1, 1]} : vector<3x3x256xf32> to vector<1x1x256xf32>
    %476 = vector.shape_cast %475 : vector<1x1x256xf32> to vector<1x256xf32>
    %477 = vector.broadcast %476 : vector<1x256xf32> to vector<16x256xf32>
    %478 = arith.mulf %383, %477 : vector<16x256xf32>
    %479 = arith.addf %474, %478 : vector<16x256xf32>
    %480 = vector.extract_strided_slice %0 {offsets = [2, 0, 0], sizes = [1, 1, 256], strides = [1, 1, 1]} : vector<3x3x256xf32> to vector<1x1x256xf32>
    %481 = vector.shape_cast %480 : vector<1x1x256xf32> to vector<1x256xf32>
    %482 = vector.broadcast %481 : vector<1x256xf32> to vector<16x256xf32>
    %483 = arith.mulf %441, %482 : vector<16x256xf32>
    %484 = arith.addf %479, %483 : vector<16x256xf32>
    %485 = vector.extract_strided_slice %0 {offsets = [2, 1, 0], sizes = [1, 1, 256], strides = [1, 1, 1]} : vector<3x3x256xf32> to vector<1x1x256xf32>
    %486 = vector.shape_cast %485 : vector<1x1x256xf32> to vector<1x256xf32>
    %487 = vector.broadcast %486 : vector<1x256xf32> to vector<16x256xf32>
    %488 = arith.mulf %434, %487 : vector<16x256xf32>
    %489 = arith.addf %484, %488 : vector<16x256xf32>
    %490 = vector.extract_strided_slice %0 {offsets = [2, 2, 0], sizes = [1, 1, 256], strides = [1, 1, 1]} : vector<3x3x256xf32> to vector<1x1x256xf32>
    %491 = vector.shape_cast %490 : vector<1x1x256xf32> to vector<1x256xf32>
    %492 = vector.broadcast %491 : vector<1x256xf32> to vector<16x256xf32>
    %493 = arith.mulf %448, %492 : vector<16x256xf32>
    %494 = arith.addf %489, %493 : vector<16x256xf32>
    %c0_114 = arith.constant 0 : index
    %c6_115 = arith.constant 6 : index
    %c0_116 = arith.constant 0 : index
    %c0_117 = arith.constant 0 : index
    %495 = vector.load %arg7[%c0_114, %c6_115, %c0_116, %c0_117] : memref<1x8x16x256xf32, #tpu.memory_space<vmem>>, vector<1x1x16x256xf32>
    %496 = vector.shape_cast %495 : vector<1x1x16x256xf32> to vector<16x256xf32>
    %497 = vector.shape_cast %494 : vector<16x256xf32> to vector<1x1x16x256xf32>
    tpu.vector_store %arg7[%c0_114, %c6_115, %c0_116, %c0_117], %497 {strides = array<i32>} : memref<1x8x16x256xf32, #tpu.memory_space<vmem>>, vector<1x1x16x256xf32>,
    %c1_i32_118 = arith.constant 1 : i32
    %498 = vector.broadcast %c1_i32_118 : i32 to vector<16x1xi32>
    %499 = arith.cmpi sge, %12, %498 : vector<16x1xi32>
    %c1_i32_119 = arith.constant 1 : i32
    %500 = tpu.dynamic_rotate %11 by %c1_i32_119 dim 0 : vector<16x256xf32>, i32 -> vector<16x256xf32>
    %cst_120 = arith.constant 0.000000e+00 : f32
    %501 = vector.shape_cast %499 : vector<16x1xi1> to vector<16x1xi1>
    %502 = vector.broadcast %501 : vector<16x1xi1> to vector<16x256xi1>
    %503 = vector.broadcast %cst_120 : f32 to vector<16x256xf32>
    %504 = arith.select %502, %500, %503 : vector<16x256xi1>, vector<16x256xf32>
    %c14_i32_121 = arith.constant 14 : i32
    %505 = vector.broadcast %c14_i32_121 : i32 to vector<16x1xi32>
    %506 = arith.cmpi sle, %12, %505 : vector<16x1xi32>
    %c15_i32_122 = arith.constant 15 : i32
    %507 = tpu.dynamic_rotate %11 by %c15_i32_122 dim 0 : vector<16x256xf32>, i32 -> vector<16x256xf32>
    %cst_123 = arith.constant 0.000000e+00 : f32
    %508 = vector.shape_cast %506 : vector<16x1xi1> to vector<16x1xi1>
    %509 = vector.broadcast %508 : vector<16x1xi1> to vector<16x256xi1>
    %510 = vector.broadcast %cst_123 : f32 to vector<16x256xf32>
    %511 = arith.select %509, %507, %510 : vector<16x256xi1>, vector<16x256xf32>
    %512 = vector.extract_strided_slice %0 {offsets = [1, 1, 0], sizes = [1, 1, 256], strides = [1, 1, 1]} : vector<3x3x256xf32> to vector<1x1x256xf32>
    %513 = vector.shape_cast %512 : vector<1x1x256xf32> to vector<1x256xf32>
    %514 = vector.broadcast %513 : vector<1x256xf32> to vector<16x256xf32>
    %515 = arith.mulf %434, %514 : vector<16x256xf32>
    %516 = vector.broadcast %1 : vector<1x256xf32> to vector<16x256xf32>
    %517 = arith.addf %515, %516 : vector<16x256xf32>
    %518 = vector.extract_strided_slice %0 {offsets = [0, 0, 0], sizes = [1, 1, 256], strides = [1, 1, 1]} : vector<3x3x256xf32> to vector<1x1x256xf32>
    %519 = vector.shape_cast %518 : vector<1x1x256xf32> to vector<1x256xf32>
    %520 = vector.broadcast %519 : vector<1x256xf32> to vector<16x256xf32>
    %521 = arith.mulf %376, %520 : vector<16x256xf32>
    %522 = arith.addf %517, %521 : vector<16x256xf32>
    %523 = vector.extract_strided_slice %0 {offsets = [0, 1, 0], sizes = [1, 1, 256], strides = [1, 1, 1]} : vector<3x3x256xf32> to vector<1x1x256xf32>
    %524 = vector.shape_cast %523 : vector<1x1x256xf32> to vector<1x256xf32>
    %525 = vector.broadcast %524 : vector<1x256xf32> to vector<16x256xf32>
    %526 = arith.mulf %369, %525 : vector<16x256xf32>
    %527 = arith.addf %522, %526 : vector<16x256xf32>
    %528 = vector.extract_strided_slice %0 {offsets = [0, 2, 0], sizes = [1, 1, 256], strides = [1, 1, 1]} : vector<3x3x256xf32> to vector<1x1x256xf32>
    %529 = vector.shape_cast %528 : vector<1x1x256xf32> to vector<1x256xf32>
    %530 = vector.broadcast %529 : vector<1x256xf32> to vector<16x256xf32>
    %531 = arith.mulf %383, %530 : vector<16x256xf32>
    %532 = arith.addf %527, %531 : vector<16x256xf32>
    %533 = vector.extract_strided_slice %0 {offsets = [1, 0, 0], sizes = [1, 1, 256], strides = [1, 1, 1]} : vector<3x3x256xf32> to vector<1x1x256xf32>
    %534 = vector.shape_cast %533 : vector<1x1x256xf32> to vector<1x256xf32>
    %535 = vector.broadcast %534 : vector<1x256xf32> to vector<16x256xf32>
    %536 = arith.mulf %441, %535 : vector<16x256xf32>
    %537 = arith.addf %532, %536 : vector<16x256xf32>
    %538 = vector.extract_strided_slice %0 {offsets = [1, 2, 0], sizes = [1, 1, 256], strides = [1, 1, 1]} : vector<3x3x256xf32> to vector<1x1x256xf32>
    %539 = vector.shape_cast %538 : vector<1x1x256xf32> to vector<1x256xf32>
    %540 = vector.broadcast %539 : vector<1x256xf32> to vector<16x256xf32>
    %541 = arith.mulf %448, %540 : vector<16x256xf32>
    %542 = arith.addf %537, %541 : vector<16x256xf32>
    %543 = vector.extract_strided_slice %0 {offsets = [2, 0, 0], sizes = [1, 1, 256], strides = [1, 1, 1]} : vector<3x3x256xf32> to vector<1x1x256xf32>
    %544 = vector.shape_cast %543 : vector<1x1x256xf32> to vector<1x256xf32>
    %545 = vector.broadcast %544 : vector<1x256xf32> to vector<16x256xf32>
    %546 = arith.mulf %504, %545 : vector<16x256xf32>
    %547 = arith.addf %542, %546 : vector<16x256xf32>
    %548 = vector.extract_strided_slice %0 {offsets = [2, 1, 0], sizes = [1, 1, 256], strides = [1, 1, 1]} : vector<3x3x256xf32> to vector<1x1x256xf32>
    %549 = vector.shape_cast %548 : vector<1x1x256xf32> to vector<1x256xf32>
    %550 = vector.broadcast %549 : vector<1x256xf32> to vector<16x256xf32>
    %551 = arith.mulf %11, %550 : vector<16x256xf32>
    %552 = arith.addf %547, %551 : vector<16x256xf32>
    %553 = vector.extract_strided_slice %0 {offsets = [2, 2, 0], sizes = [1, 1, 256], strides = [1, 1, 1]} : vector<3x3x256xf32> to vector<1x1x256xf32>
    %554 = vector.shape_cast %553 : vector<1x1x256xf32> to vector<1x256xf32>
    %555 = vector.broadcast %554 : vector<1x256xf32> to vector<16x256xf32>
    %556 = arith.mulf %511, %555 : vector<16x256xf32>
    %557 = arith.addf %552, %556 : vector<16x256xf32>
    %c0_124 = arith.constant 0 : index
    %c7_125 = arith.constant 7 : index
    %c0_126 = arith.constant 0 : index
    %c0_127 = arith.constant 0 : index
    %558 = vector.load %arg7[%c0_124, %c7_125, %c0_126, %c0_127] : memref<1x8x16x256xf32, #tpu.memory_space<vmem>>, vector<1x1x16x256xf32>
    %559 = vector.shape_cast %558 : vector<1x1x16x256xf32> to vector<16x256xf32>
    %560 = vector.shape_cast %557 : vector<16x256xf32> to vector<1x1x16x256xf32>
    tpu.vector_store %arg7[%c0_124, %c7_125, %c0_126, %c0_127], %560 {strides = array<i32>} : memref<1x8x16x256xf32, #tpu.memory_space<vmem>>, vector<1x1x16x256xf32>,
    return
  }
  func.func @transform_0(%arg0: i32, %arg1: i32) -> (i32, i32, i32, i32) {
    %c0_i32 = arith.constant 0 : i32
    %c0_i32_0 = arith.constant 0 : i32
    %c0_i32_1 = arith.constant 0 : i32
    return %arg0, %arg1, %c0_i32, %c0_i32_0 : i32, i32, i32, i32
  }
  func.func @transform_1(%arg0: i32, %arg1: i32) -> (i32, i32, i32, i32) {
    %c8_i32 = arith.constant 8 : i32
    %0 = arith.muli %arg1, %c8_i32 : i32
    %c1_i32 = arith.constant 1 : i32
    %1 = arith.subi %0, %c1_i32 : i32
    %c0_i32 = arith.constant 0 : i32
    %2 = arith.maxsi %1, %c0_i32 : i32
    %c0_i32_0 = arith.constant 0 : i32
    %c0_i32_1 = arith.constant 0 : i32
    %c0_i32_2 = arith.constant 0 : i32
    return %arg0, %2, %c0_i32_0, %c0_i32_1 : i32, i32, i32, i32
  }
  func.func @transform_2(%arg0: i32, %arg1: i32) -> (i32, i32, i32, i32) {
    %c1_i32 = arith.constant 1 : i32
    %0 = arith.addi %arg1, %c1_i32 : i32
    %c8_i32 = arith.constant 8 : i32
    %1 = arith.muli %0, %c8_i32 : i32
    %c15_i32 = arith.constant 15 : i32
    %2 = arith.minsi %1, %c15_i32 : i32
    %c0_i32 = arith.constant 0 : i32
    %c0_i32_0 = arith.constant 0 : i32
    %c0_i32_1 = arith.constant 0 : i32
    return %arg0, %2, %c0_i32, %c0_i32_0 : i32, i32, i32, i32
  }
  func.func @transform_3(%arg0: i32, %arg1: i32) -> (i32, i32, i32) {
    %c0_i32 = arith.constant 0 : i32
    %c0_i32_0 = arith.constant 0 : i32
    %c0_i32_1 = arith.constant 0 : i32
    %c0_i32_2 = arith.constant 0 : i32
    return %c0_i32, %c0_i32_0, %c0_i32_1 : i32, i32, i32
  }
  func.func @transform_4(%arg0: i32, %arg1: i32) -> (i32, i32) {
    %c0_i32 = arith.constant 0 : i32
    %c0_i32_0 = arith.constant 0 : i32
    %c0_i32_1 = arith.constant 0 : i32
    return %c0_i32, %c0_i32_0 : i32, i32
  }
  func.func @transform_5(%arg0: i32, %arg1: i32) -> (i32, i32, i32, i32) {
    %c0_i32 = arith.constant 0 : i32
    %c0_i32_0 = arith.constant 0 : i32
    %c0_i32_1 = arith.constant 0 : i32
    return %arg0, %arg1, %c0_i32, %c0_i32_0 : i32, i32, i32, i32
  }
}

</mosaic_0001>

<bundles_post_ra>
// kernel: tpu_custom_call.1
= control target key start
LH: loop header
LB: loop body
LE: loop exit
PB: predicated region body
PF: predicated region fallthrough
CT: control target
= control target key end

     0   :  { %s4207_s0 = inlined_call_operand.hbm [shape: f32[2,16,16,256], index: 0, kind: input, shape index: {}]   ;;  %s4208_s1 = inlined_call_operand.hbm [shape: f32[2,16,16,256], index: 1, kind: input, shape index: {}]   ;;  %s4209_s2 = inlined_call_operand.hbm [shape: f32[2,16,16,256], index: 2, kind: input, shape index: {}]   ;;  %s4210_s3 = inlined_call_operand.hbm [shape: f32[3,3,256], index: 3, kind: input, shape index: {}]   ;;  %s4211_s4 = inlined_call_operand.vmem [shape: f32[1,256], index: 4, kind: input, shape index: {}]   ;;  %s4212_s5 = inlined_call_operand.hbm [shape: f32[2,16,16,256], index: 5, kind: output, shape index: {}]  }
   0x1   :  { %4272 = sst [smem:[#allocation46_spill]] %s4207_s0 }
   0x2   :  { %4273 = sst [smem:[#allocation47_spill]] %s4208_s1 }
   0x3   :  { %4274 = sst [smem:[#allocation48_spill]] %s4209_s2 }
   0x4   :  { %4275 = sst [smem:[#allocation49_spill]] %s4210_s3 }
   0x5   :  { %4276 = sst [smem:[#allocation50_spill]] %s4211_s4 }
   0x6   :  { %4277 = sst [smem:[#allocation51_spill]] %s4212_s5 }
   0x7   :  { %10 = vsyncpa [#allocation3], 0 }
   0x8   :  { %12 = vsyncpa [#allocation3 + $0x1], 0 }
   0x9   :  { %13 = vsyncpa [#allocation6], 0 }
   0xa   :  { %15 = vsyncpa [#allocation6 + $0x1], 0 }
   0xb   :  { %16 = vsyncpa [#allocation9], 0 }
   0xc   :  { %17 = vsyncpa [#allocation4], 0 }
   0xd   :  { %19 = vsyncpa [#allocation4 + $0x1], 0  ;;  %s2277_s18 = smov 0   ;;  %s2279_s19 = smov 0  }
   0xe   :  { %s2281_s20 = smov 0   ;;  %s2283_s21 = smov 0  }
   0xf   :  { %s2285_s22 = smov 0   ;;  %s2287_s23 = smov 0  }
  0x10   :  { %s2289_s24 = smov 0   ;;  %s2291_s25 = smov 0  }
  0x11   :  { %s2293_s26 = smov 0   ;;  %s2295_s27 = smov 0  }
  0x12   :  { %s2297_s28 = smov 0   ;;  %s2299_s29 = smov 0  }
  0x13   :  { %s2301_s30 = smov 0   ;;  %s2303_s6 = smov 0  }
  0x14 LB: > { %4278 = sst [smem:[#allocation16_spill]] %s2182_s18  ;;  %s34_s7 = sadd.s32 1, %s2226_s29  ;;  %s2234_s6 = sphi %s2303_s6, %s25_s6   ;;  %s2230_s30 = sphi %s2301_s30, %s4424_s30   ;;  %s2226_s29 = sphi %s2299_s29, %s4423_s29   ;;  %s2222_s28 = sphi %s2297_s28, %s4422_s28   ;;  %s2218_s27 = sphi %s2295_s27, %s4431_s27   ;;  %s2214_s26 = sphi %s2293_s26, %s4420_s26   ;;  %s2210_s25 = sphi %s2291_s25, %s4430_s25   ;;  %s2206_s24 = sphi %s2289_s24, %s4429_s24   ;;  %s2202_s23 = sphi %s2287_s23, %s4418_s23   ;;  %s2198_s22 = sphi %s2285_s22, %s4428_s22   ;;  %s2194_s21 = sphi %s2283_s21, %s4427_s21   ;;  %s2190_s20 = sphi %s2281_s20, %s4426_s20   ;;  %s2186_s19 = sphi %s2279_s19, %s4416_s19   ;;  %s2182_s18 = sphi %s2277_s18, %s4415_s18  }
  0x15   : > { %4279 = sst [smem:[#allocation17_spill]] %s2186_s19  ;;  %s37_s8 = sadd.s32 1, %s2230_s30 }
  0x16   : > { %4280 = sst [smem:[#allocation18_spill]] %s2190_s20  ;;  %p35_p0 = scmp.ge.s32.totalorder %s34_s7, 2 }
  0x17   : > { %4281 = sst [smem:[#allocation19_spill]] %s2202_s23  ;;  %p4224_p1 = scmp.eq.s32.totalorder %s2234_s6, 0 }
  0x18   : > { %4282 = sst [smem:[#allocation20_spill]] %s2214_s26  ;;  %s1679_s9 = sshll.u32 %s2226_s29, 3 }
  0x19   : > { %4283 = sst [smem:[#allocation21_spill]] %s2218_s27  ;;  %s82_s10 = sadd.s32 1, %s2202_s23 }
  0x1a   : > { %4284 = sst [smem:[#allocation22_spill]] %s2222_s28  ;;  %s4433_s7 = smov (%p35_p0, %s34_s7), 0 }
  0x1b   : > { %4285 = sst [smem:[#allocation23_spill]] %s2226_s29  ;;  %s4435_s8 = smov (!%p35_p0, %s37_s8), %s2230_s30 }
  0x1c   : > { %4286 = sst [smem:[#allocation24_spill]] %s2230_s30  ;;  %s42_s11 = ssub.s32 %s2226_s29, %s4433_s7 }
  0x1d   : > { %4287 = sst [smem:[#allocation25_spill]] %s4433_s7  ;;  %s1680_s12 = sadd.s32 4294967295, %s1679_s9 }
  0x1e   : > { %p39_p2 = scmp.ge.s32.totalorder %s4435_s8, 2  ;;  %p71_p3 = scmp.gt.s32.totalorder %s1680_s12, 0 }
  0x1f   : > { %s1681_s13 = sshll.u32 %s4433_s7, 3  ;;  %p89_p4 = scmp.ne.s32.totalorder %s2202_s23, %s2198_s22 }
  0x20   : > { %s4437_s8 = smov (%p39_p2, %s4435_s8), 0  ;;  %s4439_s12 = smov (!%p71_p3, %s1680_s12), 0 }
  0x21   : > { %4288 = sst [smem:[#allocation26_spill]] %s4437_s8  ;;  %s2364_s14 = ssub.s32 %s2230_s30, %s4437_s8 }
  0x22   : > { %4289 = sst [smem:[#allocation27_spill]] %s2364_s14  ;;  %s1682_s15 = sadd.s32 4294967295, %s1681_s13 }
  0x23   : > { %s2367_s16 = sor.u32 %s42_s11, %s2364_s14  ;;  %p75_p5 = scmp.gt.s32.totalorder %s1682_s15, 0 }
  0x24   : > { %p2372_p7 = por %p89_p4, %p4224_p1  ;;  %p95_p8 = scmp.ne.s32.totalorder %s2198_s22, %s2194_s21 }
  0x25   : > { %s4441_s15 = smov (!%p75_p5, %s1682_s15), 0  ;;  %s2378_s8 = sadd.s32 8, %s1679_s9 }
  0x26   : > { %4291 = sst [smem:[#allocation28_spill]] %s2378_s8  ;;  %s78_s7 = ssub.s32 %s4439_s12, %s4441_s15 }
  0x27   : > { %s79_s5 = sor.u32 %s78_s7, %s2364_s14  ;;  %s2382_s11 = sadd.s32 8, %s1681_s13 }
  0x28   : > { %p80_p10 = scmp.eq.s32.totalorder %s79_s5, 0  ;;  %p4223_p12 = scmp.lt.s32.totalorder %s2234_s6, 4 }
  0x29   : > { %s2390_s4 = sshll.u32 %s2230_s30, 6  ;;  %s265_s27 = sand.u32 1, %s2234_s6  }
  0x2a   : > { %s2387_s28 = scalar_select %p80_p10, %s2202_s23, %s82_s10  }
  0x2b   : > { %s267_s9 = sand.u32 1, %s2202_s23   ;;  %s1696_s18 = sshll.u32 %s4439_s12, 2 }
  0x2c   : > { %4292 = sst [smem:[#allocation29_spill]] %s2387_s28  ;;  %s1693_s2 = sshll.u32 %s267_s9, 5 }
  0x2d   : > { %s279_s15 = sadd.s32 %s1696_s18, %s2390_s4  ;;  %s269_s7 = scalar_lea.vmem [#allocation5], %s1693_s2 }
  0x2e   : > { %s1698_s19 = sshll.u32 %s279_s15, 7  ;;  %s282_s13 = sshll.u32 %s269_s7, 4  ;;  %s2400_s13 = int_to_ptr.vmem [resolvable:$true] %s282_s13 }
  0x2f   : > { %s4293_s1 = sld [smem:[#allocation47_spill]]  ;;  %p2406_p13 = pnand %p4223_p12, %p2372_p7 }
  0x30   : > { %s2410_s2 = scalar_lea.sflag [#allocation6], %s265_s27 }
  0x31   : > { %p1960_p2 = pneg %p2406_p13 }
  0x35   : > { %s2398_s20 = scalar_lea.hbm %s4293_s1, %s1698_s19  ;;  %s1963_s10 = scalar_lea.hbm %s4293_s1, 16384 }
  0x36   : > { %s1958_s18 = scalar_lea.hbm %s2398_s20, 512  ;;  %p1964_p5 = scmp.lt.u32.totalorder %s2398_s20, %s4293_s1 }
  0x37   : > { %p1959_p0 = scmp.ne.s32.totalorder %s2398_s20, %s1958_s18  ;;  %p1965_p7 = scmp.lt.u32.totalorder %s1963_s10, %s1958_s18 }
  0x38   : > { %p1967_p11 = scmp.lt.u32.totalorder %s1958_s18, %s2398_s20 }
  0x39   : > { %p1961_p3 = pnand %p1960_p2, %p1959_p0  ;;  %p1966_p10 = por %p1965_p7, %p1964_p5 }
  0x3b   : > { %p1962_p4 = pneg %p1961_p3  ;;  %p1968_p9 = por %p1967_p11, %p1966_p10 }
  0x3d   : > { %p1969_p12 = pnand %p1968_p9, %p1962_p4 }
  0x3f   : > { %1972 = shalt.err (!%p1969_p12)
}
  0x40   : > { %s1973_s27 = scalar_lea.vmem %s2400_s13, 512  ;;  %s2236_s17 = smov [#allocation5]  }
  0x41   : > { %p1974_p0 = scmp.ne.s32.totalorder %s2400_s13, %s1973_s27  ;;  %s1978_s9 = sshll.u32 %s2236_s17, 4  ;;  %s1979_s9 = int_to_ptr.vmem [resolvable:$false] %s1978_s9 }
  0x42   : > { %s1980_s15 = scalar_lea.vmem %s1979_s9, 1024  ;;  %p1981_p6 = scmp.lt.s32.totalorder %s2400_s13, %s1979_s9 }
  0x43   : > { %p1976_p3 = pnand %p1974_p0, %p1960_p2  ;;  %p1982_p5 = scmp.lt.s32.totalorder %s1980_s15, %s1973_s27 }
  0x45   : > { %p1977_p1 = pneg %p1976_p3  ;;  %p1983_p7 = por %p1982_p5, %p1981_p6 }
  0x47   : > { %p1984_p11 = pnand %p1983_p7, %p1977_p1 }
  0x49   : > { %1987 = shalt.err (!%p1984_p11)
}
  0x4a   : > { %s4228_s7 = smov 256   ;;  %s4230_s18 = smov 16  }
  0x4b   : > { %1803 = dma.hbm_to_vmem [thread:$0]  (!%p2406_p13), %s2398_s20, 512, %s2400_s13, %s2410_s2, %s4228_s7, %s4228_s7, %s4230_s18  }
  0x4c   : > { %s2442_s19 = sadd.s32 4294967295, %s2234_s6   ;;  %p1685_p1 = scmp.ge.s32.totalorder %s2234_s6, 1 }
  0x4d   : > { %p4225_p6 = scmp.eq.s32.totalorder %s2442_s19, 0  ;;  %p212_p12 = scmp.lt.s32.totalorder %s2234_s6, 5 }
  0x4e   : > { %s2239_s20 = smov [#allocation8]   ;;  %s4298_s3 = sld [smem:[#allocation49_spill]] }
  0x4f   : > { %p2453_p2 = por %p95_p8, %p4225_p6  ;;  %p2457_p4 = pnand %p1685_p1, %p212_p12 }
  0x50   : > { %s224_s13 = sshll.u32 %s2239_s20, 4  ;;  %s225_s13 = int_to_ptr.vmem [resolvable:$true] %s224_s13 }
  0x51   : > { %s4295_s8 = scalar_select %p2453_p2, 1, 0 }
  0x52   : > { %s4296_s5 = scalar_select %p2457_p4, 1, 0 }
  0x53   : > { %p1793_p13 = pneg %p2457_p4 }
  0x54   : > { %s1988_s14 = scalar_lea.hbm %s4298_s3, 384 }
  0x55   : > { %p2465_p10 = pnand %p1793_p13, %p4225_p6  ;;  %p1989_p8 = scmp.ne.s32.totalorder %s4298_s3, %s1988_s14 }
  0x56   : > { %p1995_p7 = scmp.lt.u32.totalorder %s1988_s14, %s4298_s3 }
  0x57   : > { %p1990_p0 = pneg %p2465_p10 }
  0x59   : > { %p1991_p3 = pnand %p1990_p0, %p1989_p8 }
  0x5b   : > { %p1992_p5 = pneg %p1991_p3 }
  0x5d   : > { %p1997_p11 = pnand %p1995_p7, %p1992_p5 }
  0x5f   : > { %2000 = shalt.err (!%p1997_p11)
}
  0x60   : > { %s2001_s20 = scalar_lea.vmem %s225_s13, 384  ;;  %p2009_p9 = scmp.lt.s32.totalorder %s225_s13, %s225_s13 }
  0x61   : > { %p2002_p1 = scmp.ne.s32.totalorder %s225_s13, %s2001_s20  ;;  %p2010_p6 = scmp.lt.s32.totalorder %s2001_s20, %s2001_s20 }
  0x63   : > { %p2004_p12 = pnand %p2002_p1, %p1990_p0  ;;  %p2011_p2 = por %p2010_p6, %p2009_p9 }
  0x65   : > { %p2005_p13 = pneg %p2004_p12 }
  0x67   : > { %p2012_p4 = pnand %p2011_p2, %p2005_p13 }
  0x69   : > { %2015 = shalt.err (!%p2012_p4)
}
  0x6a   : > { %s2240_s21 = smov 128   ;;  %s2241_s12 = smov 8  }
  0x6b   : > { %1796 = dma.hbm_to_vmem [thread:$0]  (!%p2465_p10), %s4298_s3, 384, %s225_s13, [#allocation9], %s2240_s21, %s2240_s21, %s2241_s12  }
  0x6c   : > { %s1678_s17 = sadd.s32 4294967294, %s2234_s6   ;;  %s46_s9 = sadd.s32 1, %s2214_s26 }
  0x6d   : > { %p4299_p6 = scmp.eq.s32.totalorder %s2367_s16, 0  ;;  %p53_p9 = scmp.ne.s32.totalorder %s2214_s26, %s2210_s25 }
  0x6e   : > { %p59_p2 = scmp.ne.s32.totalorder %s2210_s25, %s2206_s24  ;;  %p205_p4 = scmp.eq.s32.totalorder %s1678_s17, 3 }
  0x6f   : > { %s2490_s15 = scalar_select %p4299_p6, %s2214_s26, %s46_s9  }
  0x70   : > { %s241_s20 = sand.u32 1, %s2214_s26   ;;  %p4301_p8 = scmp.eq.s32.totalorder %s2234_s6, 0 }
  0x71   : > { %4300 = sst [smem:[#allocation30_spill]] %s2490_s15  ;;  %p4302_p3 = scmp.eq.s32.totalorder %s2442_s19, 0 }
  0x72   : > { %p55_p0 = por %p4301_p8, %p53_p9  ;;  %p4304_p7 = scmp.eq.s32.totalorder %s2442_s19, 3 }
  0x73   : > { %p2501_p5 = por %p4302_p3, %p59_p2  ;;  %p2511_p10 = por %p205_p4, %p59_p2 }
  0x74   : > { %p2507_p11 = por %p4304_p7, %p53_p9  ;;  %s1688_s10 = sshll.u32 %s241_s20, 8 }
  0x75   : > { %s4306_s16 = scalar_select %p2511_p10, 1, 0 }
  0x76   : > { %s4305_s13 = scalar_select %p2507_p11, 1, 0 }
  0x77   : > { %4307 = sst [smem:[#allocation31_spill]] %s4306_s16  ;;  %s1777_s21 = sshll.u32 %s2226_s29, 5 }
  0x78   : > { %s252_s12 = sadd.s32 %s1777_s21, %s2390_s4  ;;  %s245_s14 = scalar_lea.vmem [#allocation2], %s1688_s10 }
  0x79   : > { %s255_s27 = sshll.u32 %s245_s14, 4  ;;  %s1692_s17 = sshll.u32 %s252_s12, 7  ;;  %s2517_s27 = int_to_ptr.vmem [resolvable:$true] %s255_s27 }
  0x7a   : > { %s4308_s0 = sld [smem:[#allocation46_spill]]  ;;  %p4309_p1 = scmp.lt.s32.totalorder %s2234_s6, 4 }
  0x7b   : > { %s2530_s10 = scalar_lea.sflag [#allocation3], %s241_s20 }
  0x7c   : > { %p2526_p12 = pnand %p4309_p1, %p55_p0 }
  0x7e   : > { %p2018_p6 = pneg %p2526_p12 }
  0x80   : > { %s2522_s1 = scalar_lea.hbm %s4308_s0, %s1692_s17  ;;  %s2021_s14 = scalar_lea.hbm %s4308_s0, 16384 }
  0x81   : > { %s2016_s21 = scalar_lea.hbm %s2522_s1, 4096  ;;  %p2022_p4 = scmp.lt.u32.totalorder %s2522_s1, %s4308_s0 }
  0x82   : > { %p2017_p13 = scmp.ne.s32.totalorder %s2522_s1, %s2016_s21  ;;  %p2023_p8 = scmp.lt.u32.totalorder %s2021_s14, %s2016_s21 }
  0x83   : > { %p2025_p3 = scmp.lt.u32.totalorder %s2016_s21, %s2522_s1 }
  0x84   : > { %p2019_p9 = pnand %p2018_p6, %p2017_p13  ;;  %p2024_p0 = por %p2023_p8, %p2022_p4 }
  0x86   : > { %p2020_p2 = pneg %p2019_p9  ;;  %p2026_p7 = por %p2025_p3, %p2024_p0 }
  0x88   : > { %p2027_p1 = pnand %p2026_p7, %p2020_p2 }
  0x8a   : > { %2030 = shalt.err (!%p2027_p1)
}
  0x8b   : > { %s2031_s20 = scalar_lea.vmem %s2517_s27, 4096  ;;  %s2242_s18 = smov [#allocation2]  }
  0x8c   : > { %p2032_p13 = scmp.ne.s32.totalorder %s2517_s27, %s2031_s20  ;;  %s2036_s12 = sshll.u32 %s2242_s18, 4  ;;  %s2037_s12 = int_to_ptr.vmem [resolvable:$false] %s2036_s12 }
  0x8d   : > { %s2038_s17 = scalar_lea.vmem %s2037_s12, 8192  ;;  %p2039_p11 = scmp.lt.s32.totalorder %s2517_s27, %s2037_s12 }
  0x8e   : > { %p2034_p9 = pnand %p2032_p13, %p2018_p6  ;;  %p2040_p4 = scmp.lt.s32.totalorder %s2038_s17, %s2031_s20 }
  0x90   : > { %p2035_p10 = pneg %p2034_p9  ;;  %p2041_p8 = por %p2040_p4, %p2039_p11 }
  0x92   : > { %p2042_p0 = pnand %p2041_p8, %p2035_p10 }
  0x94   : > { %2045 = shalt.err (!%p2042_p0)
}
  0x95   : > { %s4311_s21 = smov 16   ;;  %s4312_s14 = smov 256  }
  0x96   : > { %s4313_s9 = sld [smem:[#allocation18_spill]]  ;;  %s4314_s0 = sld [smem:[#allocation28_spill]] }
  0x97   : > { %s4315_s18 = sld [smem:[#allocation17_spill]]  ;;  %s4316_s12 = sld [smem:[#allocation16_spill]] }
  0x98   : > { %s4317_s20 = sld [smem:[#allocation27_spill]]  ;;  %p4319_p10 = scmp.lt.s32.totalorder %s2382_s11, 15 }
  0x99   : > { %1800 = dma.hbm_to_vmem [thread:$0]  (!%p2526_p12), %s2522_s1, 4096, %s2517_s27, %s2530_s10, %s4312_s14, %s4312_s14, %s4311_s21  }
  0x9a   : > { %s4445_s11 = smov (!%p4319_p10, %s2382_s11), 15  ;;  %p4320_p3 = scmp.eq.s32.totalorder %s2234_s6, 0 }
  0x9b   : > { %p4321_p13 = scmp.eq.s32.totalorder %s2442_s19, 0  ;;  %s4323_s23 = sld [smem:[#allocation48_spill]] }
  0x9c   : > { %s118_s3 = sadd.s32 1, %s4313_s9  ;;  %p4318_p11 = scmp.lt.s32.totalorder %s4314_s0, 15 }
  0x9d   : > { %p125_p6 = scmp.ne.s32.totalorder %s4313_s9, %s4315_s18  ;;  %p131_p2 = scmp.ne.s32.totalorder %s4315_s18, %s4316_s12 }
  0x9e   : > { %s4443_s0 = smov (!%p4318_p11, %s4314_s0), 15  ;;  %s294_s30 = sand.u32 1, %s4313_s9  }
  0x9f   : > { %s114_s17 = ssub.s32 %s4443_s0, %s4445_s11  ;;  %p127_p7 = por %p125_p6, %p4320_p3 }
  0xa0   : > { %s115_s29 = sor.u32 %s114_s17, %s4317_s20  ;;  %p2578_p9 = por %p131_p2, %p4321_p13 }
  0xa1   : > { %p116_p1 = scmp.eq.s32.totalorder %s115_s29, 0  ;;  %s1699_s1 = sshll.u32 %s294_s30, 5 }
  0xa2   : > { %s4322_s15 = scalar_select %p2578_p9, 1, 0 }
  0xa3   : > { %s1701_s27 = sshll.u32 %s4443_s0, 2  ;;  %s4447_s9 = smov (!%p116_p1, %s4313_s9), %s118_s3 }
  0xa4   : > { %s306_s10 = sadd.s32 %s1701_s27, %s2390_s4  ;;  %s296_s28 = scalar_lea.vmem [#allocation7], %s1699_s1 }
  0xa5   : > { %s1703_s26 = sshll.u32 %s306_s10, 7  ;;  %s309_s18 = sshll.u32 %s296_s28, 4  ;;  %s2591_s18 = int_to_ptr.vmem [resolvable:$true] %s309_s18 }
  0xa6   : > { %s4324_s16 = smov %s4323_s23  ;;  %s2589_s20 = scalar_lea.hbm %s4323_s23, %s1703_s26 }
  0xa7   : > { %p4325_p12 = scmp.lt.s32.totalorder %s2234_s6, 4  ;;  %s2046_s4 = scalar_lea.hbm %s2589_s20, 512 }
  0xa8   : > { %p2047_p8 = scmp.ne.s32.totalorder %s2589_s20, %s2046_s4  ;;  %s2051_s28 = scalar_lea.hbm %s4324_s16, 16384 }
  0xa9   : > { %p2595_p4 = pnand %p4325_p12, %p127_p7  ;;  %p2052_p6 = scmp.lt.u32.totalorder %s2589_s20, %s4324_s16 }
  0xaa   : > { %p2053_p2 = scmp.lt.u32.totalorder %s2051_s28, %s2046_s4  ;;  %p2055_p7 = scmp.lt.u32.totalorder %s2046_s4, %s2589_s20 }
  0xab   : > { %p2048_p0 = pneg %p2595_p4 }
  0xac   : > { %p2054_p3 = por %p2053_p2, %p2052_p6 }
  0xad   : > { %p2049_p11 = pnand %p2048_p0, %p2047_p8 }
  0xae   : > { %p2056_p1 = por %p2055_p7, %p2054_p3 }
  0xaf   : > { %p2050_p10 = pneg %p2049_p11 }
  0xb1   : > { %p2057_p13 = pnand %p2056_p1, %p2050_p10 }
  0xb3   : > { %2060 = shalt.err (!%p2057_p13)
}
  0xb4   : > { %s2061_s3 = scalar_lea.vmem %s2591_s18, 512  ;;  %s2243_s17 = smov [#allocation7]  }
  0xb5   : > { %p2062_p12 = scmp.ne.s32.totalorder %s2591_s18, %s2061_s3  ;;  %s2066_s1 = sshll.u32 %s2243_s17, 4  ;;  %s2067_s1 = int_to_ptr.vmem [resolvable:$false] %s2066_s1 }
  0xb6   : > { %s2068_s27 = scalar_lea.vmem %s2067_s1, 1024  ;;  %p2069_p9 = scmp.lt.s32.totalorder %s2591_s18, %s2067_s1 }
  0xb7   : > { %p2064_p8 = pnand %p2062_p12, %p2048_p0  ;;  %p2070_p6 = scmp.lt.s32.totalorder %s2068_s27, %s2061_s3 }
  0xb9   : > { %p2065_p11 = pneg %p2064_p8  ;;  %p2071_p2 = por %p2070_p6, %p2069_p9 }
  0xbb   : > { %p2072_p3 = pnand %p2071_p2, %p2065_p11 }
  0xbd   : > { %2075 = shalt.err (!%p2072_p3)
}
  0xbe   : > { %1806 = dma.hbm_to_vmem [thread:$0]  (!%p2595_p4), %s2589_s20, 512, %s2591_s18, %s2410_s2, %s4312_s14, %s4312_s14, %s4311_s21  }
  0xbf   : > { %p4327_p0 = scmp.ne.s32.totalorder %s4296_s5, 0 }
  0xc1   : > { %321 = sbr.rel (%p4327_p0) target bundleno = 458 (0x1ca), region = 40 }
  0xc8   : > { %s2631_s10 = sand.u32 1, %s2210_s25  }
  0xc9   : > { %s1705_s12 = sshll.u32 %s2631_s10, 8  ;;  %s324_s11 = scalar_lea.sflag [#allocation3], %s2631_s10 }
  0xca   : > { %s2637_s0 = scalar_lea.vmem [#allocation2], %s1705_s12 }
  0xcb   : > { %2161 = dma.done.wait (%p2501_p5), %s324_s11, 4096  }
  0xcc   : > { %2163 = vsyncadd (%p2501_p5), %s324_s11, 4294963200  ;;  %s332_s2 = sand.u32 1, %s2442_s19   ;;  %s334_s5 = sand.u32 1, %s2198_s22  }
  0xcd   : > { %s1706_s21 = sshll.u32 %s334_s5, 5  ;;  %s333_s14 = scalar_lea.sflag [#allocation6], %s332_s2 }
  0xce   : > { %s2645_s18 = scalar_lea.vmem [#allocation5], %s1706_s21  ;;  %p4328_p9 = scmp.ne.s32.totalorder %s4295_s8, 0 }
  0xd0   : > { %2165 = dma.done.wait (%p4328_p9), %s333_s14, 512  }
  0xd1   : > { %2167 = vsyncadd (%p4328_p9), %s333_s14, 4294966784  ;;  %s4329_s20 = sld [smem:[#allocation17_spill]]  ;;  %p4330_p5 = scmp.ne.s32.totalorder %s4322_s15, 0 }
  0xd7   : > { %s343_s4 = sand.u32 1, %s4329_s20  }
  0xd8   : > { %s1707_s23 = sshll.u32 %s343_s4, 5 }
  0xd9   : > { %s2652_s7 = scalar_lea.vmem [#allocation7], %s1707_s23 }
  0xda   : > { %2169 = dma.done.wait (%p4330_p5), %s333_s14, 512  }
  0xdb   : > { %2171 = vsyncadd (%p4330_p5), %s333_s14, 4294966784  ;;  %p4331_p4 = scmp.eq.s32.totalorder %s2442_s19, 0 }
  0xdd   : > { %2173 = dma.done.wait (%p4331_p4), [#allocation9], 384   ;;  %p4332_p10 = pmov %p4331_p4 }
  0xde   : > { %s4333_s26 = sld [smem:[#allocation21_spill]]  ;;  %v424_v0 = vlaneseq  ;;  %v2685_v7 = vld [vmem:[#allocation8] sm:$0x77]  ;;  %v2687_v8 = vld [vmem:[#allocation8 + $0x8] sm:$0x77]  ;;  %s4334_s28 = sld [smem:[#allocation50_spill]] }
  0xdf   : > { %2175 = vsyncadd (%p4332_p10), [#allocation9], 4294966912  ;;  %v2705_v13 = vld [vmem:[%s2637_s0] sm:$0xff]  ;;  %v2714_v18 = vld [vmem:[%s2637_s0 + $0x10] sm:$0xff]  ;;  %s2980_s29 = scalar_lea.vmem [#allocation10], %s1705_s12  ;;  %s4409_s3 = sld [smem:[#allocation22_spill]] }
  0xe0   : > { %v2663_v1 = vshrl.u32 %v424_v0, 7  ;;  %4335 = vst [vmem:[#allocation32_spill] sm:$0xff] %v2714_v18  ;;  %v4245_v19 = vrot.slane %v2705_v13, 7  ;;  %v4244_v20 = vrot.slane %v2705_v13, 1  ;;  %v2719_v21 = vld [vmem:[%s2637_s0 + $0x20] sm:$0xff]  ;;  %v4246_v23 = vrot.slane %v2714_v18, 7 }
  0xe1   : > { %v4243_v24 = vrot.slane %v2714_v18, 1  ;;  %v2728_v25 = vld [vmem:[%s2637_s0 + $0x30] sm:$0xff]  ;;  %v4239_v26 = vrot.slane %v2719_v21, 7  ;;  %v4242_v33 = vrot.slane %v2719_v21, 1  ;;  %s1528_s11 = sshll.u32 %s2980_s29, 4  ;;  %s4410_s5 = sld [smem:[#allocation51_spill]]  ;;  %s4127_s11 = int_to_ptr.vmem [resolvable:$true] %s1528_s11 }
  0xe2   : > { %vm427_vm0 = vcmp.ge.s32.totalorder %v2663_v1, 1  ;;  %vm433_vm1 = vcmp.lt.s32.totalorder %v2663_v1, 1  ;;  %v2668_v2 = vsub.s32 1, %v2663_v1  ;;  %v2671_v3 = vsub.s32 0, %v2663_v1  ;;  %4336 = vst [vmem:[#allocation33_spill] sm:$0xff] %v2728_v25  ;;  %s1512_s14 = scalar_lea.sflag [#allocation4], %s2631_s10 }
  0xe3   : > { %vm452_vm2 = vcmp.lt.s32.totalorder %v2663_v1, 7  ;;  %v2677_v4 = vsub.s32 2, %v2663_v1  ;;  %v2680_v5 = vsub.s32 5, %v2663_v1  ;;  %v2683_v6 = vsub.s32 4, %v2663_v1  ;;  %v2752_v36 = vld [vmem:[#allocation8 + $0x10] sm:$0x77] }
  0xe4   : > { %p400_p7 = scmp.gt.s32.totalorder %s4333_s26, 0  ;;  %v2690_v9 = vsub.s32 6, %v2663_v1  ;;  %v2693_v10 = vadd.s32 8, %v2663_v1  ;;  %v2698_v11 = vld [vmem:[%s4334_s28] sm:$0x3]  ;;  %v526_v14 = vrot.slane %v2687_v8, %v2668_v2  ;;  %v564_v15 = vrot.slane %v2685_v7, %v2671_v3  ;;  %p412_p1 = scmp.lt.s32.totalorder %s4333_s26, 1 }
  0xe5   : > { %v590_v27 = vrot.slane %v2685_v7, %v2668_v2  ;;  %v4240_v30 = vrot.slane %v2728_v25, 7  ;;  %v616_v31 = vrot.slane %v2685_v7, %v2677_v4  ;;  %v475_v32 = vsel %vm433_vm1, %v4246_v23, %v4245_v19  ;;  %s1780_s17 = sshll.u32 %s4333_s26, 5  ;;  %s1769_s1 = sshll.u32 %s4409_s3, 6 }
  0xe6   : > { %s2673_s8 = scalar_select %p400_p7, 255, 0  ;;  %v2746_v34 = vrot.slane %v526_v14, %v2668_v2  ;;  %v2750_v35 = vrot.slane %v2698_v11, %v2671_v3  ;;  %v485_v39 = vsel %vm452_vm2, %v4244_v20, %v4243_v24  ;;  %v4241_v40 = vrot.slane %v2728_v25, 1  ;;  %v2833_v14 = vld [vmem:[%s2637_s0 + $0x40] sm:$0xff]  ;;  %v2884_v24 = vld [vmem:[%s2637_s0 + $0x28] sm:$0xff] }
  0xe7   : > { %v477_v42 = vsel %vm427_vm0, %v475_v32, 0.0  ;;  %v504_v43 = vsel %vm433_vm1, %v4240_v30, %v4239_v26  ;;  %v2786_v45 = vrot.slane %v564_v15, %v2671_v3  ;;  %v2789_v46 = vrot.slane %v590_v27, %v2668_v2  ;;  %s4005_s30 = scalar_select %p412_p1, 255, 0 }
  0xe8   : > { %v2702_v12 = vld [vmem:[%s2645_s18] sm:%s2673_s8]  ;;  %v2723_v22 = vld [vmem:[%s2645_s18 + $0x10] sm:%s2673_s8]  ;;  %v541_v44 = vmul.f32 %v2746_v34, %v2705_v13  ;;  %v2792_v47 = vrot.slane %v616_v31, %v2677_v4  ;;  %v642_v48 = vrot.slane %v2687_v8, %v2671_v3  ;;  %v668_v50 = vrot.slane %v2687_v8, %v2677_v4  ;;  %s1525_s27 = sadd.s32 %s1780_s17, %s1769_s1  ;;  %p4411_p12 = scmp.ne.s32.totalorder %s4305_s13, 0 }
  0xe9   : > { %v429_v16 = vrot.slane %v2702_v12, 7  ;;  %v4250_v17 = vrot.slane %v2702_v12, 1  ;;  %v431_v28 = vrot.slane %v2723_v22, 7  ;;  %v4247_v29 = vrot.slane %v2723_v22, 1  ;;  %s1770_s12 = sshll.u32 %s1525_s27, 7  ;;  %s2244_s20 = smov [#allocation10]  }
  0xea   : > { %v556_v49 = vadd.f32 %v2750_v35, %v541_v44  ;;  %v695_v51 = vrot.slane %v2752_v36, %v2671_v3  ;;  %v721_v52 = vrot.slane %v2752_v36, %v2668_v2  ;;  %v2805_v53 = vsel %vm427_vm0, %v504_v43, 0.0  ;;  %s4125_s21 = scalar_lea.hbm %s4410_s5, %s1770_s12  ;;  %s2080_s4 = sshll.u32 %s2244_s20, 4  ;;  %s2081_s4 = int_to_ptr.vmem [resolvable:$false] %s2080_s4 }
  0xeb   : > { %v436_v37 = vsel %vm433_vm1, %v431_v28, %v429_v16  ;;  %v453_v38 = vsel %vm452_vm2, %v4250_v17, %v4247_v29  ;;  %v605_v55 = vmul.f32 %v2702_v12, %v2789_v46  ;;  %v2811_v56 = vrot.slane %v642_v48, %v2671_v3  ;;  %s2082_s23 = scalar_lea.vmem %s2081_s4, 8192  ;;  %p2083_p6 = scmp.lt.s32.totalorder %s4127_s11, %s2081_s4 }
  0xec   : > { %v442_v41 = vsel %vm427_vm0, %v436_v37, 0.0  ;;  %v2814_v57 = vrot.slane %v668_v50, %v2677_v4  ;;  %v2817_v58 = vrot.slane %v695_v51, %v2671_v3  ;;  %v2820_v59 = vrot.slane %v721_v52, %v2668_v2  ;;  %v2847_v37 = vld [vmem:[%s2645_s18 + $0x8] sm:%s2673_s8]  ;;  %v2864_v50 = vld [vmem:[%s2637_s0 + $0x18] sm:$0xff] }
  0xed   : > { %v579_v54 = vmul.f32 %v2786_v45, %v442_v41  ;;  %v747_v60 = vrot.slane %v2752_v36, %v2677_v4  ;;  %v514_v61 = vsel %vm452_vm2, %v4242_v33, %v4241_v40  ;;  %v631_v63 = vmul.f32 %v2792_v47, %v453_v38  ;;  %v2851_v41 = vld [vmem:[%s2645_s18 + $0x18] sm:%s2673_s8]  ;;  %s2076_s18 = scalar_lea.vmem %s4127_s11, 4096 }
  0xee   : > { %v657_v0 = vmul.f32 %v2811_v56, %v477_v42  ;;  %v683_v15 = vmul.f32 %v2814_v57, %v485_v39  ;;  %v710_v27 = vmul.f32 %v2817_v58, %v2805_v53  ;;  %v2840_v31 = vmul.f32 %v2719_v21, %v2746_v34  ;;  %p2077_p13 = scmp.ne.s32.totalorder %s4127_s11, %s2076_s18  ;;  %p2084_p2 = scmp.lt.s32.totalorder %s2082_s23, %s2076_s18 }
  0xef   : > { %v583_v62 = vadd.f32 %v579_v54, %v556_v49  ;;  %v2843_v32 = vmul.f32 %v2786_v45, %v477_v42  ;;  %v736_v43 = vmul.f32 %v2719_v21, %v2820_v59  ;;  %v2856_v44 = vrot.slane %v747_v60, %v2677_v4  ;;  %v2861_v49 = vld [vmem:[%s2637_s0 + $0x8] sm:$0xff] }
  0xf0   : > { %v909_v48 = vmul.f32 %v2833_v14, %v2746_v34  ;;  %v2867_v42 = vmul.f32 %v2792_v47, %v485_v39  ;;  %v2870_v51 = vmul.f32 %v2814_v57, %v514_v61  ;;  %v917_v52 = vmul.f32 %v2786_v45, %v2805_v53  ;;  %p2078_p8 = pnand %p2077_p13, %p4411_p12  ;;  %p2085_p3 = por %p2084_p2, %p2083_p6 }
  0xf1   : > { %v609_v38 = vadd.f32 %v605_v55, %v583_v62  ;;  %v925_v54 = vmul.f32 %v2719_v21, %v2789_v46  ;;  %v4248_v62 = vrot.slane %v2847_v37, 7  ;;  %v4249_v26 = vrot.slane %v2851_v41, 7 }
  0xf2   : > { %v913_v60 = vadd.f32 %v909_v48, %v2750_v35  ;;  %v4256_v39 = vrot.slane %v2847_v37, 1  ;;  %v4253_v30 = vrot.slane %v2851_v41, 1  ;;  %v4251_v40 = vrot.slane %v2861_v49, 7  ;;  %v2894_v48 = vld [vmem:[%s2637_s0 + $0x38] sm:$0xff]  ;;  %p2079_p11 = pneg %p2078_p8 }
  0xf3   : > { %v635_v55 = vadd.f32 %v631_v63, %v609_v38  ;;  %v4252_v33 = vrot.slane %v2864_v50, 7  ;;  %v437_v63 = vsel %vm433_vm1, %v4249_v26, %v4248_v62  ;;  %v4255_v38 = vrot.slane %v2861_v49, 1 }
  0xf4   : > { %v921_v19 = vadd.f32 %v917_v52, %v913_v60  ;;  %v762_v23 = vmul.f32 %v2856_v44, %v514_v61  ;;  %v933_v29 = vmul.f32 %v2792_v47, %v514_v61  ;;  %v4254_v52 = vrot.slane %v2864_v50, 1  ;;  %p2086_p0 = pnand %p2085_p3, %p2079_p11 }
  0xf5   : > { %v661_v20 = vadd.f32 %v657_v0, %v635_v55  ;;  %v476_v0 = vsel %vm433_vm1, %v4252_v33, %v4251_v40  ;;  %v443_v62 = vsel %vm427_vm0, %v437_v63, 0.0  ;;  %v4257_v26 = vrot.slane %v2884_v24, 7 }
  0xf6   : > { %v929_v60 = vadd.f32 %v925_v54, %v921_v19  ;;  %v454_v61 = vsel %vm452_vm2, %v4256_v39, %v4253_v30  ;;  %v478_v17 = vsel %vm427_vm0, %v476_v0, 0.0  ;;  %v486_v19 = vsel %vm452_vm2, %v4255_v38, %v4254_v52 }
  0xf7   : > { %v687_v55 = vadd.f32 %v683_v15, %v661_v20  ;;  %v4258_v20 = vrot.slane %v2894_v48, 7  ;;  %v4260_v54 = vrot.slane %v2884_v24, 1  ;;  %v4259_v63 = vrot.slane %v2894_v48, 1 }
  0xf8   : > { %v530_v40 = vrot.slane %v2687_v8, %v2680_v5  ;;  %v2927_v33 = vadd.f32 %v933_v29, %v929_v60  ;;  %v2931_v0 = vrot.slane %v2698_v11, %v2668_v2  ;;  %v568_v30 = vrot.slane %v2685_v7, %v2683_v6 }
  0xf9   : > { %v714_v15 = vadd.f32 %v710_v27, %v687_v55  ;;  %v594_v52 = vrot.slane %v2685_v7, %v2680_v5  ;;  %v505_v29 = vsel %vm433_vm1, %v4258_v20, %v4257_v26  ;;  %v620_v11 = vrot.slane %v2685_v7, %v2690_v9 }
  0xfa   : > { %4337 = vst [vmem:[#allocation34_spill] sm:$0xff] %v2927_v33  ;;  %v2944_v55 = vrot.slane %v530_v40, %v2668_v2  ;;  %v2949_v60 = vrot.slane %v568_v30, %v2671_v3  ;;  %v699_v7 = vrot.slane %v2752_v36, %v2683_v6  ;;  %v515_v30 = vsel %vm452_vm2, %v4260_v54, %v4259_v63 }
  0xfb   : > { %v740_v27 = vadd.f32 %v736_v43, %v714_v15  ;;  %v2952_v38 = vrot.slane %v594_v52, %v2668_v2  ;;  %v646_v43 = vrot.slane %v2687_v8, %v2683_v6  ;;  %v672_v15 = vrot.slane %v2687_v8, %v2690_v9 }
  0xfc   : > { %v542_v40 = vmul.f32 %v2944_v55, %v2861_v49  ;;  %v2961_v26 = vrot.slane %v620_v11, %v2677_v4  ;;  %v580_v52 = vmul.f32 %v2949_v60, %v443_v62  ;;  %v2987_v11 = vrot.slane %v699_v7, %v2671_v3  ;;  %v3004_v7 = vld [vmem:[%s2637_s0 + $0x48] sm:$0xff] }
  0xfd   : > { %v766_v39 = vadd.f32 %v762_v23, %v740_v27  ;;  %v2973_v8 = vrot.slane %v646_v43, %v2671_v3  ;;  %v2976_v23 = vrot.slane %v672_v15, %v2677_v4  ;;  %v606_v27 = vmul.f32 %v2847_v37, %v2952_v38 }
  0xfe   : > { %v557_v6 = vadd.f32 %v2931_v0, %v542_v40  ;;  %v725_v62 = vrot.slane %v2752_v36, %v2680_v5  ;;  %v2993_v43 = vsel %vm427_vm0, %v505_v29, 0.0  ;;  %v632_v15 = vmul.f32 %v2961_v26, %v454_v61 }
  0xff   : > { %770 = vst [vmem:[%s2980_s29] sm:$0xff] %v766_v39  ;;  %4338 = vst [vmem:[#allocation35_spill] sm:$0xff] %v2993_v43  ;;  %v658_v20 = vmul.f32 %v2973_v8, %v478_v17  ;;  %v751_v39 = vrot.slane %v2752_v36, %v2690_v9  ;;  %v684_v63 = vmul.f32 %v2976_v23, %v486_v19  ;;  %vm447_vm3 = vcmp.le.s32.totalorder %v2693_v10, 14 }
 0x100   : > { %v584_v40 = vadd.f32 %v580_v52, %v557_v6  ;;  %v3001_v3 = vrot.slane %v725_v62, %v2668_v2  ;;  %v3008_v5 = vmul.f32 %v2884_v24, %v2944_v55  ;;  %v711_v61 = vmul.f32 %v2987_v11, %v2993_v43 }
 0x101   : > { %v3013_v29 = vrot.slane %v751_v39, %v2677_v4  ;;  %v3016_v9 = vmul.f32 %v2949_v60, %v478_v17  ;;  %v910_v36 = vmul.f32 %v3004_v7, %v2944_v55  ;;  %v3021_v52 = vmul.f32 %v2961_v26, %v486_v19 }
 0x102   : > { %v610_v2 = vadd.f32 %v606_v27, %v584_v40  ;;  %v3024_v6 = vmul.f32 %v2976_v23, %v515_v30  ;;  %v918_v62 = vmul.f32 %v2949_v60, %v2993_v43  ;;  %v737_v4 = vmul.f32 %v2884_v24, %v3001_v3 }
 0x103   : > { %4339 = vst [vmem:[#allocation36_spill] sm:$0xff] %v3016_v9  ;;  %4340 = vst [vmem:[#allocation37_spill] sm:$0xff] %v3021_v52  ;;  %v763_v39 = vmul.f32 %v3013_v29, %v515_v30  ;;  %v914_v17 = vadd.f32 %v910_v36, %v2931_v0  ;;  %v926_v54 = vmul.f32 %v2884_v24, %v2952_v38  ;;  %v4342_v40 = vrot.slane %v2702_v12, 1 }
 0x104   : > { %4341 = vst [vmem:[#allocation38_spill] sm:$0xff] %v3024_v6  ;;  %v636_v27 = vadd.f32 %v632_v15, %v610_v2  ;;  %v434_v19 = vsel %vm433_vm1, %v429_v16, %v431_v28  ;;  %v4343_v33 = vrot.slane %v2723_v22, 1  ;;  %v934_v52 = vmul.f32 %v2961_v26, %v515_v30 }
 0x105   : > { %v922_v6 = vadd.f32 %v918_v62, %v914_v17  ;;  %v4344_v15 = vrot.slane %v2714_v18, 7  ;;  %v4345_v2 = vrot.slane %v2705_v13, 7  ;;  %v4346_v16 = vrot.slane %v2705_v13, 1 }
 0x106   : > { %v455_v36 = vsel %vm452_vm2, %v4343_v33, %v4342_v40  ;;  %v4347_v28 = vrot.slane %v2714_v18, 1  ;;  %v662_v9 = vadd.f32 %v658_v20, %v636_v27  ;;  %v4348_v30 = vrot.slane %v2719_v21, 1 }
 0x107   : > { %v473_v43 = vsel %vm433_vm1, %v4345_v2, %v4344_v15  ;;  %v463_v33 = vsel %vm447_vm3, %v455_v36, 0.0  ;;  %v4349_v62 = vrot.slane %v2728_v25, 1  ;;  %v543_v40 = vmul.f32 %v2746_v34, %v2714_v18 }
 0x108   : > { %v487_v12 = vsel %vm452_vm2, %v4347_v28, %v4346_v16  ;;  %v930_v15 = vadd.f32 %v926_v54, %v922_v6  ;;  %v4350_v20 = vrot.slane %v2728_v25, 7  ;;  %v4351_v27 = vrot.slane %v2719_v21, 7 }
 0x109   : > { %v516_v17 = vsel %vm452_vm2, %v4349_v62, %v4348_v30  ;;  %v491_v2 = vsel %vm447_vm3, %v487_v12, 0.0  ;;  %v581_v16 = vmul.f32 %v2786_v45, %v434_v19  ;;  %v688_v28 = vadd.f32 %v684_v63, %v662_v9  ;;  %v3096_v19 = vld [vmem:[%s2637_s0 + $0x50] sm:$0xff] }
 0x10a   : > { %v3078_v36 = vsel %vm433_vm1, %v4351_v27, %v4350_v20  ;;  %v520_v30 = vsel %vm447_vm3, %v516_v17, 0.0  ;;  %v558_v54 = vadd.f32 %v2750_v35, %v543_v40  ;;  %v607_v6 = vmul.f32 %v2723_v22, %v2789_v46 }
 0x10b   : > { %4352 = vst [vmem:[#allocation39_spill] sm:$0xff] %v3078_v36  ;;  %v3086_v12 = vadd.f32 %v934_v52, %v930_v15  ;;  %v633_v62 = vmul.f32 %v2792_v47, %v463_v33  ;;  %v659_v21 = vmul.f32 %v2811_v56, %v473_v43  ;;  %v685_v20 = vmul.f32 %v2814_v57, %v491_v2 }
 0x10c   : > { %v715_v27 = vadd.f32 %v711_v61, %v688_v28  ;;  %v585_v18 = vadd.f32 %v581_v16, %v558_v54  ;;  %v712_v63 = vmul.f32 %v2817_v58, %v3078_v36  ;;  %v738_v9 = vmul.f32 %v2728_v25, %v2820_v59 }
 0x10d   : > { %4353 = vst [vmem:[#allocation40_spill] sm:$0xff] %v3086_v12  ;;  %v764_v22 = vmul.f32 %v2856_v44, %v520_v30  ;;  %v3100_v52 = vmul.f32 %v2786_v45, %v473_v43  ;;  %v911_v33 = vmul.f32 %v3096_v19, %v2746_v34  ;;  %v919_v61 = vmul.f32 %v2786_v45, %v3078_v36 }
 0x10e   : > { %v741_v17 = vadd.f32 %v737_v4, %v715_v27  ;;  %v611_v40 = vadd.f32 %v607_v6, %v585_v18  ;;  %v3107_v15 = vmul.f32 %v2792_v47, %v491_v2  ;;  %v3110_v16 = vmul.f32 %v2814_v57, %v520_v30 }
 0x10f   : > { %4354 = vst [vmem:[#allocation41_spill] sm:$0xff] %v3100_v52  ;;  %v915_v28 = vadd.f32 %v911_v33, %v2750_v35  ;;  %v927_v43 = vmul.f32 %v2728_v25, %v2789_v46  ;;  %v4357_v54 = vrot.slane %v2851_v41, 7  ;;  %v4358_v12 = vrot.slane %v2847_v37, 7 }
 0x110   : > { %4355 = vst [vmem:[#allocation42_spill] sm:$0xff] %v3107_v15  ;;  %4356 = vst [vmem:[#allocation43_spill] sm:$0xff] %v3110_v16  ;;  %v4359_v18 = vrot.slane %v2847_v37, 1  ;;  %v4360_v2 = vrot.slane %v2851_v41, 1  ;;  %v767_v27 = vadd.f32 %v763_v39, %v741_v17  ;;  %v637_v16 = vadd.f32 %v633_v62, %v611_v40 }
 0x111   : > { %v435_v4 = vsel %vm433_vm1, %v4358_v12, %v4357_v54  ;;  %v935_v33 = vmul.f32 %v2792_v47, %v520_v30  ;;  %v4361_v15 = vrot.slane %v2861_v49, 1  ;;  %v4362_v52 = vrot.slane %v2864_v50, 1 }
 0x112   : > { %v456_v6 = vsel %vm452_vm2, %v4360_v2, %v4359_v18  ;;  %v923_v25 = vadd.f32 %v919_v61, %v915_v28  ;;  %v4363_v12 = vrot.slane %v2864_v50, 7  ;;  %v4364_v54 = vrot.slane %v2861_v49, 7  ;;  %771 = vst [vmem:[%s2980_s29 + $0x8] sm:$0xff] %v767_v27 }
 0x113   : > { %v488_v36 = vsel %vm452_vm2, %v4362_v52, %v4361_v15  ;;  %v464_v37 = vsel %vm447_vm3, %v456_v6, 0.0  ;;  %v4365_v30 = vrot.slane %v2884_v24, 1  ;;  %v4366_v62 = vrot.slane %v2894_v48, 1 }
 0x114   : > { %v474_v39 = vsel %vm433_vm1, %v4364_v54, %v4363_v12  ;;  %v663_v52 = vadd.f32 %v659_v21, %v637_v16  ;;  %v492_v61 = vsel %vm447_vm3, %v488_v36, 0.0  ;;  %v544_v40 = vmul.f32 %v2944_v55, %v2864_v50 }
 0x115   : > { %v517_v17 = vsel %vm452_vm2, %v4366_v62, %v4365_v30  ;;  %v582_v15 = vmul.f32 %v2949_v60, %v435_v4  ;;  %v931_v28 = vadd.f32 %v927_v43, %v923_v25  ;;  %v4367_v18 = vrot.slane %v2894_v48, 7 }
 0x116   : > { %v4368_v2 = vrot.slane %v2884_v24, 7  ;;  %v521_v21 = vsel %vm447_vm3, %v517_v17, 0.0  ;;  %v608_v36 = vmul.f32 %v2851_v41, %v2952_v38  ;;  %v689_v16 = vadd.f32 %v685_v20, %v663_v52  ;;  %v3178_v20 = vld [vmem:[%s2637_s0 + $0x58] sm:$0xff] }
 0x117   : > { %v559_v27 = vadd.f32 %v2931_v0, %v544_v40  ;;  %v634_v4 = vmul.f32 %v2961_v26, %v464_v37  ;;  %v660_v25 = vmul.f32 %v2973_v8, %v474_v39  ;;  %v3169_v43 = vadd.f32 %v935_v33, %v931_v28 }
 0x118   : > { %v3160_v6 = vsel %vm433_vm1, %v4368_v2, %v4367_v18  ;;  %v686_v24 = vmul.f32 %v2976_v23, %v492_v61  ;;  %v739_v54 = vmul.f32 %v2894_v48, %v3001_v3  ;;  %v716_v30 = vadd.f32 %v712_v63, %v689_v16 }
 0x119   : > { %4369 = vst [vmem:[#allocation44_spill] sm:$0xff] %v3169_v43  ;;  %v713_v12 = vmul.f32 %v2987_v11, %v3160_v6  ;;  %v586_v62 = vadd.f32 %v582_v15, %v559_v27  ;;  %v765_v41 = vmul.f32 %v3013_v29, %v521_v21  ;;  %v3181_v37 = vmul.f32 %v2949_v60, %v474_v39 }
 0x11a   : > { %v3184_v33 = vmul.f32 %v2961_v26, %v492_v61  ;;  %v912_v17 = vmul.f32 %v3178_v20, %v2944_v55  ;;  %v920_v52 = vmul.f32 %v2949_v60, %v3160_v6  ;;  %v928_v63 = vmul.f32 %v2894_v48, %v2952_v38 }
 0x11b   : > { %v742_v40 = vadd.f32 %v738_v9, %v716_v30  ;;  %v612_v15 = vadd.f32 %v608_v36, %v586_v62  ;;  %v4265_v28 = vrot.slane %v2833_v14, 7  ;;  %v4266_v39 = vrot.slane %v3096_v19, 7 }
 0x11c   : > { %v916_v18 = vadd.f32 %v912_v17, %v2931_v0  ;;  %v4268_v61 = vrot.slane %v2833_v14, 1  ;;  %v4267_v2 = vrot.slane %v3096_v19, 1  ;;  %v807_v16 = vadd.f32 %v2840_v31, %v2750_v35 }
 0x11d   : > { %v768_v27 = vadd.f32 %v764_v22, %v742_v40  ;;  %v638_v43 = vadd.f32 %v634_v4, %v612_v15  ;;  %v785_v9 = vsel %vm433_vm1, %v4266_v39, %v4265_v28  ;;  %v819_v36 = vmul.f32 %v2789_v46, %v2705_v13 }
 0x11e   : > { %v3208_v30 = vmul.f32 %v2976_v23, %v521_v21  ;;  %v924_v62 = vadd.f32 %v920_v52, %v916_v18  ;;  %v3212_v31 = vsel %vm427_vm0, %v785_v9, 0.0  ;;  %v815_v22 = vadd.f32 %v2843_v32, %v807_v16 }
 0x11f   : > { %772 = vst [vmem:[%s2980_s29 + $0x10] sm:$0xff] %v768_v27  ;;  %v664_v4 = vadd.f32 %v660_v25, %v638_v43  ;;  %v936_v17 = vmul.f32 %v2961_v26, %v521_v21  ;;  %v795_v13 = vsel %vm452_vm2, %v4268_v61, %v4267_v2  ;;  %v835_v52 = vmul.f32 %v2811_v56, %v2805_v53  ;;  %v3230_v25 = vld [vmem:[%s2637_s0 + $0x60] sm:$0xff] }
 0x120   : > { %v932_v40 = vadd.f32 %v928_v63, %v924_v62  ;;  %v823_v15 = vadd.f32 %v819_v36, %v815_v22  ;;  %v851_v18 = vmul.f32 %v3212_v31, %v2817_v58  ;;  %v859_v32 = vmul.f32 %v2833_v14, %v2820_v59 }
 0x121   : > { %v690_v21 = vadd.f32 %v686_v24, %v664_v4  ;;  %v867_v43 = vmul.f32 %v795_v13, %v2856_v44  ;;  %v1015_v16 = vmul.f32 %v3230_v25, %v2746_v34  ;;  %v1023_v27 = vmul.f32 %v3212_v31, %v2786_v45 }
 0x122   : > { %v831_v53 = vadd.f32 %v2867_v42, %v823_v15  ;;  %v3239_v63 = vmul.f32 %v795_v13, %v2814_v57  ;;  %v1031_v9 = vmul.f32 %v2833_v14, %v2789_v46  ;;  %v4269_v36 = vrot.slane %v3004_v7, 7 }
 0x123   : > { %v717_v62 = vadd.f32 %v713_v12, %v690_v21  ;;  %v1019_v24 = vadd.f32 %v1015_v16, %v2750_v35  ;;  %v4270_v22 = vrot.slane %v3178_v20, 7  ;;  %v792_v4 = vrot.slane %v3004_v7, 1 }
 0x124   : > { %v839_v28 = vadd.f32 %v835_v52, %v831_v53  ;;  %v794_v39 = vrot.slane %v3178_v20, 1  ;;  %v808_v42 = vadd.f32 %v3008_v5, %v2931_v0  ;;  %v820_v15 = vmul.f32 %v2952_v38, %v2861_v49  ;;  %v4372_v53 = vld [vmem:[#allocation35_spill] sm:$0xff] }
 0x125   : > { %v743_v2 = vadd.f32 %v739_v54, %v717_v62  ;;  %v3252_v61 = vadd.f32 %v936_v17, %v932_v40  ;;  %v1027_v12 = vadd.f32 %v1023_v27, %v1019_v24  ;;  %v786_v52 = vsel %vm433_vm1, %v4270_v22, %v4269_v36  ;;  %v4371_v54 = vld [vmem:[#allocation36_spill] sm:$0xff] }
 0x126   : > { %v847_v21 = vadd.f32 %v2870_v51, %v839_v28  ;;  %v1039_v5 = vmul.f32 %v795_v13, %v2792_v47  ;;  %v3264_v49 = vsel %vm427_vm0, %v786_v52, 0.0  ;;  %v816_v17 = vadd.f32 %v4371_v54, %v808_v42  ;;  %v3276_v13 = vld [vmem:[%s2637_s0 + $0x68] sm:$0xff] }
 0x127   : > { %4370 = vst [vmem:[#allocation45_spill] sm:$0xff] %v3252_v61  ;;  %v769_v40 = vadd.f32 %v765_v41, %v743_v2  ;;  %v1035_v16 = vadd.f32 %v1031_v9, %v1027_v12  ;;  %v796_v27 = vsel %vm452_vm2, %v792_v4, %v794_v39  ;;  %v836_v62 = vmul.f32 %v2973_v8, %v4372_v53  ;;  %v4375_v12 = vld [vmem:[#allocation37_spill] sm:$0xff] }
 0x128   : > { %v855_v24 = vadd.f32 %v851_v18, %v847_v21  ;;  %v824_v36 = vadd.f32 %v820_v15, %v816_v17  ;;  %v852_v51 = vmul.f32 %v3264_v49, %v2987_v11  ;;  %v860_v28 = vmul.f32 %v3004_v7, %v3001_v3 }
 0x129   : > { %773 = vst [vmem:[%s2980_s29 + $0x18] sm:$0xff] %v769_v40  ;;  %v868_v41 = vmul.f32 %v796_v27, %v3013_v29  ;;  %v3281_v2 = vmul.f32 %v796_v27, %v2976_v23  ;;  %v1016_v9 = vmul.f32 %v3276_v13, %v2944_v55  ;;  %v1024_v18 = vmul.f32 %v3264_v49, %v2949_v60 }
 0x12a   : > { %v863_v42 = vadd.f32 %v859_v32, %v855_v24  ;;  %v3287_v15 = vadd.f32 %v1039_v5, %v1035_v16  ;;  %v832_v52 = vadd.f32 %v4375_v12, %v824_v36  ;;  %v1032_v21 = vmul.f32 %v3004_v7, %v2952_v38  ;;  %v4378_v5 = vld [vmem:[#allocation33_spill] sm:$0xff] }
 0x12b   : > { %4373 = vst [vmem:[#allocation36_spill] sm:$0xff] %v3281_v2  ;;  %v1020_v54 = vadd.f32 %v1016_v9, %v2931_v0  ;;  %v1040_v17 = vmul.f32 %v796_v27, %v2961_v26  ;;  %v4376_v40 = vrot.slane %v2833_v14, 1  ;;  %v4377_v53 = vrot.slane %v3096_v19, 1  ;;  %v4381_v27 = vld [vmem:[#allocation32_spill] sm:$0xff] }
 0x12c   : > { %4374 = vst [vmem:[#allocation35_spill] sm:$0xff] %v3287_v15  ;;  %v805_v16 = vmul.f32 %v4378_v5, %v2746_v34  ;;  %v871_v24 = vadd.f32 %v867_v43, %v863_v42  ;;  %v840_v22 = vadd.f32 %v836_v62, %v832_v52  ;;  %v4379_v36 = vrot.slane %v3096_v19, 7  ;;  %v4382_v5 = vld [vmem:[#allocation39_spill] sm:$0xff] }
 0x12d   : > { %v797_v32 = vsel %vm452_vm2, %v4377_v53, %v4376_v40  ;;  %v4380_v12 = vrot.slane %v2833_v14, 7  ;;  %v821_v15 = vmul.f32 %v2789_v46, %v4381_v27  ;;  %v1028_v61 = vadd.f32 %v1024_v18, %v1020_v54  ;;  %v3318_v62 = vld [vmem:[%s2637_s0 + $0x70] sm:$0xff]  ;;  %v4383_v14 = vld [vmem:[#allocation38_spill] sm:$0xff] }
 0x12e   : > { %v801_v40 = vsel %vm447_vm3, %v797_v32, 0.0  ;;  %v809_v53 = vadd.f32 %v805_v16, %v2750_v35  ;;  %v837_v43 = vmul.f32 %v2811_v56, %v4382_v5  ;;  %1718 = vst [vmem:[%s2980_s29 + $0x20] sm:$0xff] %v871_v24  ;;  %v848_v42 = vadd.f32 %v4383_v14, %v840_v22  ;;  %v4384_v32 = vld [vmem:[#allocation41_spill] sm:$0xff] }
 0x12f   : > { %v3308_v9 = vsel %vm433_vm1, %v4380_v12, %v4379_v36  ;;  %v861_v36 = vmul.f32 %v3096_v19, %v2820_v59  ;;  %v1017_v18 = vmul.f32 %v3318_v62, %v2746_v34  ;;  %v1036_v54 = vadd.f32 %v1032_v21, %v1028_v61 }
 0x130   : > { %v853_v52 = vmul.f32 %v3308_v9, %v2817_v58  ;;  %v817_v16 = vadd.f32 %v4384_v32, %v809_v53  ;;  %v869_v12 = vmul.f32 %v801_v40, %v2856_v44  ;;  %v1025_v27 = vmul.f32 %v3308_v9, %v2786_v45 }
 0x131   : > { %v856_v24 = vadd.f32 %v852_v51, %v848_v42  ;;  %v3333_v22 = vmul.f32 %v801_v40, %v2814_v57  ;;  %v1021_v5 = vadd.f32 %v1017_v18, %v2750_v35  ;;  %v1033_v14 = vmul.f32 %v3096_v19, %v2789_v46 }
 0x132   : > { %v825_v2 = vadd.f32 %v821_v15, %v817_v16  ;;  %v1041_v61 = vmul.f32 %v801_v40, %v2792_v47  ;;  %v798_v21 = vsel %vm452_vm2, %v794_v39, %v792_v4  ;;  %v806_v53 = vmul.f32 %v2894_v48, %v2944_v55  ;;  %v4388_v15 = vld [vmem:[#allocation42_spill] sm:$0xff]  ;;  %v3364_v16 = vld [vmem:[%s2637_s0 + $0x78] sm:$0xff] }
 0x133   : > { %4385 = vst [vmem:[#allocation37_spill] sm:$0xff] %v3333_v22  ;;  %v864_v32 = vadd.f32 %v860_v28, %v856_v24  ;;  %v3343_v51 = vadd.f32 %v1040_v17, %v1036_v54  ;;  %v1029_v42 = vadd.f32 %v1025_v27, %v1021_v5  ;;  %v4386_v18 = vrot.slane %v3178_v20, 7 }
 0x134   : > { %v4387_v22 = vrot.slane %v3004_v7, 7  ;;  %v833_v40 = vadd.f32 %v4388_v15, %v825_v2  ;;  %v802_v39 = vsel %vm447_vm3, %v798_v21, 0.0  ;;  %v810_v48 = vadd.f32 %v806_v53, %v2931_v0 }
 0x135   : > { %v822_v4 = vmul.f32 %v2952_v38, %v2864_v50  ;;  %v872_v28 = vadd.f32 %v868_v41, %v864_v32  ;;  %v1037_v17 = vadd.f32 %v1033_v14, %v1029_v42  ;;  %v838_v54 = vmul.f32 %v2973_v8, %v3160_v6 }
 0x136   : > { %v3351_v19 = vsel %vm433_vm1, %v4387_v22, %v4386_v18  ;;  %v841_v27 = vadd.f32 %v837_v43, %v833_v40  ;;  %v818_v2 = vadd.f32 %v3181_v37, %v810_v48  ;;  %v862_v24 = vmul.f32 %v3178_v20, %v3001_v3  ;;  %v4389_v37 = vld [vmem:[#allocation43_spill] sm:$0xff] }
 0x137   : > { %v854_v7 = vmul.f32 %v3351_v19, %v2987_v11  ;;  %v1018_v22 = vmul.f32 %v3364_v16, %v2944_v55  ;;  %1719 = vst [vmem:[%s2980_s29 + $0x28] sm:$0xff] %v872_v28  ;;  %v870_v50 = vmul.f32 %v802_v39, %v3013_v29  ;;  %v3374_v6 = vmul.f32 %v802_v39, %v2976_v23 }
 0x138   : > { %v1026_v41 = vmul.f32 %v3351_v19, %v2949_v60  ;;  %v1034_v43 = vmul.f32 %v3178_v20, %v2952_v38  ;;  %v849_v5 = vadd.f32 %v4389_v37, %v841_v27  ;;  %v826_v14 = vadd.f32 %v822_v4, %v818_v2  ;;  %v3392_v4 = vld [vmem:[%s2637_s0 + $0x80] sm:$0xff] }
 0x139   : > { %v1022_v21 = vadd.f32 %v1018_v22, %v2931_v0  ;;  %v885_v53 = vrot.slane %v3230_v25, 7  ;;  %v887_v32 = vrot.slane %v3318_v62, 7  ;;  %v897_v42 = vrot.slane %v3230_v25, 1  ;;  %v4390_v22 = vld [vmem:[#allocation34_spill] sm:$0xff] }
 0x13a   : > { %v899_v18 = vrot.slane %v3318_v62, 1  ;;  %v941_v15 = vmul.f32 %v3212_v31, %v2811_v56  ;;  %v857_v40 = vadd.f32 %v853_v52, %v849_v5  ;;  %v3388_v48 = vadd.f32 %v1041_v61, %v1037_v17 }
 0x13b   : > { %v834_v20 = vadd.f32 %v3184_v33, %v826_v14  ;;  %v1030_v28 = vadd.f32 %v1026_v41, %v1022_v21  ;;  %v1042_v27 = vmul.f32 %v802_v39, %v2961_v26  ;;  %v891_v2 = vsel %vm433_vm1, %v887_v32, %v885_v53 }
 0x13c   : > { %v945_v37 = vadd.f32 %v941_v15, %v4390_v22  ;;  %v1121_v31 = vmul.f32 %v3392_v4, %v2746_v34  ;;  %v865_v52 = vadd.f32 %v861_v36, %v857_v40  ;;  %v3406_v61 = vsel %vm427_vm0, %v891_v2, 0.0 }
 0x13d   : > { %v842_v33 = vadd.f32 %v838_v54, %v834_v20  ;;  %v965_v39 = vmul.f32 %v3230_v25, %v2820_v59  ;;  %v1038_v17 = vadd.f32 %v1034_v43, %v1030_v28  ;;  %v901_v41 = vsel %vm452_vm2, %v897_v42, %v899_v18 }
 0x13e   : > { %v953_v5 = vadd.f32 %v3239_v63, %v945_v37  ;;  %v957_v36 = vmul.f32 %v3406_v61, %v2817_v58  ;;  %v873_v14 = vadd.f32 %v869_v12, %v865_v52  ;;  %v973_v21 = vmul.f32 %v901_v41, %v2856_v44 }
 0x13f   : > { %v850_v54 = vadd.f32 %v3208_v30, %v842_v33  ;;  %v1125_v15 = vadd.f32 %v1121_v31, %v2750_v35  ;;  %v3421_v43 = vmul.f32 %v901_v41, %v2814_v57  ;;  %v1129_v20 = vmul.f32 %v3406_v61, %v2786_v45  ;;  %v3435_v33 = vld [vmem:[%s2637_s0 + $0x88] sm:$0xff] }
 0x140   : > { %v961_v40 = vadd.f32 %v957_v36, %v953_v5  ;;  %v1137_v63 = vmul.f32 %v3230_v25, %v2789_v46  ;;  %1720 = vst [vmem:[%s2980_s29 + $0x30] sm:$0xff] %v873_v14  ;;  %v886_v12 = vrot.slane %v3276_v13, 7  ;;  %v888_v30 = vrot.slane %v3364_v16, 7 }
 0x141   : > { %v858_v28 = vadd.f32 %v854_v7, %v850_v54  ;;  %v898_v2 = vrot.slane %v3276_v13, 1  ;;  %v1133_v37 = vadd.f32 %v1129_v20, %v1125_v15  ;;  %v900_v31 = vrot.slane %v3364_v16, 1 }
 0x142   : > { %v969_v22 = vadd.f32 %v965_v39, %v961_v40  ;;  %v942_v52 = vmul.f32 %v3264_v49, %v2973_v8  ;;  %v1145_v36 = vmul.f32 %v901_v41, %v2792_v47  ;;  %v892_v7 = vsel %vm433_vm1, %v888_v30, %v886_v12  ;;  %v4391_v41 = vld [vmem:[#allocation40_spill] sm:$0xff] }
 0x143   : > { %v866_v5 = vadd.f32 %v862_v24, %v858_v28  ;;  %v1122_v14 = vmul.f32 %v3435_v33, %v2944_v55  ;;  %v3442_v39 = vadd.f32 %v1042_v27, %v1038_v17  ;;  %v1141_v15 = vadd.f32 %v1137_v63, %v1133_v37 }
 0x144   : > { %v977_v54 = vadd.f32 %v973_v21, %v969_v22  ;;  %v3446_v40 = vsel %vm427_vm0, %v892_v7, 0.0  ;;  %v902_v24 = vsel %vm452_vm2, %v898_v2, %v900_v31  ;;  %v946_v20 = vadd.f32 %v942_v52, %v4391_v41  ;;  %v4392_v22 = vld [vmem:[#allocation36_spill] sm:$0xff] }
 0x145   : > { %v874_v49 = vadd.f32 %v870_v50, %v866_v5  ;;  %v958_v28 = vmul.f32 %v3446_v40, %v2987_v11  ;;  %v966_v27 = vmul.f32 %v3276_v13, %v3001_v3  ;;  %v974_v17 = vmul.f32 %v902_v24, %v3013_v29 }
 0x146   : > { %1726 = vst [vmem:[%s2980_s29 + $0x40] sm:$0xff] %v977_v54  ;;  %v1126_v21 = vadd.f32 %v1122_v14, %v2931_v0  ;;  %v1130_v50 = vmul.f32 %v3446_v40, %v2949_v60  ;;  %v3461_v63 = vadd.f32 %v1145_v36, %v1141_v15  ;;  %v954_v37 = vadd.f32 %v4392_v22, %v946_v20  ;;  %v3484_v15 = vld [vmem:[%s2637_s0 + $0x90] sm:$0xff]  ;;  %v4393_v20 = vld [vmem:[#allocation44_spill] sm:$0xff] }
 0x147   : > { %1721 = vst [vmem:[%s2980_s29 + $0x38] sm:$0xff] %v874_v49  ;;  %v3465_v52 = vmul.f32 %v902_v24, %v2976_v23  ;;  %v1138_v5 = vmul.f32 %v3276_v13, %v2952_v38  ;;  %v3475_v14 = vsel %vm433_vm1, %v885_v53, %v887_v32  ;;  %v903_v36 = vsel %vm452_vm2, %v899_v18, %v897_v42 }
 0x148   : > { %v1134_v7 = vadd.f32 %v1130_v50, %v1126_v21  ;;  %v943_v54 = vmul.f32 %v3308_v9, %v2811_v56  ;;  %v962_v13 = vadd.f32 %v958_v28, %v954_v37  ;;  %v1146_v49 = vmul.f32 %v902_v24, %v2961_v26  ;;  %v4394_v50 = vld [vmem:[#allocation37_spill] sm:$0xff] }
 0x149   : > { %v959_v41 = vmul.f32 %v3475_v14, %v2817_v58  ;;  %v1123_v53 = vmul.f32 %v3484_v15, %v2746_v34  ;;  %v907_v25 = vsel %vm447_vm3, %v903_v36, 0.0  ;;  %v967_v9 = vmul.f32 %v3318_v62, %v2820_v59 }
 0x14a   : > { %v1142_v32 = vadd.f32 %v1138_v5, %v1134_v7  ;;  %v947_v42 = vadd.f32 %v943_v54, %v4393_v20  ;;  %v970_v18 = vadd.f32 %v966_v27, %v962_v13  ;;  %v1131_v24 = vmul.f32 %v3475_v14, %v2786_v45 }
 0x14b   : > { %v1127_v28 = vadd.f32 %v1123_v53, %v2750_v35  ;;  %v1139_v21 = vmul.f32 %v3318_v62, %v2789_v46  ;;  %v975_v37 = vmul.f32 %v907_v25, %v2856_v44  ;;  %v3504_v5 = vmul.f32 %v907_v25, %v2814_v57 }
 0x14c   : > { %v955_v22 = vadd.f32 %v4394_v50, %v947_v42  ;;  %v3508_v27 = vsel %vm433_vm1, %v886_v12, %v888_v30  ;;  %v978_v7 = vadd.f32 %v974_v17, %v970_v18  ;;  %v904_v54 = vsel %vm452_vm2, %v900_v31, %v898_v2  ;;  %v4396_v12 = vld [vmem:[#allocation45_spill] sm:$0xff]  ;;  %v3526_v31 = vld [vmem:[%s2637_s0 + $0x98] sm:$0xff] }
 0x14d   : > { %v1135_v36 = vadd.f32 %v1131_v24, %v1127_v28  ;;  %v944_v62 = vmul.f32 %v3351_v19, %v2973_v8  ;;  %v3514_v13 = vadd.f32 %v1146_v49, %v1142_v32  ;;  %v1147_v20 = vmul.f32 %v907_v25, %v2792_v47 }
 0x14e   : > { %v963_v53 = vadd.f32 %v959_v41, %v955_v22  ;;  %v908_v42 = vsel %vm447_vm3, %v904_v54, 0.0  ;;  %1727 = vst [vmem:[%s2980_s29 + $0x48] sm:$0xff] %v978_v7  ;;  %v960_v17 = vmul.f32 %v3508_v27, %v2987_v11  ;;  %v968_v2 = vmul.f32 %v3364_v16, %v3001_v3 }
 0x14f   : > { %4395 = vst [vmem:[#allocation33_spill] sm:$0xff] %v3514_v13  ;;  %v1143_v50 = vadd.f32 %v1139_v21, %v1135_v36  ;;  %v948_v30 = vadd.f32 %v944_v62, %v4396_v12  ;;  %v976_v49 = vmul.f32 %v908_v42, %v3013_v29  ;;  %v1124_v41 = vmul.f32 %v3526_v31, %v2944_v55 }
 0x150   : > { %v971_v19 = vadd.f32 %v967_v9, %v963_v53  ;;  %v1132_v32 = vmul.f32 %v3508_v27, %v2949_v60  ;;  %v3535_v18 = vmul.f32 %v908_v42, %v2976_v23  ;;  %v1140_v28 = vmul.f32 %v3364_v16, %v2952_v38  ;;  %v3549_v53 = vld [vmem:[%s2637_s0 + $0xa0] sm:$0xff] }
 0x151   : > { %v956_v25 = vadd.f32 %v3374_v6, %v948_v30  ;;  %v991_v9 = vrot.slane %v3392_v4, 7  ;;  %v1128_v21 = vadd.f32 %v1124_v41, %v2931_v0  ;;  %v993_v22 = vrot.slane %v3484_v15, 7 }
 0x152   : > { %v979_v24 = vadd.f32 %v975_v37, %v971_v19  ;;  %v1003_v7 = vrot.slane %v3392_v4, 1  ;;  %v3543_v36 = vadd.f32 %v1147_v20, %v1143_v50  ;;  %v1005_v6 = vrot.slane %v3484_v15, 1 }
 0x153   : > { %v964_v54 = vadd.f32 %v960_v17, %v956_v25  ;;  %v1047_v62 = vmul.f32 %v3406_v61, %v2811_v56  ;;  %v1136_v16 = vadd.f32 %v1132_v32, %v1128_v21  ;;  %v1148_v37 = vmul.f32 %v908_v42, %v2961_v26  ;;  %v4398_v17 = vld [vmem:[#allocation35_spill] sm:$0xff] }
 0x154   : > { %4397 = vst [vmem:[#allocation32_spill] sm:$0xff] %v3543_v36  ;;  %1728 = vst [vmem:[%s2980_s29 + $0x50] sm:$0xff] %v979_v24  ;;  %v997_v12 = vsel %vm433_vm1, %v993_v22, %v991_v9  ;;  %v1227_v30 = vmul.f32 %v3549_v53, %v2746_v34  ;;  %v1071_v19 = vmul.f32 %v3392_v4, %v2820_v59 }
 0x155   : > { %v972_v20 = vadd.f32 %v968_v2, %v964_v54  ;;  %v3559_v50 = vsel %vm427_vm0, %v997_v12, 0.0  ;;  %v1051_v61 = vadd.f32 %v1047_v62, %v4398_v17  ;;  %v1144_v41 = vadd.f32 %v1140_v28, %v1136_v16 }
 0x156   : > { %v1007_v42 = vsel %vm452_vm2, %v1003_v7, %v1005_v6  ;;  %v1063_v32 = vmul.f32 %v3559_v50, %v2817_v58  ;;  %v1243_v2 = vmul.f32 %v3392_v4, %v2789_v46  ;;  %v1231_v21 = vadd.f32 %v1227_v30, %v2750_v35  ;;  %v3584_v30 = vld [vmem:[%s2637_s0 + $0xa8] sm:$0xff] }
 0x157   : > { %v980_v25 = vadd.f32 %v976_v49, %v972_v20  ;;  %v1059_v24 = vadd.f32 %v3421_v43, %v1051_v61  ;;  %v1235_v54 = vmul.f32 %v3559_v50, %v2786_v45  ;;  %v1079_v28 = vmul.f32 %v1007_v42, %v2856_v44 }
 0x158   : > { %v3576_v62 = vmul.f32 %v1007_v42, %v2814_v57  ;;  %v992_v16 = vrot.slane %v3435_v33, 7  ;;  %v994_v12 = vrot.slane %v3526_v31, 7  ;;  %v1004_v49 = vrot.slane %v3435_v33, 1 }
 0x159   : > { %1729 = vst [vmem:[%s2980_s29 + $0x58] sm:$0xff] %v980_v25  ;;  %v1067_v17 = vadd.f32 %v1063_v32, %v1059_v24  ;;  %v1239_v4 = vadd.f32 %v1235_v54, %v1231_v21  ;;  %v1006_v43 = vrot.slane %v3526_v31, 1  ;;  %v1251_v20 = vmul.f32 %v1007_v42, %v2792_v47 }
 0x15a   : > { %v998_v61 = vsel %vm433_vm1, %v994_v12, %v992_v16  ;;  %v1048_v36 = vmul.f32 %v3446_v40, %v2973_v8  ;;  %v1228_v13 = vmul.f32 %v3584_v30, %v2944_v55  ;;  %v3593_v25 = vadd.f32 %v1148_v37, %v1144_v41 }
 0x15b   : > { %v1075_v32 = vadd.f32 %v1071_v19, %v1067_v17  ;;  %v1247_v24 = vadd.f32 %v1243_v2, %v1239_v4  ;;  %v3597_v21 = vsel %vm427_vm0, %v998_v61, 0.0  ;;  %v1008_v42 = vsel %vm452_vm2, %v1004_v49, %v1006_v43 }
 0x15c   : > { %4399 = vst [vmem:[#allocation39_spill] sm:$0xff] %v3593_v25  ;;  %v1052_v54 = vadd.f32 %v1048_v36, %v3343_v51  ;;  %v1064_v40 = vmul.f32 %v3597_v21, %v2987_v11  ;;  %v1072_v37 = vmul.f32 %v3435_v33, %v3001_v3  ;;  %v1080_v19 = vmul.f32 %v1008_v42, %v3013_v29 }
 0x15d   : > { %v1083_v41 = vadd.f32 %v1079_v28, %v1075_v32  ;;  %v1232_v2 = vadd.f32 %v1228_v13, %v2931_v0  ;;  %v1236_v17 = vmul.f32 %v3597_v21, %v2949_v60  ;;  %v3610_v4 = vadd.f32 %v1251_v20, %v1247_v24  ;;  %v3628_v32 = vld [vmem:[%s2637_s0 + $0xb0] sm:$0xff] }
 0x15e   : > { %v1060_v61 = vadd.f32 %v3465_v52, %v1052_v54  ;;  %v3614_v51 = vmul.f32 %v1008_v42, %v2976_v23  ;;  %v1244_v36 = vmul.f32 %v3435_v33, %v2952_v38  ;;  %v3621_v28 = vsel %vm433_vm1, %v991_v9, %v993_v22 }
 0x15f   : > { %1734 = vst [vmem:[%s2980_s29 + $0x60] sm:$0xff] %v1083_v41  ;;  %v1240_v25 = vadd.f32 %v1236_v17, %v1232_v2  ;;  %v1009_v13 = vsel %vm452_vm2, %v1005_v6, %v1003_v7  ;;  %v1049_v20 = vmul.f32 %v3475_v14, %v2811_v56  ;;  %v1252_v24 = vmul.f32 %v1008_v42, %v2961_v26 }
 0x160   : > { %v1068_v52 = vadd.f32 %v1064_v40, %v1060_v61  ;;  %v1065_v33 = vmul.f32 %v3621_v28, %v2817_v58  ;;  %v1229_v54 = vmul.f32 %v3628_v32, %v2746_v34  ;;  %v1013_v9 = vsel %vm447_vm3, %v1009_v13, 0.0 }
 0x161   : > { %v1248_v41 = vadd.f32 %v1244_v36, %v1240_v25  ;;  %v1053_v22 = vadd.f32 %v1049_v20, %v3388_v48  ;;  %v1073_v14 = vmul.f32 %v3484_v15, %v2820_v59  ;;  %v1237_v42 = vmul.f32 %v3621_v28, %v2786_v45 }
 0x162   : > { %v1076_v7 = vadd.f32 %v1072_v37, %v1068_v52  ;;  %v1233_v6 = vadd.f32 %v1229_v54, %v2750_v35  ;;  %v1245_v40 = vmul.f32 %v3484_v15, %v2789_v46  ;;  %v1081_v2 = vmul.f32 %v1013_v9, %v2856_v44 }
 0x163   : > { %v1061_v25 = vadd.f32 %v3504_v5, %v1053_v22  ;;  %v3648_v48 = vmul.f32 %v1013_v9, %v2814_v57  ;;  %v3652_v37 = vsel %vm433_vm1, %v992_v16, %v994_v12  ;;  %v1010_v36 = vsel %vm452_vm2, %v1006_v43, %v1004_v49  ;;  %v3670_v43 = vld [vmem:[%s2637_s0 + $0xb8] sm:$0xff] }
 0x164   : > { %v1084_v17 = vadd.f32 %v1080_v19, %v1076_v7  ;;  %v1241_v61 = vadd.f32 %v1237_v42, %v1233_v6  ;;  %v1050_v15 = vmul.f32 %v3508_v27, %v2973_v8  ;;  %v3658_v13 = vadd.f32 %v1252_v24, %v1248_v41 }
 0x165   : > { %v1069_v5 = vadd.f32 %v1065_v33, %v1061_v25  ;;  %v1253_v20 = vmul.f32 %v1013_v9, %v2792_v47  ;;  %v1014_v52 = vsel %vm447_vm3, %v1010_v36, 0.0  ;;  %v1066_v12 = vmul.f32 %v3652_v37, %v2987_v11 }
 0x166   : > { %1735 = vst [vmem:[%s2980_s29 + $0x68] sm:$0xff] %v1084_v17  ;;  %v1249_v54 = vadd.f32 %v1245_v40, %v1241_v61  ;;  %v1054_v16 = vadd.f32 %v1050_v15, %v3442_v39  ;;  %v1074_v49 = vmul.f32 %v3526_v31, %v3001_v3  ;;  %v1082_v19 = vmul.f32 %v1014_v52, %v3013_v29  ;;  %v3693_v61 = vld [vmem:[%s2637_s0 + $0xc0] sm:$0xff] }
 0x167   : > { %v1077_v27 = vadd.f32 %v1073_v14, %v1069_v5  ;;  %v1230_v24 = vmul.f32 %v3670_v43, %v2944_v55  ;;  %v1238_v33 = vmul.f32 %v3652_v37, %v2949_v60  ;;  %v3679_v41 = vmul.f32 %v1014_v52, %v2976_v23 }
 0x168   : > { %v1062_v39 = vadd.f32 %v3535_v18, %v1054_v16  ;;  %v1246_v9 = vmul.f32 %v3526_v31, %v2952_v38  ;;  %v1097_v22 = vrot.slane %v3549_v53, 7  ;;  %v1099_v6 = vrot.slane %v3628_v32, 7 }
 0x169   : > { %v1085_v14 = vadd.f32 %v1081_v2, %v1077_v27  ;;  %v1234_v7 = vadd.f32 %v1230_v24, %v2931_v0  ;;  %v1109_v42 = vrot.slane %v3549_v53, 1  ;;  %v3687_v40 = vadd.f32 %v1253_v20, %v1249_v54 }
 0x16a   : > { %v1070_v25 = vadd.f32 %v1066_v12, %v1062_v39  ;;  %v1111_v18 = vrot.slane %v3628_v32, 1  ;;  %v1153_v17 = vmul.f32 %v3559_v50, %v2811_v56  ;;  %v1254_v2 = vmul.f32 %v1014_v52, %v2961_v26 }
 0x16b   : > { %1736 = vst [vmem:[%s2980_s29 + $0x70] sm:$0xff] %v1085_v14  ;;  %v1242_v31 = vadd.f32 %v1238_v33, %v1234_v7  ;;  %v1103_v36 = vsel %vm433_vm1, %v1099_v6, %v1097_v22  ;;  %v1333_v15 = vmul.f32 %v3693_v61, %v2746_v34  ;;  %v1177_v54 = vmul.f32 %v3549_v53, %v2820_v59 }
 0x16c   : > { %v1078_v5 = vadd.f32 %v1074_v49, %v1070_v25  ;;  %v3703_v20 = vsel %vm427_vm0, %v1103_v36, 0.0  ;;  %v1157_v50 = vadd.f32 %v1153_v17, %v3461_v63  ;;  %v1113_v52 = vsel %vm452_vm2, %v1109_v42, %v1111_v18  ;;  %v3728_v17 = vld [vmem:[%s2637_s0 + $0xc8] sm:$0xff] }
 0x16d   : > { %v1250_v16 = vadd.f32 %v1246_v9, %v1242_v31  ;;  %v1169_v12 = vmul.f32 %v3703_v20, %v2817_v58  ;;  %v1349_v49 = vmul.f32 %v3549_v53, %v2789_v46  ;;  %v1337_v33 = vadd.f32 %v1333_v15, %v2750_v35  ;;  %4400 = vst [vmem:[#allocation38_spill] sm:$0xff] %v3728_v17 }
 0x16e   : > { %v1086_v27 = vadd.f32 %v1082_v19, %v1078_v5  ;;  %v1165_v24 = vadd.f32 %v3576_v62, %v1157_v50  ;;  %v1341_v63 = vmul.f32 %v3703_v20, %v2786_v45  ;;  %v1185_v39 = vmul.f32 %v1113_v52, %v2856_v44 }
 0x16f   : > { %v3720_v9 = vmul.f32 %v1113_v52, %v2814_v57  ;;  %v1098_v14 = vrot.slane %v3584_v30, 7  ;;  %v1100_v7 = vrot.slane %v3670_v43, 7  ;;  %v1110_v19 = vrot.slane %v3584_v30, 1 }
 0x170   : > { %1737 = vst [vmem:[%s2980_s29 + $0x78] sm:$0xff] %v1086_v27  ;;  %v1173_v25 = vadd.f32 %v1169_v12, %v1165_v24  ;;  %v1345_v53 = vadd.f32 %v1341_v63, %v1337_v33  ;;  %v1112_v62 = vrot.slane %v3670_v43, 1  ;;  %v1357_v31 = vmul.f32 %v1113_v52, %v2792_v47  ;;  %v4402_v33 = vld [vmem:[#allocation33_spill] sm:$0xff] }
 0x171   : > { %v1104_v36 = vsel %vm433_vm1, %v1100_v7, %v1098_v14  ;;  %v1154_v15 = vmul.f32 %v3597_v21, %v2973_v8  ;;  %v1334_v5 = vmul.f32 %v3728_v17, %v2944_v55  ;;  %v3737_v50 = vadd.f32 %v1254_v2, %v1250_v16 }
 0x172   : > { %v1181_v12 = vadd.f32 %v1177_v54, %v1173_v25  ;;  %v1353_v27 = vadd.f32 %v1349_v49, %v1345_v53  ;;  %v3741_v24 = vsel %vm427_vm0, %v1104_v36, 0.0  ;;  %v1114_v52 = vsel %vm452_vm2, %v1110_v19, %v1112_v62 }
 0x173   : > { %4401 = vst [vmem:[#allocation41_spill] sm:$0xff] %v3737_v50  ;;  %v1158_v63 = vadd.f32 %v1154_v15, %v4402_v33  ;;  %v1170_v21 = vmul.f32 %v3741_v24, %v2987_v11  ;;  %v1178_v2 = vmul.f32 %v3584_v30, %v3001_v3  ;;  %v1186_v54 = vmul.f32 %v1114_v52, %v3013_v29 }
 0x174   : > { %v1189_v16 = vadd.f32 %v1185_v39, %v1181_v12  ;;  %v1338_v49 = vadd.f32 %v1334_v5, %v2931_v0  ;;  %v1342_v25 = vmul.f32 %v3741_v24, %v2949_v60  ;;  %v3754_v53 = vadd.f32 %v1357_v31, %v1353_v27  ;;  %v3772_v12 = vld [vmem:[%s2637_s0 + $0xd0] sm:$0xff] }
 0x175   : > { %v1166_v36 = vadd.f32 %v3614_v51, %v1158_v63  ;;  %v3758_v15 = vmul.f32 %v1114_v52, %v2976_v23  ;;  %v1350_v33 = vmul.f32 %v3584_v30, %v2952_v38  ;;  %v3765_v39 = vsel %vm433_vm1, %v1097_v22, %v1099_v6  ;;  %v4403_v6 = vld [vmem:[#allocation32_spill] sm:$0xff] }
 0x176   : > { %1742 = vst [vmem:[%s2980_s29 + $0x80] sm:$0xff] %v1189_v16  ;;  %v1346_v50 = vadd.f32 %v1342_v25, %v1338_v49  ;;  %v1115_v5 = vsel %vm452_vm2, %v1111_v18, %v1109_v42  ;;  %v1155_v31 = vmul.f32 %v3621_v28, %v2811_v56  ;;  %v1358_v27 = vmul.f32 %v1114_v52, %v2961_v26 }
 0x177   : > { %v1174_v51 = vadd.f32 %v1170_v21, %v1166_v36  ;;  %v1171_v30 = vmul.f32 %v3765_v39, %v2817_v58  ;;  %v1335_v63 = vmul.f32 %v3772_v12, %v2746_v34  ;;  %v1119_v22 = vsel %vm447_vm3, %v1115_v5, 0.0 }
 0x178   : > { %v1354_v16 = vadd.f32 %v1350_v33, %v1346_v50  ;;  %v1159_v42 = vadd.f32 %v1155_v31, %v4403_v6  ;;  %v1179_v28 = vmul.f32 %v3628_v32, %v2820_v59  ;;  %v1343_v52 = vmul.f32 %v3765_v39, %v2786_v45 }
 0x179   : > { %v1182_v18 = vadd.f32 %v1178_v2, %v1174_v51  ;;  %v1339_v21 = vadd.f32 %v1335_v63, %v2750_v35  ;;  %v1351_v49 = vmul.f32 %v3628_v32, %v2789_v46  ;;  %v1187_v25 = vmul.f32 %v1119_v22, %v2856_v44 }
 0x17a   : > { %v1167_v50 = vadd.f32 %v3648_v48, %v1159_v42  ;;  %v3792_v36 = vmul.f32 %v1119_v22, %v2814_v57  ;;  %v3796_v2 = vsel %vm433_vm1, %v1098_v14, %v1100_v7  ;;  %v1116_v31 = vsel %vm452_vm2, %v1112_v62, %v1110_v19  ;;  %v4404_v14 = vld [vmem:[#allocation39_spill] sm:$0xff]  ;;  %v3814_v62 = vld [vmem:[%s2637_s0 + $0xd8] sm:$0xff] }
 0x17b   : > { %v1190_v33 = vadd.f32 %v1186_v54, %v1182_v18  ;;  %v1347_v5 = vadd.f32 %v1343_v52, %v1339_v21  ;;  %v1156_v32 = vmul.f32 %v3652_v37, %v2973_v8  ;;  %v3802_v51 = vadd.f32 %v1358_v27, %v1354_v16 }
 0x17c   : > { %v1175_v48 = vadd.f32 %v1171_v30, %v1167_v50  ;;  %v1359_v63 = vmul.f32 %v1119_v22, %v2792_v47  ;;  %v1120_v6 = vsel %vm447_vm3, %v1116_v31, 0.0  ;;  %v1172_v54 = vmul.f32 %v3796_v2, %v2987_v11 }
 0x17d   : > { %1743 = vst [vmem:[%s2980_s29 + $0x88] sm:$0xff] %v1190_v33  ;;  %v1355_v42 = vadd.f32 %v1351_v49, %v1347_v5  ;;  %v1160_v7 = vadd.f32 %v1156_v32, %v4404_v14  ;;  %v1180_v19 = vmul.f32 %v3670_v43, %v3001_v3  ;;  %v1188_v27 = vmul.f32 %v1120_v6, %v3013_v29 }
 0x17e   : > { %v1183_v37 = vadd.f32 %v1179_v28, %v1175_v48  ;;  %v1336_v30 = vmul.f32 %v3814_v62, %v2944_v55  ;;  %v1344_v16 = vmul.f32 %v3796_v2, %v2949_v60  ;;  %v3823_v18 = vmul.f32 %v1120_v6, %v2976_v23 }
 0x17f   : > { %v1168_v22 = vadd.f32 %v3679_v41, %v1160_v7  ;;  %v1352_v21 = vmul.f32 %v3670_v43, %v2952_v38  ;;  %v1203_v52 = vrot.slane %v3693_v61, 7  ;;  %v1205_v50 = vrot.slane %v3772_v12, 7 }
 0x180   : > { %v1191_v28 = vadd.f32 %v1187_v25, %v1183_v37  ;;  %v1340_v49 = vadd.f32 %v1336_v30, %v2931_v0  ;;  %v1215_v33 = vrot.slane %v3693_v61, 1  ;;  %v3831_v5 = vadd.f32 %v1359_v63, %v1355_v42 }
 0x181   : > { %v1176_v31 = vadd.f32 %v1172_v54, %v1168_v22  ;;  %v1217_v41 = vrot.slane %v3772_v12, 1  ;;  %v1259_v32 = vmul.f32 %v3703_v20, %v2811_v56  ;;  %v1209_v43 = vsel %vm433_vm1, %v1205_v50, %v1203_v52 }
 0x182   : > { %1744 = vst [vmem:[%s2980_s29 + $0x90] sm:$0xff] %v1191_v28  ;;  %v1348_v48 = vadd.f32 %v1344_v16, %v1340_v49  ;;  %v1204_v25 = vrot.slane %v3728_v17, 7  ;;  %v1206_v14 = vrot.slane %v3814_v62, 7  ;;  %v1360_v63 = vmul.f32 %v1120_v6, %v2961_v26 }
 0x183   : > { %v1184_v7 = vadd.f32 %v1180_v19, %v1176_v31  ;;  %v3844_v42 = vsel %vm427_vm0, %v1209_v43, 0.0  ;;  %v1263_v54 = vadd.f32 %v1259_v32, %v3610_v4  ;;  %v1219_v37 = vsel %vm452_vm2, %v1215_v33, %v1217_v41 }
 0x184   : > { %v1356_v20 = vadd.f32 %v1352_v21, %v1348_v48  ;;  %v1275_v30 = vmul.f32 %v3844_v42, %v2817_v58  ;;  %v1283_v16 = vmul.f32 %v3693_v61, %v2820_v59  ;;  %v1291_v6 = vmul.f32 %v1219_v37, %v2856_v44 }
 0x185   : > { %v1192_v19 = vadd.f32 %v1188_v27, %v1184_v7  ;;  %v1271_v22 = vadd.f32 %v3720_v9, %v1263_v54  ;;  %v3856_v28 = vmul.f32 %v1219_v37, %v2814_v57  ;;  %v3860_v4 = vmul.f32 %v3844_v42, %v2786_v45 }
 0x186   : > { %v1210_v21 = vsel %vm433_vm1, %v1206_v14, %v1204_v25  ;;  %v1216_v49 = vrot.slane %v3728_v17, 1  ;;  %v1218_v31 = vrot.slane %v3814_v62, 1  ;;  %v3868_v9 = vmul.f32 %v1219_v37, %v2792_v47 }
 0x187   : > { %1745 = vst [vmem:[%s2980_s29 + $0x98] sm:$0xff] %v1192_v19  ;;  %v1279_v27 = vadd.f32 %v1275_v30, %v1271_v22  ;;  %v3872_v32 = vsel %vm427_vm0, %v1210_v21, 0.0  ;;  %v1260_v48 = vmul.f32 %v3741_v24, %v2973_v8  ;;  %v3876_v43 = vadd.f32 %v1360_v63, %v1356_v20  ;;  %v3894_v63 = vld [vmem:[%s2637_s0 + $0xf0] sm:$0xff] }
 0x188   : > { %v1220_v7 = vsel %vm452_vm2, %v1216_v49, %v1218_v31  ;;  %v1276_v54 = vmul.f32 %v3872_v32, %v2987_v11  ;;  %v1284_v30 = vmul.f32 %v3728_v17, %v3001_v3  ;;  %v3887_v22 = vmul.f32 %v3872_v32, %v2949_v60 }
 0x189   : > { %v1287_v37 = vadd.f32 %v1283_v16, %v1279_v27  ;;  %v1264_v19 = vadd.f32 %v1260_v48, %v3658_v13  ;;  %v3891_v24 = vsel %vm433_vm1, %v1203_v52, %v1205_v50  ;;  %v1292_v20 = vmul.f32 %v1220_v7, %v3013_v29 }
 0x18a   : > { %4405 = vst [vmem:[#allocation42_spill] sm:$0xff] %v3887_v22  ;;  %v3898_v21 = vmul.f32 %v1220_v7, %v2976_v23  ;;  %v1221_v16 = vsel %vm452_vm2, %v1217_v41, %v1215_v33  ;;  %v1261_v13 = vmul.f32 %v3765_v39, %v2811_v56  ;;  %v3906_v52 = vmul.f32 %v1220_v7, %v2961_v26 }
 0x18b   : > { %v1295_v27 = vadd.f32 %v1291_v6, %v1287_v37  ;;  %v1272_v48 = vadd.f32 %v3758_v15, %v1264_v19  ;;  %v1277_v50 = vmul.f32 %v3891_v24, %v2817_v58  ;;  %v1225_v17 = vsel %vm447_vm3, %v1221_v16, 0.0 }
 0x18c   : > { %v1265_v22 = vadd.f32 %v1261_v13, %v3687_v40  ;;  %v1285_v33 = vmul.f32 %v3772_v12, %v2820_v59  ;;  %v1436_v39 = vmul.f32 %v3894_v63, %v2746_v34  ;;  %v1293_v41 = vmul.f32 %v1225_v17, %v2856_v44 }
 0x18d   : > { %1750 = vst [vmem:[%s2980_s29 + $0xa0] sm:$0xff] %v1295_v27  ;;  %v1280_v15 = vadd.f32 %v1276_v54, %v1272_v48  ;;  %v3920_v6 = vmul.f32 %v1225_v17, %v2814_v57  ;;  %v1444_v7 = vmul.f32 %v3891_v24, %v2786_v45  ;;  %v1452_v19 = vmul.f32 %v3772_v12, %v2789_v46  ;;  %v3931_v54 = vld [vmem:[%s2637_s0 + $0xf8] sm:$0xff] }
 0x18e   : > { %v1273_v37 = vadd.f32 %v3792_v36, %v1265_v22  ;;  %v1440_v40 = vadd.f32 %v1436_v39, %v2750_v35  ;;  %v1222_v16 = vsel %vm452_vm2, %v1218_v31, %v1216_v49  ;;  %v1460_v27 = vmul.f32 %v1225_v17, %v2792_v47  ;;  %v4406_v47 = vld [vmem:[#allocation41_spill] sm:$0xff] }
 0x18f   : > { %v1288_v13 = vadd.f32 %v1284_v30, %v1280_v15  ;;  %v3936_v48 = vsel %vm433_vm1, %v1204_v25, %v1206_v14  ;;  %v1262_v45 = vmul.f32 %v3796_v2, %v2973_v8  ;;  %v1226_v12 = vsel %vm447_vm3, %v1222_v16, 0.0  ;;  %v1754_v15 = vld [vmem:[%s2637_s0 + $0xe0] sm:$0xff] }
 0x190   : > { %v1281_v36 = vadd.f32 %v1277_v50, %v1273_v37  ;;  %v1448_v22 = vadd.f32 %v1444_v7, %v1440_v40  ;;  %v1278_v49 = vmul.f32 %v3936_v48, %v2987_v11  ;;  %v1286_v25 = vmul.f32 %v3814_v62, %v3001_v3 }
 0x191   : > { %v1296_v31 = vadd.f32 %v1292_v20, %v1288_v13  ;;  %v1266_v17 = vadd.f32 %v1262_v45, %v4406_v47  ;;  %v1437_v14 = vmul.f32 %v3931_v54, %v2944_v55  ;;  %v1294_v50 = vmul.f32 %v1226_v12, %v3013_v29 }
 0x192   : > { %v1289_v30 = vadd.f32 %v1285_v33, %v1281_v36  ;;  %v1456_v2 = vadd.f32 %v1452_v19, %v1448_v22  ;;  %v1445_v39 = vmul.f32 %v3936_v48, %v2949_v60  ;;  %v1453_v37 = vmul.f32 %v3814_v62, %v2952_v38 }
 0x193   : > { %1751 = vst [vmem:[%s2980_s29 + $0xa8] sm:$0xff] %v1296_v31  ;;  %v1274_v20 = vadd.f32 %v3823_v18, %v1266_v17  ;;  %v1441_v7 = vadd.f32 %v1437_v14, %v2931_v0  ;;  %v1309_v40 = vrot.slane %v1754_v15, 7  ;;  %v1461_v33 = vmul.f32 %v1226_v12, %v2961_v26 }
 0x194   : > { %v1297_v16 = vadd.f32 %v1293_v41, %v1289_v30  ;;  %v1311_v19 = vrot.slane %v3894_v63, 7  ;;  %v1321_v13 = vrot.slane %v1754_v15, 1  ;;  %v1323_v60 = vrot.slane %v3894_v63, 1 }
 0x195   : > { %v1282_v45 = vadd.f32 %v1278_v49, %v1274_v20  ;;  %v1449_v36 = vadd.f32 %v1445_v39, %v1441_v7  ;;  %v1365_v18 = vmul.f32 %v3844_v42, %v2811_v56  ;;  %v3965_v22 = vadd.f32 %v1460_v27, %v1456_v2  ;;  %v1755_v42 = vld [vmem:[%s2637_s0 + $0xe8] sm:$0xff] }
 0x196   : > { %1752 = vst [vmem:[%s2980_s29 + $0xb0] sm:$0xff] %v1297_v16  ;;  %v3968_v62 = vmul.f32 %v1226_v12, %v2976_v23  ;;  %v1315_v26 = vsel %vm433_vm1, %v1311_v19, %v1309_v40  ;;  %v1434_v41 = vmul.f32 %v1754_v15, %v2746_v34  ;;  %v1389_v17 = vmul.f32 %v1754_v15, %v2820_v59 }
 0x197   : > { %v1290_v31 = vadd.f32 %v1286_v25, %v1282_v45  ;;  %v1457_v47 = vadd.f32 %v1453_v37, %v1449_v36  ;;  %v1317_v49 = vsel %vm427_vm0, %v1315_v26, 0.0  ;;  %v1325_v27 = vsel %vm452_vm2, %v1321_v13, %v1323_v60 }
 0x198   : > { %v1369_v12 = vadd.f32 %v1365_v18, %v3754_v53  ;;  %v1381_v14 = vmul.f32 %v1317_v49, %v2817_v58  ;;  %v1310_v30 = vrot.slane %v1755_v42, 7  ;;  %v1397_v34 = vmul.f32 %v1325_v27, %v2856_v44 }
 0x199   : > { %v1298_v2 = vadd.f32 %v1294_v50, %v1290_v31  ;;  %v3981_v39 = vadd.f32 %v1461_v33, %v1457_v47  ;;  %v1438_v25 = vadd.f32 %v1434_v41, %v2750_v35  ;;  %v1312_v15 = vrot.slane %v3931_v54, 7 }
 0x19a   : > { %v1377_v20 = vadd.f32 %v3856_v28, %v1369_v12  ;;  %v1322_v7 = vrot.slane %v1755_v42, 1  ;;  %v1324_v37 = vrot.slane %v3931_v54, 1  ;;  %v3990_v53 = vmul.f32 %v1317_v49, %v2811_v56 }
 0x19b   : > { %1753 = vst [vmem:[%s2980_s29 + $0xb8] sm:$0xff] %v1298_v2  ;;  %v3993_v50 = vmul.f32 %v1325_v27, %v2814_v57  ;;  %v1366_v16 = vmul.f32 %v3872_v32, %v2973_v8  ;;  %v1435_v33 = vmul.f32 %v1755_v42, %v2944_v55  ;;  %v1316_v28 = vsel %vm433_vm1, %v1312_v15, %v1310_v30 }
 0x19c   : > { %v1385_v35 = vadd.f32 %v1381_v14, %v1377_v20  ;;  %v1390_v45 = vmul.f32 %v1755_v42, %v3001_v3  ;;  %v1327_v36 = vsel %vm452_vm2, %v1323_v60, %v1321_v13  ;;  %v1318_v18 = vsel %vm427_vm0, %v1316_v28, 0.0  ;;  %v1954_v28 = vld [vmem:[%s2652_s7 + $0x8] sm:%s4005_s30] }
 0x19d   : > { %v1326_v32 = vsel %vm452_vm2, %v1322_v7, %v1324_v37  ;;  %v1370_v55 = vadd.f32 %v1366_v16, %v3802_v51  ;;  %v1313_v26 = vsel %vm433_vm1, %v1309_v40, %v1311_v19  ;;  %v1382_v31 = vmul.f32 %v1318_v18, %v2987_v11 }
 0x19e   : > { %v1393_v41 = vadd.f32 %v1389_v17, %v1385_v35  ;;  %v1398_v13 = vmul.f32 %v1326_v32, %v3013_v29  ;;  %v1439_v60 = vadd.f32 %v1435_v33, %v2931_v0  ;;  %v4019_v49 = vmul.f32 %v1318_v18, %v2973_v8 }
 0x19f   : > { %v1378_v47 = vadd.f32 %v3898_v21, %v1370_v55  ;;  %v1331_v51 = vsel %vm447_vm3, %v1327_v36, 0.0  ;;  %v1367_v40 = vmul.f32 %v3891_v24, %v2811_v56  ;;  %v4026_v17 = vmul.f32 %v1326_v32, %v2976_v23 }
 0x1a0   : > { %v1401_v19 = vadd.f32 %v1397_v34, %v1393_v41  ;;  %v1383_v42 = vmul.f32 %v1313_v26, %v2817_v58  ;;  %v1391_v0 = vmul.f32 %v3894_v63, %v2820_v59  ;;  %v1399_v12 = vmul.f32 %v1331_v51, %v2856_v44 }
 0x1a1   : > { %v1386_v21 = vadd.f32 %v1382_v31, %v1378_v47  ;;  %v1371_v27 = vadd.f32 %v1367_v40, %v3831_v5  ;;  %v1314_v14 = vsel %vm433_vm1, %v1310_v30, %v1312_v15  ;;  %v1468_v24 = vmul.f32 %v1313_v26, %v2811_v56  ;;  %v1948_v5 = vld [vmem:[%s2652_s7] sm:%s4005_s30]  ;;  %v1951_v15 = vld [vmem:[%s2652_s7 + $0x10] sm:%s4005_s30] }
 0x1a2   : > { %1758 = vst [vmem:[%s2980_s29 + $0xc0] sm:$0xff] %v1401_v19  ;;  %v4038_v2 = vmul.f32 %v1331_v51, %v2814_v57  ;;  %v1328_v34 = vsel %vm452_vm2, %v1324_v37, %v1322_v7  ;;  %v1368_v63 = vmul.f32 %v3936_v48, %v2973_v8  ;;  %v1384_v30 = vmul.f32 %v1314_v14, %v2987_v11 }
 0x1a3   : > { %v1394_v20 = vadd.f32 %v1390_v45, %v1386_v21  ;;  %v1379_v16 = vadd.f32 %v3920_v6, %v1371_v27  ;;  %v1392_v56 = vmul.f32 %v3931_v54, %v3001_v3  ;;  %v1332_v57 = vsel %vm447_vm3, %v1328_v34, 0.0  ;;  %v4408_v21 = vld [vmem:[#allocation38_spill] sm:$0xff] }
 0x1a4   : > { %v1372_v7 = vadd.f32 %v1368_v63, %v3876_v43  ;;  %v1469_v48 = vmul.f32 %v1314_v14, %v2973_v8  ;;  %v1410_v35 = vrot.slane %v1948_v5, 7  ;;  %v1412_v45 = vrot.slane %v1951_v15, 7  ;;  %v1957_v8 = vld [vmem:[%s2652_s7 + $0x18] sm:%s4005_s30] }
 0x1a5   : > { %v1402_v37 = vadd.f32 %v1398_v13, %v1394_v20  ;;  %v1387_v33 = vadd.f32 %v1383_v42, %v1379_v16  ;;  %v1422_v36 = vrot.slane %v1948_v5, 1  ;;  %v1424_v18 = vrot.slane %v1951_v15, 1  ;;  %v4407_v42 = vld [vmem:[#allocation42_spill] sm:$0xff] }
 0x1a6   : > { %v1380_v6 = vadd.f32 %v3968_v62, %v1372_v7  ;;  %v1400_v32 = vmul.f32 %v1332_v57, %v3013_v29  ;;  %v1446_v55 = vadd.f32 %v3860_v4, %v1438_v25  ;;  %v1450_v43 = vmul.f32 %v3693_v61, %v2789_v46 }
 0x1a7   : > { %1759 = vst [vmem:[%s2980_s29 + $0xc8] sm:$0xff] %v1402_v37  ;;  %v1395_v54 = vadd.f32 %v1391_v0, %v1387_v33  ;;  %v1477_v41 = vmul.f32 %v1332_v57, %v2976_v23  ;;  %v1416_v62 = vsel %vm433_vm1, %v1412_v45, %v1410_v35  ;;  %v1411_v31 = vrot.slane %v1954_v28, 7 }
 0x1a8   : > { %v1388_v26 = vadd.f32 %v1384_v30, %v1380_v6  ;;  %v1426_v47 = vsel %vm452_vm2, %v1422_v36, %v1424_v18  ;;  %v1454_v51 = vadd.f32 %v1450_v43, %v1446_v55  ;;  %v1490_v40 = vmul.f32 %v1948_v5, %v2820_v59 }
 0x1a9   : > { %v1403_v13 = vadd.f32 %v1399_v12, %v1395_v54  ;;  %v1418_v4 = vsel %vm427_vm0, %v1416_v62, 0.0  ;;  %v1413_v46 = vrot.slane %v1957_v8, 7  ;;  %v1423_v61 = vrot.slane %v1954_v28, 1 }
 0x1aa   : > { %v1396_v19 = vadd.f32 %v1392_v56, %v1388_v26  ;;  %v1462_v23 = vadd.f32 %v3868_v9, %v1454_v51  ;;  %v1425_v25 = vrot.slane %v1957_v8, 1  ;;  %v1447_v0 = vadd.f32 %v4407_v42, %v1439_v60 }
 0x1ab   : > { %1760 = vst [vmem:[%s2980_s29 + $0xd0] sm:$0xff] %v1403_v13  ;;  %v1451_v27 = vmul.f32 %v4408_v21, %v2952_v38  ;;  %v1498_v14 = vmul.f32 %v1426_v47, %v2856_v44  ;;  %v1417_v34 = vsel %vm433_vm1, %v1413_v46, %v1411_v31  ;;  %v1414_v63 = vsel %vm433_vm1, %v1410_v35, %v1412_v45 }
 0x1ac   : > { %v1404_v12 = vadd.f32 %v1400_v32, %v1396_v19  ;;  %v1470_v5 = vadd.f32 %v3990_v53, %v1462_v23  ;;  %v1482_v9 = vmul.f32 %v1418_v4, %v2817_v58  ;;  %v1419_v60 = vsel %vm427_vm0, %v1417_v34, 0.0 }
 0x1ad   : > { %v1455_v20 = vadd.f32 %v1451_v27, %v1447_v0  ;;  %v1427_v38 = vsel %vm452_vm2, %v1423_v61, %v1425_v25  ;;  %v1491_v16 = vmul.f32 %v1954_v28, %v3001_v3  ;;  %v1428_v30 = vsel %vm452_vm2, %v1424_v18, %v1422_v36 }
 0x1ae   : > { %1761 = vst [vmem:[%s2980_s29 + $0xd8] sm:$0xff] %v1404_v12  ;;  %v1472_v56 = vadd.f32 %v1468_v24, %v3965_v22  ;;  %v1478_v57 = vadd.f32 %v3993_v50, %v1470_v5  ;;  %v1432_v7 = vsel %vm447_vm3, %v1428_v30, 0.0  ;;  %v1484_v37 = vmul.f32 %v1414_v63, %v2817_v58 }
 0x1af   : > { %v1463_v53 = vadd.f32 %v3906_v52, %v1455_v20  ;;  %v1483_v33 = vmul.f32 %v1419_v60, %v2987_v11  ;;  %v1492_v28 = vmul.f32 %v1951_v15, %v2820_v59  ;;  %v1415_v22 = vsel %vm433_vm1, %v1411_v31, %v1413_v46 }
 0x1b0   : > { %v1480_v35 = vadd.f32 %v4038_v2, %v1472_v56  ;;  %v1486_v24 = vadd.f32 %v1482_v9, %v1478_v57  ;;  %v1429_v52 = vsel %vm452_vm2, %v1425_v25, %v1423_v61  ;;  %v1473_v6 = vadd.f32 %v1469_v48, %v3981_v39 }
 0x1b1   : > { %v1471_v50 = vadd.f32 %v4019_v49, %v1463_v53  ;;  %v1500_v45 = vmul.f32 %v1432_v7, %v2856_v44  ;;  %v1433_v2 = vsel %vm447_vm3, %v1429_v52, 0.0  ;;  %v1485_v59 = vmul.f32 %v1415_v22, %v2987_v11 }
 0x1b2   : > { %v1488_v58 = vadd.f32 %v1484_v37, %v1480_v35  ;;  %v1494_v15 = vadd.f32 %v1490_v40, %v1486_v24  ;;  %v1481_v36 = vadd.f32 %v1477_v41, %v1473_v6  ;;  %v1493_v1 = vmul.f32 %v1957_v8, %v3001_v3 }
 0x1b3   : > { %v1479_v49 = vadd.f32 %v4026_v17, %v1471_v50  ;;  %v1499_v39 = vmul.f32 %v1427_v38, %v3013_v29  ;;  %v1501_v54 = vmul.f32 %v1433_v2, %v3013_v29 }
 0x1b4   : > { %v1496_v48 = vadd.f32 %v1492_v28, %v1488_v58  ;;  %v1502_v18 = vadd.f32 %v1498_v14, %v1494_v15  ;;  %v1489_v10 = vadd.f32 %v1485_v59, %v1481_v36 }
 0x1b5   : > { %v1487_v44 = vadd.f32 %v1483_v33, %v1479_v49 }
 0x1b6   : > { %v1504_v11 = vadd.f32 %v1500_v45, %v1496_v48  ;;  %1762 = vst [vmem:[%s2980_s29 + $0xe0] sm:$0xff] %v1502_v18  ;;  %v1497_v32 = vadd.f32 %v1493_v1, %v1489_v10 }
 0x1b7   : > { %v1495_v17 = vadd.f32 %v1491_v16, %v1487_v44 }
 0x1b8   : > { %1764 = vst [vmem:[%s2980_s29 + $0xf0] sm:$0xff] %v1504_v11  ;;  %v1505_v29 = vadd.f32 %v1501_v54, %v1497_v32 }
 0x1b9   : > { %v1503_v3 = vadd.f32 %v1499_v39, %v1495_v17 }
 0x1ba   : > { %1765 = vst [vmem:[%s2980_s29 + $0xf8] sm:$0xff] %v1505_v29 }
 0x1bb   : > { %1763 = vst [vmem:[%s2980_s29 + $0xe8] sm:$0xff] %v1503_v3 }
 0x1bc   : > { %2089 = shalt.err (!%p2086_p0)
}
 0x1bd   : > { %s2090_s7 = scalar_lea.hbm %s4125_s21, 4096  ;;  %s2094_s19 = scalar_lea.hbm %s4410_s5, 16384 }
 0x1be   : > { %p2091_p9 = scmp.ne.s32.totalorder %s4125_s21, %s2090_s7  ;;  %p2095_p10 = scmp.lt.u32.totalorder %s4125_s21, %s4410_s5 }
 0x1bf   : > { %p2096_p7 = scmp.lt.u32.totalorder %s2094_s19, %s2090_s7  ;;  %p2098_p13 = scmp.lt.u32.totalorder %s2090_s7, %s4125_s21 }
 0x1c0   : > { %p2092_p5 = pnand %p2091_p9, %p4411_p12 }
 0x1c1   : > { %p2097_p1 = por %p2096_p7, %p2095_p10 }
 0x1c2   : > { %p2093_p4 = pneg %p2092_p5 }
 0x1c3   : > { %p2099_p8 = por %p2098_p13, %p2097_p1 }
 0x1c5   : > { %p2100_p11 = pnand %p2099_p8, %p2093_p4 }
 0x1c7   : > { %2103 = shalt.err (!%p2100_p11)
}
 0x1c8   : > { %s2245_s29 = smov 256   ;;  %s2246_s30 = smov 16  }
 0x1c9   : > { %1791 = dma.vmem_to_hbm [thread:$0]  (%p4411_p12), %s4127_s11, 4096, %s4125_s21, %s1512_s14, %s2245_s29, %s2245_s29, %s2246_s30  }
 0x1ca PF: > { %s4412_s3 = sld [smem:[#allocation31_spill]]  ;;  %p1814_p6 = scmp.ge.s32.totalorder %s2234_s6, 2 }
 0x1cb   : > { %s1543_s17 = sand.u32 1, %s2206_s24  }
 0x1cc   : > { %s1544_s1 = scalar_lea.sflag [#allocation4], %s1543_s17 }
 0x1d0   : > { %p4413_p2 = scmp.ne.s32.totalorder %s4412_s3, 0 }
 0x1d2   : > { %p1808_p3 = pnand %p1814_p6, %p4413_p2 }
 0x1d4   : > { %2177 = dma.done.wait (!%p1808_p3), %s1544_s1, 4096  }
 0x1d5   : > { %2179 = vsyncadd (!%p1808_p3), %s1544_s1, 4294963200  ;;  %s25_s6 = sadd.s32 1, %s2234_s6   ;;  %s4415_s18 = sld [smem:[#allocation17_spill]] }
 0x1d6   : > { %p4160_p0 = scmp.ge.s32.totalorder %s25_s6, 6   ;;  %s4416_s19 = sld [smem:[#allocation18_spill]] }
 0x1d7   : > { %s4417_s13 = sld [smem:[#allocation19_spill]]  ;;  %s4418_s23 = sld [smem:[#allocation29_spill]] }
 0x1d8   : > { %s4419_s10 = sld [smem:[#allocation20_spill]]  ;;  %s4420_s26 = sld [smem:[#allocation30_spill]] }
 0x1d9   : > { %s4421_s12 = sld [smem:[#allocation23_spill]]  ;;  %s4422_s28 = sld [smem:[#allocation24_spill]] }
 0x1da   : > { %s4423_s29 = sld [smem:[#allocation25_spill]]  ;;  %s4424_s30 = sld [smem:[#allocation26_spill]] }
 0x1db   : > { %s4426_s20 = smov %s4447_s9  ;;  %s4427_s21 = smov %s2198_s22 }
 0x1dc   : > { %s4429_s24 = smov %s2210_s25  ;;  %24 = sbr.rel (!%p4160_p0) target bundleno = 20 (0x14), region = 127 }
 0x1dd   : > { %s4428_s22 = smov %s4417_s13 }
 0x1de   : > { %s4430_s25 = smov %s4419_s10 }
 0x1df   : > { %s4431_s27 = smov %s4421_s12 }
 0x1e3   :  { %1549 = vsyncpa [#allocation3], 1 }
 0x1e4   :  { %1551 = vsyncpa [#allocation3 + $0x1], 1 }
 0x1e5   :  { %1552 = vsyncpa [#allocation6], 1 }
 0x1e6   :  { %1554 = vsyncpa [#allocation6 + $0x1], 1 }
 0x1e7   :  { %1555 = vsyncpa [#allocation9], 1 }
 0x1e8   :  { %1556 = vsyncpa [#allocation4], 1 }
 0x1e9   :  { %1558 = vsyncpa [#allocation4 + $0x1], 1 }

</bundles_post_ra>
